<compile_context>
chip_gen: v5e
topology: v5e:2x2
jax: 0.10.0
libtpu: 0.0.40
codegen_flags: <defaults>
</compile_context>

<pallas_src>
import math
import numpy as np
import jax
import jax.numpy as jnp
from jax import lax
from jax.experimental import pallas as pl
from jax.experimental.pallas import tpu as pltpu

# ------------------------- model hyper-parameters -------------------------
BETA = 0.9          # leak factor of every Leaky neuron
AN_UTH = 0.5        # AuditoryNerve threshold (kwargs['an_uth'])
THR = 1.0           # threshold of the remaining Leaky neurons
STELI_STD = (0.5, 0.3, 0.1)   # kwargs['steli_std'] for OSF_b / OSF_m / OSF_n
GTF_FS = 16000.0    # kwargs['gtf_fs']
GTF_FR = 100.0      # kwargs['gtf_fr'] (unused by this synthetic filterbank)
GTF_BF = 100.0      # kwargs['gtf_bf'] (lowest center frequency)
IHC_WIN = 16        # kwargs['ihc_win']

LANE = 128
SUBLANE = 8
NSPIKE = 5          # spike-fed layers: OSF_b, OSF_m, OSF_n, IC, AC
DELAY = NSPIKE      # wavefront: AC output for timestep t is produced at wave t+DELAY


def _round_up(a, m):
    return ((a + m - 1) // m) * m


# ------------------------- cochlea + IHC (plain JAX glue) ------------------
def gammatone_bank(num_ch, fs, f_low, klen=64, order=4):
    def hz_to_erb(f):
        return 21.4 * np.log10(4.37e-3 * f + 1.0)

    def erb_to_hz(e):
        return (10.0 ** (e / 21.4) - 1.0) / 4.37e-3

    erbs = np.linspace(hz_to_erb(f_low), hz_to_erb(0.45 * fs), num_ch)
    cfs = erb_to_hz(erbs)
    t = np.arange(klen) / fs
    bw = 1.019 * 24.7 * (4.37 * cfs / 1000.0 + 1.0)
    ir = (t[None, :] ** (order - 1)
          * np.exp(-2.0 * np.pi * bw[:, None] * t[None, :])
          * np.cos(2.0 * np.pi * cfs[:, None] * t[None, :]))
    ir = ir / (np.max(np.abs(ir), axis=1, keepdims=True) + 1e-8)
    return jnp.asarray(ir, jnp.float32)          # (C, K)


def cochlea_ihc(waveform, num_ch, fs, f_low, ihc_win):
    # waveform: (B, L) float32  ->  features (B, T, C)
    B, L = waveform.shape
    ir = gammatone_bank(num_ch, fs, f_low)                       # (C, K)
    out = lax.conv_general_dilated(
        waveform[:, None, :], ir[:, None, :],
        window_strides=(1,), padding="SAME",
        dimension_numbers=("NCH", "OIH", "NCH"))                 # (B, C, L)
    out = jnp.maximum(out, 0.0)                                  # half-wave rectify
    T = L // ihc_win
    out = out[:, :, : T * ihc_win].reshape(B, num_ch, T, ihc_win).mean(-1)
    return jnp.transpose(out, (0, 2, 1))                         # (B, T, C)


# ------------------------- Pallas SNN recurrence kernel --------------------
def run_snn(x_btc, params):
    """x_btc: (B, T, C) features; params: dict of (Wt, b) with Wt pre-transposed."""
    B, T, C = x_btc.shape
    O = params["wac"].shape[1]
    # TODO(synk): generalize the lane-dense output packing when O does not divide 128.
    assert 0 < O <= LANE and LANE % O == 0, "out_features must divide 128"
    GROUP = LANE // O                       # waves packed per 128-lane output row

    Bp = _round_up(B, SUBLANE)              # batch padded to sublane multiple
    Wp = _round_up(T + DELAY, GROUP)        # wave axis: time + pipeline fill/drain
    Wg = Wp // GROUP
    KW = (NSPIKE - 1) * C + O               # concatenated RHS width: 4C + O

    # ---------------- wrapper-side layout prep (cheap XLA glue) ----------------
    x = jnp.transpose(x_btc, (1, 0, 2)).astype(jnp.float32)      # (T, B, C)
    x = jnp.pad(x, ((0, Wp - T), (0, Bp - B), (0, 0)))           # (Wp, Bp, C)
    # spikes are exact in bf16; features lose only mantissa -> bf16 MXU inputs.
    x = x.astype(jnp.bfloat16).reshape(Wg, GROUP * Bp, C)        # row-major: free

    w_an = params["wan"].astype(jnp.bfloat16)                    # (C, C)
    b_an = params["ban"].astype(jnp.float32)                     # (1, C)
    w_cat = jnp.concatenate(
        [params["wb"], params["wm"], params["wn"], params["wic"], params["wac"]],
        axis=1).astype(jnp.bfloat16)                             # (C, 4C+O)
    b_cat = jnp.concatenate(
        [params["bb"], params["bm"], params["bn"], params["bic"], params["bac"]],
        axis=1).astype(jnp.float32)                              # (1, 4C+O)

    def kernel(x_ref, wan_ref, ban_ref, wcat_ref, bcat_ref,
               spk_out_ref, mem_out_ref,
               spk_c_ref, mem_c_ref, spk_ac_ref, mem_ac_ref):
        g = pl.program_id(0)

        @pl.when(g == 0)
        def _init():
            spk_c_ref[...] = jnp.zeros_like(spk_c_ref)
            mem_c_ref[...] = jnp.zeros_like(mem_c_ref)
            spk_ac_ref[...] = jnp.zeros_like(spk_ac_ref)
            mem_ac_ref[...] = jnp.zeros_like(mem_ac_ref)

        # ---- per-group invariants (hoisted out of the wave loop) ----
        w_cat_v = wcat_ref[...]                                   # (C, 4C+O) bf16
        b_cat_b = jnp.broadcast_to(bcat_ref[...], (NSPIKE * Bp, KW))
        # AN pre-synaptic current has no recurrent dependence: one bf16 matmul
        # covering all GROUP waves of this grid step.
        syn_an_g = jnp.dot(x_ref[0], wan_ref[...],
                           preferred_element_type=jnp.float32) + ban_ref[...]

        wave0 = g * GROUP
        for k in range(GROUP):                                    # unrolled
            w_idx = wave0 + k                                     # wave index (traced)
            wv_c = jnp.full((Bp, C), w_idx, jnp.int32)
            wv_o = jnp.full((Bp, O), w_idx, jnp.int32)

            slab = spk_c_ref[...]          # previous-wave spikes [AN; B; M; N; IC]
            mems = mem_c_ref[...]          # previous-wave membranes, same layout
            # ONE wavefront matmul feeds all 5 spike-fed layers (diagonal blocks).
            res = jnp.dot(slab.astype(jnp.bfloat16), w_cat_v,
                          preferred_element_type=jnp.float32) + b_cat_b

            # ---- layer 0: AuditoryNerve (uth = fire & subtract threshold) ----
            m_old = mems[0:Bp]
            s_old = slab[0:Bp]
            m_new = BETA * m_old + syn_an_g[k * Bp:(k + 1) * Bp] - s_old * AN_UTH
            s_new = (m_new > AN_UTH).astype(jnp.float32)
            mem_c_ref[pl.ds(0, Bp), :] = m_new
            spk_c_ref[pl.ds(0, Bp), :] = s_new

            # ---- layers 1..4: OSF_b, OSF_m, OSF_n, IC (time-staggered) ----
            for l in range(1, NSPIKE):
                syn = res[(l - 1) * Bp:l * Bp, (l - 1) * C:l * C]
                m_old = mems[l * Bp:(l + 1) * Bp]
                s_old = slab[l * Bp:(l + 1) * Bp]
                m_new = BETA * m_old + syn - s_old * THR
                s_new = (m_new > THR).astype(jnp.float32)
                valid = wv_c >= l                     # pipeline-fill mask
                m_new = jnp.where(valid, m_new, m_old)
                s_new = jnp.where(valid, s_new, s_old)
                mem_c_ref[pl.ds(l * Bp, Bp), :] = m_new
                spk_c_ref[pl.ds(l * Bp, Bp), :] = s_new

            # ---- layer 5: AudioCortex (consumes previous-wave IC spikes) ----
            syn = res[(NSPIKE - 1) * Bp:NSPIKE * Bp,
                      (NSPIKE - 1) * C:(NSPIKE - 1) * C + O]
            m_old = mem_ac_ref[...]
            s_old = spk_ac_ref[...]
            m_new = BETA * m_old + syn - s_old * THR
            s_new = (m_new > THR).astype(jnp.float32)
            valid = wv_o >= NSPIKE
            m_new = jnp.where(valid, m_new, m_old)
            s_new = jnp.where(valid, s_new, s_old)
            mem_ac_ref[...] = m_new
            spk_ac_ref[...] = s_new
            # lane-packed, batch-major output slot for this wave
            spk_out_ref[:, pl.ds(k * O, O)] = s_new
            mem_out_ref[:, pl.ds(k * O, O)] = m_new

    grid_spec = pltpu.PrefetchScalarGridSpec(
        num_scalar_prefetch=0,
        grid=(Wg,),
        in_specs=[
            pl.BlockSpec((1, GROUP * Bp, C), lambda g: (g, 0, 0)),   # streamed features
            pl.BlockSpec(w_an.shape, lambda g: (0, 0)),              # loop-invariant
            pl.BlockSpec(b_an.shape, lambda g: (0, 0)),
            pl.BlockSpec(w_cat.shape, lambda g: (0, 0)),
            pl.BlockSpec(b_cat.shape, lambda g: (0, 0)),
        ],
        out_specs=[
            pl.BlockSpec((Bp, GROUP * O), lambda g: (0, g)),         # lane-dense, batch-major
            pl.BlockSpec((Bp, GROUP * O), lambda g: (0, g)),
        ],
        scratch_shapes=[
            pltpu.VMEM((NSPIKE * Bp, C), jnp.float32),   # spikes   [AN; B; M; N; IC]
            pltpu.VMEM((NSPIKE * Bp, C), jnp.float32),   # membranes, same layout
            pltpu.VMEM((Bp, O), jnp.float32),            # AC spike
            pltpu.VMEM((Bp, O), jnp.float32),            # AC membrane
        ])

    spk, mem = pl.pallas_call(
        kernel,
        out_shape=(jax.ShapeDtypeStruct((Bp, Wp * O), jnp.float32),
                   jax.ShapeDtypeStruct((Bp, Wp * O), jnp.float32)),
        grid_spec=grid_spec,
        compiler_params=pltpu.CompilerParams(
            dimension_semantics=("arbitrary",)),      # state carried across grid steps
    )(x, w_an, b_an, w_cat, b_cat)

    # batch-major lane-packed -> (B, T, O): pure reshape + slice (de-stagger by DELAY).
    spk = spk.reshape(Bp, Wp, O)[:B, DELAY:DELAY + T]
    mem = mem.reshape(Bp, Wp, O)[:B, DELAY:DELAY + T]
    return spk, mem


# ------------------------- parameter init (deterministic) ------------------
def init_params(key, in_features, out_features):
    ks = jax.random.split(key, 12)

    def linear(kw, kb, fan_in, fan_out, std=None):
        if std is None:
            bound = 1.0 / math.sqrt(fan_in)
            w = jax.random.uniform(kw, (fan_out, fan_in), jnp.float32, -bound, bound)
        else:
            w = std * jax.random.normal(kw, (fan_out, fan_in), jnp.float32)
        b = jax.random.uniform(kb, (1, fan_out), jnp.float32,
                               -1.0 / math.sqrt(fan_in), 1.0 / math.sqrt(fan_in))
        return w.T, b        # pre-transposed: syn = x @ Wt + b

    C, O = in_features, out_features
    p = {}
    p["wan"], p["ban"] = linear(ks[0], ks[1], C, C)
    p["wb"], p["bb"] = linear(ks[2], ks[3], C, C, std=STELI_STD[0])
    p["wm"], p["bm"] = linear(ks[4], ks[5], C, C, std=STELI_STD[1])
    p["wn"], p["bn"] = linear(ks[6], ks[7], C, C, std=STELI_STD[2])
    p["wic"], p["bic"] = linear(ks[8], ks[9], C, C)
    p["wac"], p["bac"] = linear(ks[10], ks[11], C, O)
    return p


# ------------------------- full forward ------------------------------------
def net_forward(waveform, params, in_features):
    feats = cochlea_ihc(waveform, in_features, GTF_FS, GTF_BF, IHC_WIN)  # (B, T, C)
    spk_ac, mem_ac = run_snn(feats, params)
    return spk_ac, mem_ac


if __name__ == "__main__":
    IN_FEATURES = 32
    OUT_FEATURES = 16
    B = 2
    L = 128                       # raw waveform length -> T = L // IHC_WIN = 8

    key = jax.random.PRNGKey(0)
    k_wave, k_params = jax.random.split(key)
    waveform = jax.random.normal(k_wave, (B, L), jnp.float32)
    params = init_params(k_params, IN_FEATURES, OUT_FEATURES)

    spk_ac, mem_ac = net_forward(waveform, params, IN_FEATURES)
    jax.block_until_ready((spk_ac, mem_ac))

    assert spk_ac.shape == (B, L // IHC_WIN, OUT_FEATURES)
    assert mem_ac.shape == (B, L // IHC_WIN, OUT_FEATURES)
    print("KERNEL_OK")
</pallas_src>

<mosaic_0001>
module attributes {stable_mosaic.version = 11 : i64} {
  func.func @kernel(%arg0: i32, %arg1: memref<1x64x32xbf16, #tpu.memory_space<vmem>>, %arg2: memref<32x32xbf16, #tpu.memory_space<vmem>>, %arg3: memref<1x32xf32, #tpu.memory_space<vmem>>, %arg4: memref<32x144xbf16, #tpu.memory_space<vmem>>, %arg5: memref<1x144xf32, #tpu.memory_space<vmem>>, %arg6: memref<8x128xf32, #tpu.memory_space<vmem>>, %arg7: memref<8x128xf32, #tpu.memory_space<vmem>>, %arg8: memref<40x32xf32, #tpu.memory_space<vmem>>, %arg9: memref<40x32xf32, #tpu.memory_space<vmem>>, %arg10: memref<8x16xf32, #tpu.memory_space<vmem>>, %arg11: memref<8x16xf32, #tpu.memory_space<vmem>>) attributes {dimension_semantics = [#tpu.dimension_semantics<arbitrary>], iteration_bounds = array<i64: 2>, scalar_prefetch = 0 : i64, scratch_operands = 4 : i64, tpu.core_type = #tpu.core_type<tc>, window_params = [{transform_indices = @transform_0, window_bounds = array<i64: 1, 64, 32>}, {pipeline_mode = #tpu.pipeline_mode<synchronous>, transform_indices = @transform_1, window_bounds = array<i64: 32, 32>}, {pipeline_mode = #tpu.pipeline_mode<synchronous>, transform_indices = @transform_2, window_bounds = array<i64: 1, 32>}, {pipeline_mode = #tpu.pipeline_mode<synchronous>, transform_indices = @transform_3, window_bounds = array<i64: 32, 144>}, {pipeline_mode = #tpu.pipeline_mode<synchronous>, transform_indices = @transform_4, window_bounds = array<i64: 1, 144>}, {transform_indices = @transform_5, window_bounds = array<i64: 8, 128>}, {transform_indices = @transform_6, window_bounds = array<i64: 8, 128>}]} {
    %c0_i32 = arith.constant 0 : i32
    %0 = arith.cmpi eq, %arg0, %c0_i32 : i32
    %1 = arith.extui %0 : i1 to i32
    %c0_i32_0 = arith.constant 0 : i32
    %2 = arith.cmpi ne, %1, %c0_i32_0 : i32
    scf.if %2 {
      %cst_483 = arith.constant 0.000000e+00 : f32
      %975 = vector.broadcast %cst_483 : f32 to vector<40x32xf32>
      %c0_484 = arith.constant 0 : index
      %c0_485 = arith.constant 0 : index
      %976 = vector.load %arg8[%c0_484, %c0_485] : memref<40x32xf32, #tpu.memory_space<vmem>>, vector<40x32xf32>
      tpu.vector_store %arg8[%c0_484, %c0_485], %975 {strides = array<i32>} : memref<40x32xf32, #tpu.memory_space<vmem>>, vector<40x32xf32>,
      %cst_486 = arith.constant 0.000000e+00 : f32
      %977 = vector.broadcast %cst_486 : f32 to vector<40x32xf32>
      %c0_487 = arith.constant 0 : index
      %c0_488 = arith.constant 0 : index
      %978 = vector.load %arg9[%c0_487, %c0_488] : memref<40x32xf32, #tpu.memory_space<vmem>>, vector<40x32xf32>
      tpu.vector_store %arg9[%c0_487, %c0_488], %977 {strides = array<i32>} : memref<40x32xf32, #tpu.memory_space<vmem>>, vector<40x32xf32>,
      %cst_489 = arith.constant 0.000000e+00 : f32
      %979 = vector.broadcast %cst_489 : f32 to vector<8x16xf32>
      %c0_490 = arith.constant 0 : index
      %c0_491 = arith.constant 0 : index
      %980 = vector.load %arg10[%c0_490, %c0_491] : memref<8x16xf32, #tpu.memory_space<vmem>>, vector<8x16xf32>
      tpu.vector_store %arg10[%c0_490, %c0_491], %979 {strides = array<i32>} : memref<8x16xf32, #tpu.memory_space<vmem>>, vector<8x16xf32>,
      %cst_492 = arith.constant 0.000000e+00 : f32
      %981 = vector.broadcast %cst_492 : f32 to vector<8x16xf32>
      %c0_493 = arith.constant 0 : index
      %c0_494 = arith.constant 0 : index
      %982 = vector.load %arg11[%c0_493, %c0_494] : memref<8x16xf32, #tpu.memory_space<vmem>>, vector<8x16xf32>
      tpu.vector_store %arg11[%c0_493, %c0_494], %981 {strides = array<i32>} : memref<8x16xf32, #tpu.memory_space<vmem>>, vector<8x16xf32>,
    } else {
    }
    %c0 = arith.constant 0 : index
    %c0_1 = arith.constant 0 : index
    %3 = vector.load %arg4[%c0, %c0_1] : memref<32x144xbf16, #tpu.memory_space<vmem>>, vector<32x144xbf16>
    %c0_2 = arith.constant 0 : index
    %c0_3 = arith.constant 0 : index
    %4 = vector.load %arg5[%c0_2, %c0_3] : memref<1x144xf32, #tpu.memory_space<vmem>>, vector<1x144xf32>
    %5 = vector.shape_cast %4 : vector<1x144xf32> to vector<1x144xf32>
    %6 = vector.broadcast %5 : vector<1x144xf32> to vector<40x144xf32>
    %c0_4 = arith.constant 0 : index
    %c0_5 = arith.constant 0 : index
    %c0_6 = arith.constant 0 : index
    %7 = vector.load %arg1[%c0_4, %c0_5, %c0_6] : memref<1x64x32xbf16, #tpu.memory_space<vmem>>, vector<1x64x32xbf16>
    %8 = vector.shape_cast %7 : vector<1x64x32xbf16> to vector<64x32xbf16>
    %c0_7 = arith.constant 0 : index
    %c0_8 = arith.constant 0 : index
    %9 = vector.load %arg2[%c0_7, %c0_8] : memref<32x32xbf16, #tpu.memory_space<vmem>>, vector<32x32xbf16>
    %cst = arith.constant dense<0.000000e+00> : vector<64x32xf32>
    %10 = tpu.matmul %8, %9, %cst {dimension_numbers = #tpu.dot_dimension_numbers<[1], [0], [0], [1], [0, 0, 1, 1], [], []>} : vector<64x32xbf16>, vector<32x32xbf16>, vector<64x32xf32> -> vector<64x32xf32>
    %c0_9 = arith.constant 0 : index
    %c0_10 = arith.constant 0 : index
    %11 = vector.load %arg3[%c0_9, %c0_10] : memref<1x32xf32, #tpu.memory_space<vmem>>, vector<1x32xf32>
    %12 = vector.broadcast %11 : vector<1x32xf32> to vector<64x32xf32>
    %13 = arith.addf %10, %12 : vector<64x32xf32>
    %c8_i32 = arith.constant 8 : i32
    %14 = arith.muli %arg0, %c8_i32 : i32
    %c0_i32_11 = arith.constant 0 : i32
    %15 = arith.addi %14, %c0_i32_11 : i32
    %16 = vector.broadcast %15 : i32 to vector<8x32xi32>
    %17 = vector.broadcast %15 : i32 to vector<8x16xi32>
    %c0_12 = arith.constant 0 : index
    %c0_13 = arith.constant 0 : index
    %18 = vector.load %arg8[%c0_12, %c0_13] : memref<40x32xf32, #tpu.memory_space<vmem>>, vector<40x32xf32>
    %c0_14 = arith.constant 0 : index
    %c0_15 = arith.constant 0 : index
    %19 = vector.load %arg9[%c0_14, %c0_15] : memref<40x32xf32, #tpu.memory_space<vmem>>, vector<40x32xf32>
    %20 = arith.truncf %18 : vector<40x32xf32> to vector<40x32xbf16>
    %cst_16 = arith.constant dense<0.000000e+00> : vector<40x144xf32>
    %21 = tpu.matmul %20, %3, %cst_16 {dimension_numbers = #tpu.dot_dimension_numbers<[1], [0], [0], [1], [0, 0, 1, 1], [], []>} : vector<40x32xbf16>, vector<32x144xbf16>, vector<40x144xf32> -> vector<40x144xf32>
    %22 = arith.addf %21, %6 : vector<40x144xf32>
    %23 = vector.extract_strided_slice %19 {offsets = [0, 0], sizes = [8, 32], strides = [1, 1]} : vector<40x32xf32> to vector<8x32xf32>
    %24 = vector.extract_strided_slice %18 {offsets = [0, 0], sizes = [8, 32], strides = [1, 1]} : vector<40x32xf32> to vector<8x32xf32>
    %cst_17 = arith.constant 0.899999976 : f32
    %25 = vector.broadcast %cst_17 : f32 to vector<8x32xf32>
    %26 = arith.mulf %25, %23 : vector<8x32xf32>
    %27 = vector.extract_strided_slice %13 {offsets = [0, 0], sizes = [8, 32], strides = [1, 1]} : vector<64x32xf32> to vector<8x32xf32>
    %28 = arith.addf %26, %27 : vector<8x32xf32>
    %cst_18 = arith.constant 5.000000e-01 : f32
    %29 = vector.broadcast %cst_18 : f32 to vector<8x32xf32>
    %30 = arith.mulf %24, %29 : vector<8x32xf32>
    %31 = arith.subf %28, %30 : vector<8x32xf32>
    %cst_19 = arith.constant 5.000000e-01 : f32
    %32 = vector.broadcast %cst_19 : f32 to vector<8x32xf32>
    %33 = arith.cmpf ogt, %31, %32 : vector<8x32xf32>
    %34 = arith.extui %33 : vector<8x32xi1> to vector<8x32xi32>
    %35 = arith.sitofp %34 : vector<8x32xi32> to vector<8x32xf32>
    %c0_20 = arith.constant 0 : index
    %c0_21 = arith.constant 0 : index
    %36 = vector.load %arg9[%c0_20, %c0_21] : memref<40x32xf32, #tpu.memory_space<vmem>>, vector<8x32xf32>
    tpu.vector_store %arg9[%c0_20, %c0_21], %31 {strides = array<i32>} : memref<40x32xf32, #tpu.memory_space<vmem>>, vector<8x32xf32>,
    %c0_22 = arith.constant 0 : index
    %c0_23 = arith.constant 0 : index
    %37 = vector.load %arg8[%c0_22, %c0_23] : memref<40x32xf32, #tpu.memory_space<vmem>>, vector<8x32xf32>
    tpu.vector_store %arg8[%c0_22, %c0_23], %35 {strides = array<i32>} : memref<40x32xf32, #tpu.memory_space<vmem>>, vector<8x32xf32>,
    %38 = vector.extract_strided_slice %22 {offsets = [0, 0], sizes = [8, 32], strides = [1, 1]} : vector<40x144xf32> to vector<8x32xf32>
    %39 = vector.extract_strided_slice %19 {offsets = [8, 0], sizes = [8, 32], strides = [1, 1]} : vector<40x32xf32> to vector<8x32xf32>
    %40 = vector.extract_strided_slice %18 {offsets = [8, 0], sizes = [8, 32], strides = [1, 1]} : vector<40x32xf32> to vector<8x32xf32>
    %cst_24 = arith.constant 0.899999976 : f32
    %41 = vector.broadcast %cst_24 : f32 to vector<8x32xf32>
    %42 = arith.mulf %41, %39 : vector<8x32xf32>
    %43 = arith.addf %42, %38 : vector<8x32xf32>
    %cst_25 = arith.constant 1.000000e+00 : f32
    %44 = vector.broadcast %cst_25 : f32 to vector<8x32xf32>
    %45 = arith.mulf %40, %44 : vector<8x32xf32>
    %46 = arith.subf %43, %45 : vector<8x32xf32>
    %cst_26 = arith.constant 1.000000e+00 : f32
    %47 = vector.broadcast %cst_26 : f32 to vector<8x32xf32>
    %48 = arith.cmpf ogt, %46, %47 : vector<8x32xf32>
    %49 = arith.extui %48 : vector<8x32xi1> to vector<8x32xi32>
    %50 = arith.sitofp %49 : vector<8x32xi32> to vector<8x32xf32>
    %c1_i32 = arith.constant 1 : i32
    %51 = vector.broadcast %c1_i32 : i32 to vector<8x32xi32>
    %52 = arith.cmpi sge, %16, %51 : vector<8x32xi32>
    %53 = arith.select %52, %46, %39 : vector<8x32xi1>, vector<8x32xf32>
    %54 = arith.select %52, %50, %40 : vector<8x32xi1>, vector<8x32xf32>
    %c8 = arith.constant 8 : index
    %c0_27 = arith.constant 0 : index
    %55 = vector.load %arg9[%c8, %c0_27] : memref<40x32xf32, #tpu.memory_space<vmem>>, vector<8x32xf32>
    tpu.vector_store %arg9[%c8, %c0_27], %53 {strides = array<i32>} : memref<40x32xf32, #tpu.memory_space<vmem>>, vector<8x32xf32>,
    %c8_28 = arith.constant 8 : index
    %c0_29 = arith.constant 0 : index
    %56 = vector.load %arg8[%c8_28, %c0_29] : memref<40x32xf32, #tpu.memory_space<vmem>>, vector<8x32xf32>
    tpu.vector_store %arg8[%c8_28, %c0_29], %54 {strides = array<i32>} : memref<40x32xf32, #tpu.memory_space<vmem>>, vector<8x32xf32>,
    %57 = vector.extract_strided_slice %22 {offsets = [8, 32], sizes = [8, 32], strides = [1, 1]} : vector<40x144xf32> to vector<8x32xf32>
    %58 = vector.extract_strided_slice %19 {offsets = [16, 0], sizes = [8, 32], strides = [1, 1]} : vector<40x32xf32> to vector<8x32xf32>
    %59 = vector.extract_strided_slice %18 {offsets = [16, 0], sizes = [8, 32], strides = [1, 1]} : vector<40x32xf32> to vector<8x32xf32>
    %cst_30 = arith.constant 0.899999976 : f32
    %60 = vector.broadcast %cst_30 : f32 to vector<8x32xf32>
    %61 = arith.mulf %60, %58 : vector<8x32xf32>
    %62 = arith.addf %61, %57 : vector<8x32xf32>
    %cst_31 = arith.constant 1.000000e+00 : f32
    %63 = vector.broadcast %cst_31 : f32 to vector<8x32xf32>
    %64 = arith.mulf %59, %63 : vector<8x32xf32>
    %65 = arith.subf %62, %64 : vector<8x32xf32>
    %cst_32 = arith.constant 1.000000e+00 : f32
    %66 = vector.broadcast %cst_32 : f32 to vector<8x32xf32>
    %67 = arith.cmpf ogt, %65, %66 : vector<8x32xf32>
    %68 = arith.extui %67 : vector<8x32xi1> to vector<8x32xi32>
    %69 = arith.sitofp %68 : vector<8x32xi32> to vector<8x32xf32>
    %c2_i32 = arith.constant 2 : i32
    %70 = vector.broadcast %c2_i32 : i32 to vector<8x32xi32>
    %71 = arith.cmpi sge, %16, %70 : vector<8x32xi32>
    %72 = arith.select %71, %65, %58 : vector<8x32xi1>, vector<8x32xf32>
    %73 = arith.select %71, %69, %59 : vector<8x32xi1>, vector<8x32xf32>
    %c16 = arith.constant 16 : index
    %c0_33 = arith.constant 0 : index
    %74 = vector.load %arg9[%c16, %c0_33] : memref<40x32xf32, #tpu.memory_space<vmem>>, vector<8x32xf32>
    tpu.vector_store %arg9[%c16, %c0_33], %72 {strides = array<i32>} : memref<40x32xf32, #tpu.memory_space<vmem>>, vector<8x32xf32>,
    %c16_34 = arith.constant 16 : index
    %c0_35 = arith.constant 0 : index
    %75 = vector.load %arg8[%c16_34, %c0_35] : memref<40x32xf32, #tpu.memory_space<vmem>>, vector<8x32xf32>
    tpu.vector_store %arg8[%c16_34, %c0_35], %73 {strides = array<i32>} : memref<40x32xf32, #tpu.memory_space<vmem>>, vector<8x32xf32>,
    %76 = vector.extract_strided_slice %22 {offsets = [16, 64], sizes = [8, 32], strides = [1, 1]} : vector<40x144xf32> to vector<8x32xf32>
    %77 = vector.extract_strided_slice %19 {offsets = [24, 0], sizes = [8, 32], strides = [1, 1]} : vector<40x32xf32> to vector<8x32xf32>
    %78 = vector.extract_strided_slice %18 {offsets = [24, 0], sizes = [8, 32], strides = [1, 1]} : vector<40x32xf32> to vector<8x32xf32>
    %cst_36 = arith.constant 0.899999976 : f32
    %79 = vector.broadcast %cst_36 : f32 to vector<8x32xf32>
    %80 = arith.mulf %79, %77 : vector<8x32xf32>
    %81 = arith.addf %80, %76 : vector<8x32xf32>
    %cst_37 = arith.constant 1.000000e+00 : f32
    %82 = vector.broadcast %cst_37 : f32 to vector<8x32xf32>
    %83 = arith.mulf %78, %82 : vector<8x32xf32>
    %84 = arith.subf %81, %83 : vector<8x32xf32>
    %cst_38 = arith.constant 1.000000e+00 : f32
    %85 = vector.broadcast %cst_38 : f32 to vector<8x32xf32>
    %86 = arith.cmpf ogt, %84, %85 : vector<8x32xf32>
    %87 = arith.extui %86 : vector<8x32xi1> to vector<8x32xi32>
    %88 = arith.sitofp %87 : vector<8x32xi32> to vector<8x32xf32>
    %c3_i32 = arith.constant 3 : i32
    %89 = vector.broadcast %c3_i32 : i32 to vector<8x32xi32>
    %90 = arith.cmpi sge, %16, %89 : vector<8x32xi32>
    %91 = arith.select %90, %84, %77 : vector<8x32xi1>, vector<8x32xf32>
    %92 = arith.select %90, %88, %78 : vector<8x32xi1>, vector<8x32xf32>
    %c24 = arith.constant 24 : index
    %c0_39 = arith.constant 0 : index
    %93 = vector.load %arg9[%c24, %c0_39] : memref<40x32xf32, #tpu.memory_space<vmem>>, vector<8x32xf32>
    tpu.vector_store %arg9[%c24, %c0_39], %91 {strides = array<i32>} : memref<40x32xf32, #tpu.memory_space<vmem>>, vector<8x32xf32>,
    %c24_40 = arith.constant 24 : index
    %c0_41 = arith.constant 0 : index
    %94 = vector.load %arg8[%c24_40, %c0_41] : memref<40x32xf32, #tpu.memory_space<vmem>>, vector<8x32xf32>
    tpu.vector_store %arg8[%c24_40, %c0_41], %92 {strides = array<i32>} : memref<40x32xf32, #tpu.memory_space<vmem>>, vector<8x32xf32>,
    %95 = vector.extract_strided_slice %22 {offsets = [24, 96], sizes = [8, 32], strides = [1, 1]} : vector<40x144xf32> to vector<8x32xf32>
    %96 = vector.extract_strided_slice %19 {offsets = [32, 0], sizes = [8, 32], strides = [1, 1]} : vector<40x32xf32> to vector<8x32xf32>
    %97 = vector.extract_strided_slice %18 {offsets = [32, 0], sizes = [8, 32], strides = [1, 1]} : vector<40x32xf32> to vector<8x32xf32>
    %cst_42 = arith.constant 0.899999976 : f32
    %98 = vector.broadcast %cst_42 : f32 to vector<8x32xf32>
    %99 = arith.mulf %98, %96 : vector<8x32xf32>
    %100 = arith.addf %99, %95 : vector<8x32xf32>
    %cst_43 = arith.constant 1.000000e+00 : f32
    %101 = vector.broadcast %cst_43 : f32 to vector<8x32xf32>
    %102 = arith.mulf %97, %101 : vector<8x32xf32>
    %103 = arith.subf %100, %102 : vector<8x32xf32>
    %cst_44 = arith.constant 1.000000e+00 : f32
    %104 = vector.broadcast %cst_44 : f32 to vector<8x32xf32>
    %105 = arith.cmpf ogt, %103, %104 : vector<8x32xf32>
    %106 = arith.extui %105 : vector<8x32xi1> to vector<8x32xi32>
    %107 = arith.sitofp %106 : vector<8x32xi32> to vector<8x32xf32>
    %c4_i32 = arith.constant 4 : i32
    %108 = vector.broadcast %c4_i32 : i32 to vector<8x32xi32>
    %109 = arith.cmpi sge, %16, %108 : vector<8x32xi32>
    %110 = arith.select %109, %103, %96 : vector<8x32xi1>, vector<8x32xf32>
    %111 = arith.select %109, %107, %97 : vector<8x32xi1>, vector<8x32xf32>
    %c32 = arith.constant 32 : index
    %c0_45 = arith.constant 0 : index
    %112 = vector.load %arg9[%c32, %c0_45] : memref<40x32xf32, #tpu.memory_space<vmem>>, vector<8x32xf32>
    tpu.vector_store %arg9[%c32, %c0_45], %110 {strides = array<i32>} : memref<40x32xf32, #tpu.memory_space<vmem>>, vector<8x32xf32>,
    %c32_46 = arith.constant 32 : index
    %c0_47 = arith.constant 0 : index
    %113 = vector.load %arg8[%c32_46, %c0_47] : memref<40x32xf32, #tpu.memory_space<vmem>>, vector<8x32xf32>
    tpu.vector_store %arg8[%c32_46, %c0_47], %111 {strides = array<i32>} : memref<40x32xf32, #tpu.memory_space<vmem>>, vector<8x32xf32>,
    %114 = vector.extract_strided_slice %22 {offsets = [32, 128], sizes = [8, 16], strides = [1, 1]} : vector<40x144xf32> to vector<8x16xf32>
    %c0_48 = arith.constant 0 : index
    %c0_49 = arith.constant 0 : index
    %115 = vector.load %arg11[%c0_48, %c0_49] : memref<8x16xf32, #tpu.memory_space<vmem>>, vector<8x16xf32>
    %c0_50 = arith.constant 0 : index
    %c0_51 = arith.constant 0 : index
    %116 = vector.load %arg10[%c0_50, %c0_51] : memref<8x16xf32, #tpu.memory_space<vmem>>, vector<8x16xf32>
    %cst_52 = arith.constant 0.899999976 : f32
    %117 = vector.broadcast %cst_52 : f32 to vector<8x16xf32>
    %118 = arith.mulf %117, %115 : vector<8x16xf32>
    %119 = arith.addf %118, %114 : vector<8x16xf32>
    %cst_53 = arith.constant 1.000000e+00 : f32
    %120 = vector.broadcast %cst_53 : f32 to vector<8x16xf32>
    %121 = arith.mulf %116, %120 : vector<8x16xf32>
    %122 = arith.subf %119, %121 : vector<8x16xf32>
    %cst_54 = arith.constant 1.000000e+00 : f32
    %123 = vector.broadcast %cst_54 : f32 to vector<8x16xf32>
    %124 = arith.cmpf ogt, %122, %123 : vector<8x16xf32>
    %125 = arith.extui %124 : vector<8x16xi1> to vector<8x16xi32>
    %126 = arith.sitofp %125 : vector<8x16xi32> to vector<8x16xf32>
    %c5_i32 = arith.constant 5 : i32
    %127 = vector.broadcast %c5_i32 : i32 to vector<8x16xi32>
    %128 = arith.cmpi sge, %17, %127 : vector<8x16xi32>
    %129 = arith.select %128, %122, %115 : vector<8x16xi1>, vector<8x16xf32>
    %130 = arith.select %128, %126, %116 : vector<8x16xi1>, vector<8x16xf32>
    %c0_55 = arith.constant 0 : index
    %c0_56 = arith.constant 0 : index
    %131 = vector.load %arg11[%c0_55, %c0_56] : memref<8x16xf32, #tpu.memory_space<vmem>>, vector<8x16xf32>
    tpu.vector_store %arg11[%c0_55, %c0_56], %129 {strides = array<i32>} : memref<8x16xf32, #tpu.memory_space<vmem>>, vector<8x16xf32>,
    %c0_57 = arith.constant 0 : index
    %c0_58 = arith.constant 0 : index
    %132 = vector.load %arg10[%c0_57, %c0_58] : memref<8x16xf32, #tpu.memory_space<vmem>>, vector<8x16xf32>
    tpu.vector_store %arg10[%c0_57, %c0_58], %130 {strides = array<i32>} : memref<8x16xf32, #tpu.memory_space<vmem>>, vector<8x16xf32>,
    %c0_59 = arith.constant 0 : index
    %c0_60 = arith.constant 0 : index
    %133 = vector.load %arg6[%c0_59, %c0_60] : memref<8x128xf32, #tpu.memory_space<vmem>>, vector<8x16xf32>
    tpu.vector_store %arg6[%c0_59, %c0_60], %130 {strides = array<i32>} : memref<8x128xf32, #tpu.memory_space<vmem>>, vector<8x16xf32>,
    %c0_61 = arith.constant 0 : index
    %c0_62 = arith.constant 0 : index
    %134 = vector.load %arg7[%c0_61, %c0_62] : memref<8x128xf32, #tpu.memory_space<vmem>>, vector<8x16xf32>
    tpu.vector_store %arg7[%c0_61, %c0_62], %129 {strides = array<i32>} : memref<8x128xf32, #tpu.memory_space<vmem>>, vector<8x16xf32>,
    %c1_i32_63 = arith.constant 1 : i32
    %135 = arith.addi %14, %c1_i32_63 : i32
    %136 = vector.broadcast %135 : i32 to vector<8x32xi32>
    %137 = vector.broadcast %135 : i32 to vector<8x16xi32>
    %c0_64 = arith.constant 0 : index
    %c0_65 = arith.constant 0 : index
    %138 = vector.load %arg8[%c0_64, %c0_65] : memref<40x32xf32, #tpu.memory_space<vmem>>, vector<40x32xf32>
    %c0_66 = arith.constant 0 : index
    %c0_67 = arith.constant 0 : index
    %139 = vector.load %arg9[%c0_66, %c0_67] : memref<40x32xf32, #tpu.memory_space<vmem>>, vector<40x32xf32>
    %140 = arith.truncf %138 : vector<40x32xf32> to vector<40x32xbf16>
    %cst_68 = arith.constant dense<0.000000e+00> : vector<40x144xf32>
    %141 = tpu.matmul %140, %3, %cst_68 {dimension_numbers = #tpu.dot_dimension_numbers<[1], [0], [0], [1], [0, 0, 1, 1], [], []>} : vector<40x32xbf16>, vector<32x144xbf16>, vector<40x144xf32> -> vector<40x144xf32>
    %142 = arith.addf %141, %6 : vector<40x144xf32>
    %143 = vector.extract_strided_slice %139 {offsets = [0, 0], sizes = [8, 32], strides = [1, 1]} : vector<40x32xf32> to vector<8x32xf32>
    %144 = vector.extract_strided_slice %138 {offsets = [0, 0], sizes = [8, 32], strides = [1, 1]} : vector<40x32xf32> to vector<8x32xf32>
    %cst_69 = arith.constant 0.899999976 : f32
    %145 = vector.broadcast %cst_69 : f32 to vector<8x32xf32>
    %146 = arith.mulf %145, %143 : vector<8x32xf32>
    %147 = vector.extract_strided_slice %13 {offsets = [8, 0], sizes = [8, 32], strides = [1, 1]} : vector<64x32xf32> to vector<8x32xf32>
    %148 = arith.addf %146, %147 : vector<8x32xf32>
    %cst_70 = arith.constant 5.000000e-01 : f32
    %149 = vector.broadcast %cst_70 : f32 to vector<8x32xf32>
    %150 = arith.mulf %144, %149 : vector<8x32xf32>
    %151 = arith.subf %148, %150 : vector<8x32xf32>
    %cst_71 = arith.constant 5.000000e-01 : f32
    %152 = vector.broadcast %cst_71 : f32 to vector<8x32xf32>
    %153 = arith.cmpf ogt, %151, %152 : vector<8x32xf32>
    %154 = arith.extui %153 : vector<8x32xi1> to vector<8x32xi32>
    %155 = arith.sitofp %154 : vector<8x32xi32> to vector<8x32xf32>
    %c0_72 = arith.constant 0 : index
    %c0_73 = arith.constant 0 : index
    %156 = vector.load %arg9[%c0_72, %c0_73] : memref<40x32xf32, #tpu.memory_space<vmem>>, vector<8x32xf32>
    tpu.vector_store %arg9[%c0_72, %c0_73], %151 {strides = array<i32>} : memref<40x32xf32, #tpu.memory_space<vmem>>, vector<8x32xf32>,
    %c0_74 = arith.constant 0 : index
    %c0_75 = arith.constant 0 : index
    %157 = vector.load %arg8[%c0_74, %c0_75] : memref<40x32xf32, #tpu.memory_space<vmem>>, vector<8x32xf32>
    tpu.vector_store %arg8[%c0_74, %c0_75], %155 {strides = array<i32>} : memref<40x32xf32, #tpu.memory_space<vmem>>, vector<8x32xf32>,
    %158 = vector.extract_strided_slice %142 {offsets = [0, 0], sizes = [8, 32], strides = [1, 1]} : vector<40x144xf32> to vector<8x32xf32>
    %159 = vector.extract_strided_slice %139 {offsets = [8, 0], sizes = [8, 32], strides = [1, 1]} : vector<40x32xf32> to vector<8x32xf32>
    %160 = vector.extract_strided_slice %138 {offsets = [8, 0], sizes = [8, 32], strides = [1, 1]} : vector<40x32xf32> to vector<8x32xf32>
    %cst_76 = arith.constant 0.899999976 : f32
    %161 = vector.broadcast %cst_76 : f32 to vector<8x32xf32>
    %162 = arith.mulf %161, %159 : vector<8x32xf32>
    %163 = arith.addf %162, %158 : vector<8x32xf32>
    %cst_77 = arith.constant 1.000000e+00 : f32
    %164 = vector.broadcast %cst_77 : f32 to vector<8x32xf32>
    %165 = arith.mulf %160, %164 : vector<8x32xf32>
    %166 = arith.subf %163, %165 : vector<8x32xf32>
    %cst_78 = arith.constant 1.000000e+00 : f32
    %167 = vector.broadcast %cst_78 : f32 to vector<8x32xf32>
    %168 = arith.cmpf ogt, %166, %167 : vector<8x32xf32>
    %169 = arith.extui %168 : vector<8x32xi1> to vector<8x32xi32>
    %170 = arith.sitofp %169 : vector<8x32xi32> to vector<8x32xf32>
    %c1_i32_79 = arith.constant 1 : i32
    %171 = vector.broadcast %c1_i32_79 : i32 to vector<8x32xi32>
    %172 = arith.cmpi sge, %136, %171 : vector<8x32xi32>
    %173 = arith.select %172, %166, %159 : vector<8x32xi1>, vector<8x32xf32>
    %174 = arith.select %172, %170, %160 : vector<8x32xi1>, vector<8x32xf32>
    %c8_80 = arith.constant 8 : index
    %c0_81 = arith.constant 0 : index
    %175 = vector.load %arg9[%c8_80, %c0_81] : memref<40x32xf32, #tpu.memory_space<vmem>>, vector<8x32xf32>
    tpu.vector_store %arg9[%c8_80, %c0_81], %173 {strides = array<i32>} : memref<40x32xf32, #tpu.memory_space<vmem>>, vector<8x32xf32>,
    %c8_82 = arith.constant 8 : index
    %c0_83 = arith.constant 0 : index
    %176 = vector.load %arg8[%c8_82, %c0_83] : memref<40x32xf32, #tpu.memory_space<vmem>>, vector<8x32xf32>
    tpu.vector_store %arg8[%c8_82, %c0_83], %174 {strides = array<i32>} : memref<40x32xf32, #tpu.memory_space<vmem>>, vector<8x32xf32>,
    %177 = vector.extract_strided_slice %142 {offsets = [8, 32], sizes = [8, 32], strides = [1, 1]} : vector<40x144xf32> to vector<8x32xf32>
    %178 = vector.extract_strided_slice %139 {offsets = [16, 0], sizes = [8, 32], strides = [1, 1]} : vector<40x32xf32> to vector<8x32xf32>
    %179 = vector.extract_strided_slice %138 {offsets = [16, 0], sizes = [8, 32], strides = [1, 1]} : vector<40x32xf32> to vector<8x32xf32>
    %cst_84 = arith.constant 0.899999976 : f32
    %180 = vector.broadcast %cst_84 : f32 to vector<8x32xf32>
    %181 = arith.mulf %180, %178 : vector<8x32xf32>
    %182 = arith.addf %181, %177 : vector<8x32xf32>
    %cst_85 = arith.constant 1.000000e+00 : f32
    %183 = vector.broadcast %cst_85 : f32 to vector<8x32xf32>
    %184 = arith.mulf %179, %183 : vector<8x32xf32>
    %185 = arith.subf %182, %184 : vector<8x32xf32>
    %cst_86 = arith.constant 1.000000e+00 : f32
    %186 = vector.broadcast %cst_86 : f32 to vector<8x32xf32>
    %187 = arith.cmpf ogt, %185, %186 : vector<8x32xf32>
    %188 = arith.extui %187 : vector<8x32xi1> to vector<8x32xi32>
    %189 = arith.sitofp %188 : vector<8x32xi32> to vector<8x32xf32>
    %c2_i32_87 = arith.constant 2 : i32
    %190 = vector.broadcast %c2_i32_87 : i32 to vector<8x32xi32>
    %191 = arith.cmpi sge, %136, %190 : vector<8x32xi32>
    %192 = arith.select %191, %185, %178 : vector<8x32xi1>, vector<8x32xf32>
    %193 = arith.select %191, %189, %179 : vector<8x32xi1>, vector<8x32xf32>
    %c16_88 = arith.constant 16 : index
    %c0_89 = arith.constant 0 : index
    %194 = vector.load %arg9[%c16_88, %c0_89] : memref<40x32xf32, #tpu.memory_space<vmem>>, vector<8x32xf32>
    tpu.vector_store %arg9[%c16_88, %c0_89], %192 {strides = array<i32>} : memref<40x32xf32, #tpu.memory_space<vmem>>, vector<8x32xf32>,
    %c16_90 = arith.constant 16 : index
    %c0_91 = arith.constant 0 : index
    %195 = vector.load %arg8[%c16_90, %c0_91] : memref<40x32xf32, #tpu.memory_space<vmem>>, vector<8x32xf32>
    tpu.vector_store %arg8[%c16_90, %c0_91], %193 {strides = array<i32>} : memref<40x32xf32, #tpu.memory_space<vmem>>, vector<8x32xf32>,
    %196 = vector.extract_strided_slice %142 {offsets = [16, 64], sizes = [8, 32], strides = [1, 1]} : vector<40x144xf32> to vector<8x32xf32>
    %197 = vector.extract_strided_slice %139 {offsets = [24, 0], sizes = [8, 32], strides = [1, 1]} : vector<40x32xf32> to vector<8x32xf32>
    %198 = vector.extract_strided_slice %138 {offsets = [24, 0], sizes = [8, 32], strides = [1, 1]} : vector<40x32xf32> to vector<8x32xf32>
    %cst_92 = arith.constant 0.899999976 : f32
    %199 = vector.broadcast %cst_92 : f32 to vector<8x32xf32>
    %200 = arith.mulf %199, %197 : vector<8x32xf32>
    %201 = arith.addf %200, %196 : vector<8x32xf32>
    %cst_93 = arith.constant 1.000000e+00 : f32
    %202 = vector.broadcast %cst_93 : f32 to vector<8x32xf32>
    %203 = arith.mulf %198, %202 : vector<8x32xf32>
    %204 = arith.subf %201, %203 : vector<8x32xf32>
    %cst_94 = arith.constant 1.000000e+00 : f32
    %205 = vector.broadcast %cst_94 : f32 to vector<8x32xf32>
    %206 = arith.cmpf ogt, %204, %205 : vector<8x32xf32>
    %207 = arith.extui %206 : vector<8x32xi1> to vector<8x32xi32>
    %208 = arith.sitofp %207 : vector<8x32xi32> to vector<8x32xf32>
    %c3_i32_95 = arith.constant 3 : i32
    %209 = vector.broadcast %c3_i32_95 : i32 to vector<8x32xi32>
    %210 = arith.cmpi sge, %136, %209 : vector<8x32xi32>
    %211 = arith.select %210, %204, %197 : vector<8x32xi1>, vector<8x32xf32>
    %212 = arith.select %210, %208, %198 : vector<8x32xi1>, vector<8x32xf32>
    %c24_96 = arith.constant 24 : index
    %c0_97 = arith.constant 0 : index
    %213 = vector.load %arg9[%c24_96, %c0_97] : memref<40x32xf32, #tpu.memory_space<vmem>>, vector<8x32xf32>
    tpu.vector_store %arg9[%c24_96, %c0_97], %211 {strides = array<i32>} : memref<40x32xf32, #tpu.memory_space<vmem>>, vector<8x32xf32>,
    %c24_98 = arith.constant 24 : index
    %c0_99 = arith.constant 0 : index
    %214 = vector.load %arg8[%c24_98, %c0_99] : memref<40x32xf32, #tpu.memory_space<vmem>>, vector<8x32xf32>
    tpu.vector_store %arg8[%c24_98, %c0_99], %212 {strides = array<i32>} : memref<40x32xf32, #tpu.memory_space<vmem>>, vector<8x32xf32>,
    %215 = vector.extract_strided_slice %142 {offsets = [24, 96], sizes = [8, 32], strides = [1, 1]} : vector<40x144xf32> to vector<8x32xf32>
    %216 = vector.extract_strided_slice %139 {offsets = [32, 0], sizes = [8, 32], strides = [1, 1]} : vector<40x32xf32> to vector<8x32xf32>
    %217 = vector.extract_strided_slice %138 {offsets = [32, 0], sizes = [8, 32], strides = [1, 1]} : vector<40x32xf32> to vector<8x32xf32>
    %cst_100 = arith.constant 0.899999976 : f32
    %218 = vector.broadcast %cst_100 : f32 to vector<8x32xf32>
    %219 = arith.mulf %218, %216 : vector<8x32xf32>
    %220 = arith.addf %219, %215 : vector<8x32xf32>
    %cst_101 = arith.constant 1.000000e+00 : f32
    %221 = vector.broadcast %cst_101 : f32 to vector<8x32xf32>
    %222 = arith.mulf %217, %221 : vector<8x32xf32>
    %223 = arith.subf %220, %222 : vector<8x32xf32>
    %cst_102 = arith.constant 1.000000e+00 : f32
    %224 = vector.broadcast %cst_102 : f32 to vector<8x32xf32>
    %225 = arith.cmpf ogt, %223, %224 : vector<8x32xf32>
    %226 = arith.extui %225 : vector<8x32xi1> to vector<8x32xi32>
    %227 = arith.sitofp %226 : vector<8x32xi32> to vector<8x32xf32>
    %c4_i32_103 = arith.constant 4 : i32
    %228 = vector.broadcast %c4_i32_103 : i32 to vector<8x32xi32>
    %229 = arith.cmpi sge, %136, %228 : vector<8x32xi32>
    %230 = arith.select %229, %223, %216 : vector<8x32xi1>, vector<8x32xf32>
    %231 = arith.select %229, %227, %217 : vector<8x32xi1>, vector<8x32xf32>
    %c32_104 = arith.constant 32 : index
    %c0_105 = arith.constant 0 : index
    %232 = vector.load %arg9[%c32_104, %c0_105] : memref<40x32xf32, #tpu.memory_space<vmem>>, vector<8x32xf32>
    tpu.vector_store %arg9[%c32_104, %c0_105], %230 {strides = array<i32>} : memref<40x32xf32, #tpu.memory_space<vmem>>, vector<8x32xf32>,
    %c32_106 = arith.constant 32 : index
    %c0_107 = arith.constant 0 : index
    %233 = vector.load %arg8[%c32_106, %c0_107] : memref<40x32xf32, #tpu.memory_space<vmem>>, vector<8x32xf32>
    tpu.vector_store %arg8[%c32_106, %c0_107], %231 {strides = array<i32>} : memref<40x32xf32, #tpu.memory_space<vmem>>, vector<8x32xf32>,
    %234 = vector.extract_strided_slice %142 {offsets = [32, 128], sizes = [8, 16], strides = [1, 1]} : vector<40x144xf32> to vector<8x16xf32>
    %c0_108 = arith.constant 0 : index
    %c0_109 = arith.constant 0 : index
    %235 = vector.load %arg11[%c0_108, %c0_109] : memref<8x16xf32, #tpu.memory_space<vmem>>, vector<8x16xf32>
    %c0_110 = arith.constant 0 : index
    %c0_111 = arith.constant 0 : index
    %236 = vector.load %arg10[%c0_110, %c0_111] : memref<8x16xf32, #tpu.memory_space<vmem>>, vector<8x16xf32>
    %cst_112 = arith.constant 0.899999976 : f32
    %237 = vector.broadcast %cst_112 : f32 to vector<8x16xf32>
    %238 = arith.mulf %237, %235 : vector<8x16xf32>
    %239 = arith.addf %238, %234 : vector<8x16xf32>
    %cst_113 = arith.constant 1.000000e+00 : f32
    %240 = vector.broadcast %cst_113 : f32 to vector<8x16xf32>
    %241 = arith.mulf %236, %240 : vector<8x16xf32>
    %242 = arith.subf %239, %241 : vector<8x16xf32>
    %cst_114 = arith.constant 1.000000e+00 : f32
    %243 = vector.broadcast %cst_114 : f32 to vector<8x16xf32>
    %244 = arith.cmpf ogt, %242, %243 : vector<8x16xf32>
    %245 = arith.extui %244 : vector<8x16xi1> to vector<8x16xi32>
    %246 = arith.sitofp %245 : vector<8x16xi32> to vector<8x16xf32>
    %c5_i32_115 = arith.constant 5 : i32
    %247 = vector.broadcast %c5_i32_115 : i32 to vector<8x16xi32>
    %248 = arith.cmpi sge, %137, %247 : vector<8x16xi32>
    %249 = arith.select %248, %242, %235 : vector<8x16xi1>, vector<8x16xf32>
    %250 = arith.select %248, %246, %236 : vector<8x16xi1>, vector<8x16xf32>
    %c0_116 = arith.constant 0 : index
    %c0_117 = arith.constant 0 : index
    %251 = vector.load %arg11[%c0_116, %c0_117] : memref<8x16xf32, #tpu.memory_space<vmem>>, vector<8x16xf32>
    tpu.vector_store %arg11[%c0_116, %c0_117], %249 {strides = array<i32>} : memref<8x16xf32, #tpu.memory_space<vmem>>, vector<8x16xf32>,
    %c0_118 = arith.constant 0 : index
    %c0_119 = arith.constant 0 : index
    %252 = vector.load %arg10[%c0_118, %c0_119] : memref<8x16xf32, #tpu.memory_space<vmem>>, vector<8x16xf32>
    tpu.vector_store %arg10[%c0_118, %c0_119], %250 {strides = array<i32>} : memref<8x16xf32, #tpu.memory_space<vmem>>, vector<8x16xf32>,
    %c0_120 = arith.constant 0 : index
    %c16_121 = arith.constant 16 : index
    %253 = vector.load %arg6[%c0_120, %c16_121] : memref<8x128xf32, #tpu.memory_space<vmem>>, vector<8x16xf32>
    tpu.vector_store %arg6[%c0_120, %c16_121], %250 {strides = array<i32>} : memref<8x128xf32, #tpu.memory_space<vmem>>, vector<8x16xf32>,
    %c0_122 = arith.constant 0 : index
    %c16_123 = arith.constant 16 : index
    %254 = vector.load %arg7[%c0_122, %c16_123] : memref<8x128xf32, #tpu.memory_space<vmem>>, vector<8x16xf32>
    tpu.vector_store %arg7[%c0_122, %c16_123], %249 {strides = array<i32>} : memref<8x128xf32, #tpu.memory_space<vmem>>, vector<8x16xf32>,
    %c2_i32_124 = arith.constant 2 : i32
    %255 = arith.addi %14, %c2_i32_124 : i32
    %256 = vector.broadcast %255 : i32 to vector<8x32xi32>
    %257 = vector.broadcast %255 : i32 to vector<8x16xi32>
    %c0_125 = arith.constant 0 : index
    %c0_126 = arith.constant 0 : index
    %258 = vector.load %arg8[%c0_125, %c0_126] : memref<40x32xf32, #tpu.memory_space<vmem>>, vector<40x32xf32>
    %c0_127 = arith.constant 0 : index
    %c0_128 = arith.constant 0 : index
    %259 = vector.load %arg9[%c0_127, %c0_128] : memref<40x32xf32, #tpu.memory_space<vmem>>, vector<40x32xf32>
    %260 = arith.truncf %258 : vector<40x32xf32> to vector<40x32xbf16>
    %cst_129 = arith.constant dense<0.000000e+00> : vector<40x144xf32>
    %261 = tpu.matmul %260, %3, %cst_129 {dimension_numbers = #tpu.dot_dimension_numbers<[1], [0], [0], [1], [0, 0, 1, 1], [], []>} : vector<40x32xbf16>, vector<32x144xbf16>, vector<40x144xf32> -> vector<40x144xf32>
    %262 = arith.addf %261, %6 : vector<40x144xf32>
    %263 = vector.extract_strided_slice %259 {offsets = [0, 0], sizes = [8, 32], strides = [1, 1]} : vector<40x32xf32> to vector<8x32xf32>
    %264 = vector.extract_strided_slice %258 {offsets = [0, 0], sizes = [8, 32], strides = [1, 1]} : vector<40x32xf32> to vector<8x32xf32>
    %cst_130 = arith.constant 0.899999976 : f32
    %265 = vector.broadcast %cst_130 : f32 to vector<8x32xf32>
    %266 = arith.mulf %265, %263 : vector<8x32xf32>
    %267 = vector.extract_strided_slice %13 {offsets = [16, 0], sizes = [8, 32], strides = [1, 1]} : vector<64x32xf32> to vector<8x32xf32>
    %268 = arith.addf %266, %267 : vector<8x32xf32>
    %cst_131 = arith.constant 5.000000e-01 : f32
    %269 = vector.broadcast %cst_131 : f32 to vector<8x32xf32>
    %270 = arith.mulf %264, %269 : vector<8x32xf32>
    %271 = arith.subf %268, %270 : vector<8x32xf32>
    %cst_132 = arith.constant 5.000000e-01 : f32
    %272 = vector.broadcast %cst_132 : f32 to vector<8x32xf32>
    %273 = arith.cmpf ogt, %271, %272 : vector<8x32xf32>
    %274 = arith.extui %273 : vector<8x32xi1> to vector<8x32xi32>
    %275 = arith.sitofp %274 : vector<8x32xi32> to vector<8x32xf32>
    %c0_133 = arith.constant 0 : index
    %c0_134 = arith.constant 0 : index
    %276 = vector.load %arg9[%c0_133, %c0_134] : memref<40x32xf32, #tpu.memory_space<vmem>>, vector<8x32xf32>
    tpu.vector_store %arg9[%c0_133, %c0_134], %271 {strides = array<i32>} : memref<40x32xf32, #tpu.memory_space<vmem>>, vector<8x32xf32>,
    %c0_135 = arith.constant 0 : index
    %c0_136 = arith.constant 0 : index
    %277 = vector.load %arg8[%c0_135, %c0_136] : memref<40x32xf32, #tpu.memory_space<vmem>>, vector<8x32xf32>
    tpu.vector_store %arg8[%c0_135, %c0_136], %275 {strides = array<i32>} : memref<40x32xf32, #tpu.memory_space<vmem>>, vector<8x32xf32>,
    %278 = vector.extract_strided_slice %262 {offsets = [0, 0], sizes = [8, 32], strides = [1, 1]} : vector<40x144xf32> to vector<8x32xf32>
    %279 = vector.extract_strided_slice %259 {offsets = [8, 0], sizes = [8, 32], strides = [1, 1]} : vector<40x32xf32> to vector<8x32xf32>
    %280 = vector.extract_strided_slice %258 {offsets = [8, 0], sizes = [8, 32], strides = [1, 1]} : vector<40x32xf32> to vector<8x32xf32>
    %cst_137 = arith.constant 0.899999976 : f32
    %281 = vector.broadcast %cst_137 : f32 to vector<8x32xf32>
    %282 = arith.mulf %281, %279 : vector<8x32xf32>
    %283 = arith.addf %282, %278 : vector<8x32xf32>
    %cst_138 = arith.constant 1.000000e+00 : f32
    %284 = vector.broadcast %cst_138 : f32 to vector<8x32xf32>
    %285 = arith.mulf %280, %284 : vector<8x32xf32>
    %286 = arith.subf %283, %285 : vector<8x32xf32>
    %cst_139 = arith.constant 1.000000e+00 : f32
    %287 = vector.broadcast %cst_139 : f32 to vector<8x32xf32>
    %288 = arith.cmpf ogt, %286, %287 : vector<8x32xf32>
    %289 = arith.extui %288 : vector<8x32xi1> to vector<8x32xi32>
    %290 = arith.sitofp %289 : vector<8x32xi32> to vector<8x32xf32>
    %c1_i32_140 = arith.constant 1 : i32
    %291 = vector.broadcast %c1_i32_140 : i32 to vector<8x32xi32>
    %292 = arith.cmpi sge, %256, %291 : vector<8x32xi32>
    %293 = arith.select %292, %286, %279 : vector<8x32xi1>, vector<8x32xf32>
    %294 = arith.select %292, %290, %280 : vector<8x32xi1>, vector<8x32xf32>
    %c8_141 = arith.constant 8 : index
    %c0_142 = arith.constant 0 : index
    %295 = vector.load %arg9[%c8_141, %c0_142] : memref<40x32xf32, #tpu.memory_space<vmem>>, vector<8x32xf32>
    tpu.vector_store %arg9[%c8_141, %c0_142], %293 {strides = array<i32>} : memref<40x32xf32, #tpu.memory_space<vmem>>, vector<8x32xf32>,
    %c8_143 = arith.constant 8 : index
    %c0_144 = arith.constant 0 : index
    %296 = vector.load %arg8[%c8_143, %c0_144] : memref<40x32xf32, #tpu.memory_space<vmem>>, vector<8x32xf32>
    tpu.vector_store %arg8[%c8_143, %c0_144], %294 {strides = array<i32>} : memref<40x32xf32, #tpu.memory_space<vmem>>, vector<8x32xf32>,
    %297 = vector.extract_strided_slice %262 {offsets = [8, 32], sizes = [8, 32], strides = [1, 1]} : vector<40x144xf32> to vector<8x32xf32>
    %298 = vector.extract_strided_slice %259 {offsets = [16, 0], sizes = [8, 32], strides = [1, 1]} : vector<40x32xf32> to vector<8x32xf32>
    %299 = vector.extract_strided_slice %258 {offsets = [16, 0], sizes = [8, 32], strides = [1, 1]} : vector<40x32xf32> to vector<8x32xf32>
    %cst_145 = arith.constant 0.899999976 : f32
    %300 = vector.broadcast %cst_145 : f32 to vector<8x32xf32>
    %301 = arith.mulf %300, %298 : vector<8x32xf32>
    %302 = arith.addf %301, %297 : vector<8x32xf32>
    %cst_146 = arith.constant 1.000000e+00 : f32
    %303 = vector.broadcast %cst_146 : f32 to vector<8x32xf32>
    %304 = arith.mulf %299, %303 : vector<8x32xf32>
    %305 = arith.subf %302, %304 : vector<8x32xf32>
    %cst_147 = arith.constant 1.000000e+00 : f32
    %306 = vector.broadcast %cst_147 : f32 to vector<8x32xf32>
    %307 = arith.cmpf ogt, %305, %306 : vector<8x32xf32>
    %308 = arith.extui %307 : vector<8x32xi1> to vector<8x32xi32>
    %309 = arith.sitofp %308 : vector<8x32xi32> to vector<8x32xf32>
    %c2_i32_148 = arith.constant 2 : i32
    %310 = vector.broadcast %c2_i32_148 : i32 to vector<8x32xi32>
    %311 = arith.cmpi sge, %256, %310 : vector<8x32xi32>
    %312 = arith.select %311, %305, %298 : vector<8x32xi1>, vector<8x32xf32>
    %313 = arith.select %311, %309, %299 : vector<8x32xi1>, vector<8x32xf32>
    %c16_149 = arith.constant 16 : index
    %c0_150 = arith.constant 0 : index
    %314 = vector.load %arg9[%c16_149, %c0_150] : memref<40x32xf32, #tpu.memory_space<vmem>>, vector<8x32xf32>
    tpu.vector_store %arg9[%c16_149, %c0_150], %312 {strides = array<i32>} : memref<40x32xf32, #tpu.memory_space<vmem>>, vector<8x32xf32>,
    %c16_151 = arith.constant 16 : index
    %c0_152 = arith.constant 0 : index
    %315 = vector.load %arg8[%c16_151, %c0_152] : memref<40x32xf32, #tpu.memory_space<vmem>>, vector<8x32xf32>
    tpu.vector_store %arg8[%c16_151, %c0_152], %313 {strides = array<i32>} : memref<40x32xf32, #tpu.memory_space<vmem>>, vector<8x32xf32>,
    %316 = vector.extract_strided_slice %262 {offsets = [16, 64], sizes = [8, 32], strides = [1, 1]} : vector<40x144xf32> to vector<8x32xf32>
    %317 = vector.extract_strided_slice %259 {offsets = [24, 0], sizes = [8, 32], strides = [1, 1]} : vector<40x32xf32> to vector<8x32xf32>
    %318 = vector.extract_strided_slice %258 {offsets = [24, 0], sizes = [8, 32], strides = [1, 1]} : vector<40x32xf32> to vector<8x32xf32>
    %cst_153 = arith.constant 0.899999976 : f32
    %319 = vector.broadcast %cst_153 : f32 to vector<8x32xf32>
    %320 = arith.mulf %319, %317 : vector<8x32xf32>
    %321 = arith.addf %320, %316 : vector<8x32xf32>
    %cst_154 = arith.constant 1.000000e+00 : f32
    %322 = vector.broadcast %cst_154 : f32 to vector<8x32xf32>
    %323 = arith.mulf %318, %322 : vector<8x32xf32>
    %324 = arith.subf %321, %323 : vector<8x32xf32>
    %cst_155 = arith.constant 1.000000e+00 : f32
    %325 = vector.broadcast %cst_155 : f32 to vector<8x32xf32>
    %326 = arith.cmpf ogt, %324, %325 : vector<8x32xf32>
    %327 = arith.extui %326 : vector<8x32xi1> to vector<8x32xi32>
    %328 = arith.sitofp %327 : vector<8x32xi32> to vector<8x32xf32>
    %c3_i32_156 = arith.constant 3 : i32
    %329 = vector.broadcast %c3_i32_156 : i32 to vector<8x32xi32>
    %330 = arith.cmpi sge, %256, %329 : vector<8x32xi32>
    %331 = arith.select %330, %324, %317 : vector<8x32xi1>, vector<8x32xf32>
    %332 = arith.select %330, %328, %318 : vector<8x32xi1>, vector<8x32xf32>
    %c24_157 = arith.constant 24 : index
    %c0_158 = arith.constant 0 : index
    %333 = vector.load %arg9[%c24_157, %c0_158] : memref<40x32xf32, #tpu.memory_space<vmem>>, vector<8x32xf32>
    tpu.vector_store %arg9[%c24_157, %c0_158], %331 {strides = array<i32>} : memref<40x32xf32, #tpu.memory_space<vmem>>, vector<8x32xf32>,
    %c24_159 = arith.constant 24 : index
    %c0_160 = arith.constant 0 : index
    %334 = vector.load %arg8[%c24_159, %c0_160] : memref<40x32xf32, #tpu.memory_space<vmem>>, vector<8x32xf32>
    tpu.vector_store %arg8[%c24_159, %c0_160], %332 {strides = array<i32>} : memref<40x32xf32, #tpu.memory_space<vmem>>, vector<8x32xf32>,
    %335 = vector.extract_strided_slice %262 {offsets = [24, 96], sizes = [8, 32], strides = [1, 1]} : vector<40x144xf32> to vector<8x32xf32>
    %336 = vector.extract_strided_slice %259 {offsets = [32, 0], sizes = [8, 32], strides = [1, 1]} : vector<40x32xf32> to vector<8x32xf32>
    %337 = vector.extract_strided_slice %258 {offsets = [32, 0], sizes = [8, 32], strides = [1, 1]} : vector<40x32xf32> to vector<8x32xf32>
    %cst_161 = arith.constant 0.899999976 : f32
    %338 = vector.broadcast %cst_161 : f32 to vector<8x32xf32>
    %339 = arith.mulf %338, %336 : vector<8x32xf32>
    %340 = arith.addf %339, %335 : vector<8x32xf32>
    %cst_162 = arith.constant 1.000000e+00 : f32
    %341 = vector.broadcast %cst_162 : f32 to vector<8x32xf32>
    %342 = arith.mulf %337, %341 : vector<8x32xf32>
    %343 = arith.subf %340, %342 : vector<8x32xf32>
    %cst_163 = arith.constant 1.000000e+00 : f32
    %344 = vector.broadcast %cst_163 : f32 to vector<8x32xf32>
    %345 = arith.cmpf ogt, %343, %344 : vector<8x32xf32>
    %346 = arith.extui %345 : vector<8x32xi1> to vector<8x32xi32>
    %347 = arith.sitofp %346 : vector<8x32xi32> to vector<8x32xf32>
    %c4_i32_164 = arith.constant 4 : i32
    %348 = vector.broadcast %c4_i32_164 : i32 to vector<8x32xi32>
    %349 = arith.cmpi sge, %256, %348 : vector<8x32xi32>
    %350 = arith.select %349, %343, %336 : vector<8x32xi1>, vector<8x32xf32>
    %351 = arith.select %349, %347, %337 : vector<8x32xi1>, vector<8x32xf32>
    %c32_165 = arith.constant 32 : index
    %c0_166 = arith.constant 0 : index
    %352 = vector.load %arg9[%c32_165, %c0_166] : memref<40x32xf32, #tpu.memory_space<vmem>>, vector<8x32xf32>
    tpu.vector_store %arg9[%c32_165, %c0_166], %350 {strides = array<i32>} : memref<40x32xf32, #tpu.memory_space<vmem>>, vector<8x32xf32>,
    %c32_167 = arith.constant 32 : index
    %c0_168 = arith.constant 0 : index
    %353 = vector.load %arg8[%c32_167, %c0_168] : memref<40x32xf32, #tpu.memory_space<vmem>>, vector<8x32xf32>
    tpu.vector_store %arg8[%c32_167, %c0_168], %351 {strides = array<i32>} : memref<40x32xf32, #tpu.memory_space<vmem>>, vector<8x32xf32>,
    %354 = vector.extract_strided_slice %262 {offsets = [32, 128], sizes = [8, 16], strides = [1, 1]} : vector<40x144xf32> to vector<8x16xf32>
    %c0_169 = arith.constant 0 : index
    %c0_170 = arith.constant 0 : index
    %355 = vector.load %arg11[%c0_169, %c0_170] : memref<8x16xf32, #tpu.memory_space<vmem>>, vector<8x16xf32>
    %c0_171 = arith.constant 0 : index
    %c0_172 = arith.constant 0 : index
    %356 = vector.load %arg10[%c0_171, %c0_172] : memref<8x16xf32, #tpu.memory_space<vmem>>, vector<8x16xf32>
    %cst_173 = arith.constant 0.899999976 : f32
    %357 = vector.broadcast %cst_173 : f32 to vector<8x16xf32>
    %358 = arith.mulf %357, %355 : vector<8x16xf32>
    %359 = arith.addf %358, %354 : vector<8x16xf32>
    %cst_174 = arith.constant 1.000000e+00 : f32
    %360 = vector.broadcast %cst_174 : f32 to vector<8x16xf32>
    %361 = arith.mulf %356, %360 : vector<8x16xf32>
    %362 = arith.subf %359, %361 : vector<8x16xf32>
    %cst_175 = arith.constant 1.000000e+00 : f32
    %363 = vector.broadcast %cst_175 : f32 to vector<8x16xf32>
    %364 = arith.cmpf ogt, %362, %363 : vector<8x16xf32>
    %365 = arith.extui %364 : vector<8x16xi1> to vector<8x16xi32>
    %366 = arith.sitofp %365 : vector<8x16xi32> to vector<8x16xf32>
    %c5_i32_176 = arith.constant 5 : i32
    %367 = vector.broadcast %c5_i32_176 : i32 to vector<8x16xi32>
    %368 = arith.cmpi sge, %257, %367 : vector<8x16xi32>
    %369 = arith.select %368, %362, %355 : vector<8x16xi1>, vector<8x16xf32>
    %370 = arith.select %368, %366, %356 : vector<8x16xi1>, vector<8x16xf32>
    %c0_177 = arith.constant 0 : index
    %c0_178 = arith.constant 0 : index
    %371 = vector.load %arg11[%c0_177, %c0_178] : memref<8x16xf32, #tpu.memory_space<vmem>>, vector<8x16xf32>
    tpu.vector_store %arg11[%c0_177, %c0_178], %369 {strides = array<i32>} : memref<8x16xf32, #tpu.memory_space<vmem>>, vector<8x16xf32>,
    %c0_179 = arith.constant 0 : index
    %c0_180 = arith.constant 0 : index
    %372 = vector.load %arg10[%c0_179, %c0_180] : memref<8x16xf32, #tpu.memory_space<vmem>>, vector<8x16xf32>
    tpu.vector_store %arg10[%c0_179, %c0_180], %370 {strides = array<i32>} : memref<8x16xf32, #tpu.memory_space<vmem>>, vector<8x16xf32>,
    %c0_181 = arith.constant 0 : index
    %c32_182 = arith.constant 32 : index
    %373 = vector.load %arg6[%c0_181, %c32_182] : memref<8x128xf32, #tpu.memory_space<vmem>>, vector<8x16xf32>
    tpu.vector_store %arg6[%c0_181, %c32_182], %370 {strides = array<i32>} : memref<8x128xf32, #tpu.memory_space<vmem>>, vector<8x16xf32>,
    %c0_183 = arith.constant 0 : index
    %c32_184 = arith.constant 32 : index
    %374 = vector.load %arg7[%c0_183, %c32_184] : memref<8x128xf32, #tpu.memory_space<vmem>>, vector<8x16xf32>
    tpu.vector_store %arg7[%c0_183, %c32_184], %369 {strides = array<i32>} : memref<8x128xf32, #tpu.memory_space<vmem>>, vector<8x16xf32>,
    %c3_i32_185 = arith.constant 3 : i32
    %375 = arith.addi %14, %c3_i32_185 : i32
    %376 = vector.broadcast %375 : i32 to vector<8x32xi32>
    %377 = vector.broadcast %375 : i32 to vector<8x16xi32>
    %c0_186 = arith.constant 0 : index
    %c0_187 = arith.constant 0 : index
    %378 = vector.load %arg8[%c0_186, %c0_187] : memref<40x32xf32, #tpu.memory_space<vmem>>, vector<40x32xf32>
    %c0_188 = arith.constant 0 : index
    %c0_189 = arith.constant 0 : index
    %379 = vector.load %arg9[%c0_188, %c0_189] : memref<40x32xf32, #tpu.memory_space<vmem>>, vector<40x32xf32>
    %380 = arith.truncf %378 : vector<40x32xf32> to vector<40x32xbf16>
    %cst_190 = arith.constant dense<0.000000e+00> : vector<40x144xf32>
    %381 = tpu.matmul %380, %3, %cst_190 {dimension_numbers = #tpu.dot_dimension_numbers<[1], [0], [0], [1], [0, 0, 1, 1], [], []>} : vector<40x32xbf16>, vector<32x144xbf16>, vector<40x144xf32> -> vector<40x144xf32>
    %382 = arith.addf %381, %6 : vector<40x144xf32>
    %383 = vector.extract_strided_slice %379 {offsets = [0, 0], sizes = [8, 32], strides = [1, 1]} : vector<40x32xf32> to vector<8x32xf32>
    %384 = vector.extract_strided_slice %378 {offsets = [0, 0], sizes = [8, 32], strides = [1, 1]} : vector<40x32xf32> to vector<8x32xf32>
    %cst_191 = arith.constant 0.899999976 : f32
    %385 = vector.broadcast %cst_191 : f32 to vector<8x32xf32>
    %386 = arith.mulf %385, %383 : vector<8x32xf32>
    %387 = vector.extract_strided_slice %13 {offsets = [24, 0], sizes = [8, 32], strides = [1, 1]} : vector<64x32xf32> to vector<8x32xf32>
    %388 = arith.addf %386, %387 : vector<8x32xf32>
    %cst_192 = arith.constant 5.000000e-01 : f32
    %389 = vector.broadcast %cst_192 : f32 to vector<8x32xf32>
    %390 = arith.mulf %384, %389 : vector<8x32xf32>
    %391 = arith.subf %388, %390 : vector<8x32xf32>
    %cst_193 = arith.constant 5.000000e-01 : f32
    %392 = vector.broadcast %cst_193 : f32 to vector<8x32xf32>
    %393 = arith.cmpf ogt, %391, %392 : vector<8x32xf32>
    %394 = arith.extui %393 : vector<8x32xi1> to vector<8x32xi32>
    %395 = arith.sitofp %394 : vector<8x32xi32> to vector<8x32xf32>
    %c0_194 = arith.constant 0 : index
    %c0_195 = arith.constant 0 : index
    %396 = vector.load %arg9[%c0_194, %c0_195] : memref<40x32xf32, #tpu.memory_space<vmem>>, vector<8x32xf32>
    tpu.vector_store %arg9[%c0_194, %c0_195], %391 {strides = array<i32>} : memref<40x32xf32, #tpu.memory_space<vmem>>, vector<8x32xf32>,
    %c0_196 = arith.constant 0 : index
    %c0_197 = arith.constant 0 : index
    %397 = vector.load %arg8[%c0_196, %c0_197] : memref<40x32xf32, #tpu.memory_space<vmem>>, vector<8x32xf32>
    tpu.vector_store %arg8[%c0_196, %c0_197], %395 {strides = array<i32>} : memref<40x32xf32, #tpu.memory_space<vmem>>, vector<8x32xf32>,
    %398 = vector.extract_strided_slice %382 {offsets = [0, 0], sizes = [8, 32], strides = [1, 1]} : vector<40x144xf32> to vector<8x32xf32>
    %399 = vector.extract_strided_slice %379 {offsets = [8, 0], sizes = [8, 32], strides = [1, 1]} : vector<40x32xf32> to vector<8x32xf32>
    %400 = vector.extract_strided_slice %378 {offsets = [8, 0], sizes = [8, 32], strides = [1, 1]} : vector<40x32xf32> to vector<8x32xf32>
    %cst_198 = arith.constant 0.899999976 : f32
    %401 = vector.broadcast %cst_198 : f32 to vector<8x32xf32>
    %402 = arith.mulf %401, %399 : vector<8x32xf32>
    %403 = arith.addf %402, %398 : vector<8x32xf32>
    %cst_199 = arith.constant 1.000000e+00 : f32
    %404 = vector.broadcast %cst_199 : f32 to vector<8x32xf32>
    %405 = arith.mulf %400, %404 : vector<8x32xf32>
    %406 = arith.subf %403, %405 : vector<8x32xf32>
    %cst_200 = arith.constant 1.000000e+00 : f32
    %407 = vector.broadcast %cst_200 : f32 to vector<8x32xf32>
    %408 = arith.cmpf ogt, %406, %407 : vector<8x32xf32>
    %409 = arith.extui %408 : vector<8x32xi1> to vector<8x32xi32>
    %410 = arith.sitofp %409 : vector<8x32xi32> to vector<8x32xf32>
    %c1_i32_201 = arith.constant 1 : i32
    %411 = vector.broadcast %c1_i32_201 : i32 to vector<8x32xi32>
    %412 = arith.cmpi sge, %376, %411 : vector<8x32xi32>
    %413 = arith.select %412, %406, %399 : vector<8x32xi1>, vector<8x32xf32>
    %414 = arith.select %412, %410, %400 : vector<8x32xi1>, vector<8x32xf32>
    %c8_202 = arith.constant 8 : index
    %c0_203 = arith.constant 0 : index
    %415 = vector.load %arg9[%c8_202, %c0_203] : memref<40x32xf32, #tpu.memory_space<vmem>>, vector<8x32xf32>
    tpu.vector_store %arg9[%c8_202, %c0_203], %413 {strides = array<i32>} : memref<40x32xf32, #tpu.memory_space<vmem>>, vector<8x32xf32>,
    %c8_204 = arith.constant 8 : index
    %c0_205 = arith.constant 0 : index
    %416 = vector.load %arg8[%c8_204, %c0_205] : memref<40x32xf32, #tpu.memory_space<vmem>>, vector<8x32xf32>
    tpu.vector_store %arg8[%c8_204, %c0_205], %414 {strides = array<i32>} : memref<40x32xf32, #tpu.memory_space<vmem>>, vector<8x32xf32>,
    %417 = vector.extract_strided_slice %382 {offsets = [8, 32], sizes = [8, 32], strides = [1, 1]} : vector<40x144xf32> to vector<8x32xf32>
    %418 = vector.extract_strided_slice %379 {offsets = [16, 0], sizes = [8, 32], strides = [1, 1]} : vector<40x32xf32> to vector<8x32xf32>
    %419 = vector.extract_strided_slice %378 {offsets = [16, 0], sizes = [8, 32], strides = [1, 1]} : vector<40x32xf32> to vector<8x32xf32>
    %cst_206 = arith.constant 0.899999976 : f32
    %420 = vector.broadcast %cst_206 : f32 to vector<8x32xf32>
    %421 = arith.mulf %420, %418 : vector<8x32xf32>
    %422 = arith.addf %421, %417 : vector<8x32xf32>
    %cst_207 = arith.constant 1.000000e+00 : f32
    %423 = vector.broadcast %cst_207 : f32 to vector<8x32xf32>
    %424 = arith.mulf %419, %423 : vector<8x32xf32>
    %425 = arith.subf %422, %424 : vector<8x32xf32>
    %cst_208 = arith.constant 1.000000e+00 : f32
    %426 = vector.broadcast %cst_208 : f32 to vector<8x32xf32>
    %427 = arith.cmpf ogt, %425, %426 : vector<8x32xf32>
    %428 = arith.extui %427 : vector<8x32xi1> to vector<8x32xi32>
    %429 = arith.sitofp %428 : vector<8x32xi32> to vector<8x32xf32>
    %c2_i32_209 = arith.constant 2 : i32
    %430 = vector.broadcast %c2_i32_209 : i32 to vector<8x32xi32>
    %431 = arith.cmpi sge, %376, %430 : vector<8x32xi32>
    %432 = arith.select %431, %425, %418 : vector<8x32xi1>, vector<8x32xf32>
    %433 = arith.select %431, %429, %419 : vector<8x32xi1>, vector<8x32xf32>
    %c16_210 = arith.constant 16 : index
    %c0_211 = arith.constant 0 : index
    %434 = vector.load %arg9[%c16_210, %c0_211] : memref<40x32xf32, #tpu.memory_space<vmem>>, vector<8x32xf32>
    tpu.vector_store %arg9[%c16_210, %c0_211], %432 {strides = array<i32>} : memref<40x32xf32, #tpu.memory_space<vmem>>, vector<8x32xf32>,
    %c16_212 = arith.constant 16 : index
    %c0_213 = arith.constant 0 : index
    %435 = vector.load %arg8[%c16_212, %c0_213] : memref<40x32xf32, #tpu.memory_space<vmem>>, vector<8x32xf32>
    tpu.vector_store %arg8[%c16_212, %c0_213], %433 {strides = array<i32>} : memref<40x32xf32, #tpu.memory_space<vmem>>, vector<8x32xf32>,
    %436 = vector.extract_strided_slice %382 {offsets = [16, 64], sizes = [8, 32], strides = [1, 1]} : vector<40x144xf32> to vector<8x32xf32>
    %437 = vector.extract_strided_slice %379 {offsets = [24, 0], sizes = [8, 32], strides = [1, 1]} : vector<40x32xf32> to vector<8x32xf32>
    %438 = vector.extract_strided_slice %378 {offsets = [24, 0], sizes = [8, 32], strides = [1, 1]} : vector<40x32xf32> to vector<8x32xf32>
    %cst_214 = arith.constant 0.899999976 : f32
    %439 = vector.broadcast %cst_214 : f32 to vector<8x32xf32>
    %440 = arith.mulf %439, %437 : vector<8x32xf32>
    %441 = arith.addf %440, %436 : vector<8x32xf32>
    %cst_215 = arith.constant 1.000000e+00 : f32
    %442 = vector.broadcast %cst_215 : f32 to vector<8x32xf32>
    %443 = arith.mulf %438, %442 : vector<8x32xf32>
    %444 = arith.subf %441, %443 : vector<8x32xf32>
    %cst_216 = arith.constant 1.000000e+00 : f32
    %445 = vector.broadcast %cst_216 : f32 to vector<8x32xf32>
    %446 = arith.cmpf ogt, %444, %445 : vector<8x32xf32>
    %447 = arith.extui %446 : vector<8x32xi1> to vector<8x32xi32>
    %448 = arith.sitofp %447 : vector<8x32xi32> to vector<8x32xf32>
    %c3_i32_217 = arith.constant 3 : i32
    %449 = vector.broadcast %c3_i32_217 : i32 to vector<8x32xi32>
    %450 = arith.cmpi sge, %376, %449 : vector<8x32xi32>
    %451 = arith.select %450, %444, %437 : vector<8x32xi1>, vector<8x32xf32>
    %452 = arith.select %450, %448, %438 : vector<8x32xi1>, vector<8x32xf32>
    %c24_218 = arith.constant 24 : index
    %c0_219 = arith.constant 0 : index
    %453 = vector.load %arg9[%c24_218, %c0_219] : memref<40x32xf32, #tpu.memory_space<vmem>>, vector<8x32xf32>
    tpu.vector_store %arg9[%c24_218, %c0_219], %451 {strides = array<i32>} : memref<40x32xf32, #tpu.memory_space<vmem>>, vector<8x32xf32>,
    %c24_220 = arith.constant 24 : index
    %c0_221 = arith.constant 0 : index
    %454 = vector.load %arg8[%c24_220, %c0_221] : memref<40x32xf32, #tpu.memory_space<vmem>>, vector<8x32xf32>
    tpu.vector_store %arg8[%c24_220, %c0_221], %452 {strides = array<i32>} : memref<40x32xf32, #tpu.memory_space<vmem>>, vector<8x32xf32>,
    %455 = vector.extract_strided_slice %382 {offsets = [24, 96], sizes = [8, 32], strides = [1, 1]} : vector<40x144xf32> to vector<8x32xf32>
    %456 = vector.extract_strided_slice %379 {offsets = [32, 0], sizes = [8, 32], strides = [1, 1]} : vector<40x32xf32> to vector<8x32xf32>
    %457 = vector.extract_strided_slice %378 {offsets = [32, 0], sizes = [8, 32], strides = [1, 1]} : vector<40x32xf32> to vector<8x32xf32>
    %cst_222 = arith.constant 0.899999976 : f32
    %458 = vector.broadcast %cst_222 : f32 to vector<8x32xf32>
    %459 = arith.mulf %458, %456 : vector<8x32xf32>
    %460 = arith.addf %459, %455 : vector<8x32xf32>
    %cst_223 = arith.constant 1.000000e+00 : f32
    %461 = vector.broadcast %cst_223 : f32 to vector<8x32xf32>
    %462 = arith.mulf %457, %461 : vector<8x32xf32>
    %463 = arith.subf %460, %462 : vector<8x32xf32>
    %cst_224 = arith.constant 1.000000e+00 : f32
    %464 = vector.broadcast %cst_224 : f32 to vector<8x32xf32>
    %465 = arith.cmpf ogt, %463, %464 : vector<8x32xf32>
    %466 = arith.extui %465 : vector<8x32xi1> to vector<8x32xi32>
    %467 = arith.sitofp %466 : vector<8x32xi32> to vector<8x32xf32>
    %c4_i32_225 = arith.constant 4 : i32
    %468 = vector.broadcast %c4_i32_225 : i32 to vector<8x32xi32>
    %469 = arith.cmpi sge, %376, %468 : vector<8x32xi32>
    %470 = arith.select %469, %463, %456 : vector<8x32xi1>, vector<8x32xf32>
    %471 = arith.select %469, %467, %457 : vector<8x32xi1>, vector<8x32xf32>
    %c32_226 = arith.constant 32 : index
    %c0_227 = arith.constant 0 : index
    %472 = vector.load %arg9[%c32_226, %c0_227] : memref<40x32xf32, #tpu.memory_space<vmem>>, vector<8x32xf32>
    tpu.vector_store %arg9[%c32_226, %c0_227], %470 {strides = array<i32>} : memref<40x32xf32, #tpu.memory_space<vmem>>, vector<8x32xf32>,
    %c32_228 = arith.constant 32 : index
    %c0_229 = arith.constant 0 : index
    %473 = vector.load %arg8[%c32_228, %c0_229] : memref<40x32xf32, #tpu.memory_space<vmem>>, vector<8x32xf32>
    tpu.vector_store %arg8[%c32_228, %c0_229], %471 {strides = array<i32>} : memref<40x32xf32, #tpu.memory_space<vmem>>, vector<8x32xf32>,
    %474 = vector.extract_strided_slice %382 {offsets = [32, 128], sizes = [8, 16], strides = [1, 1]} : vector<40x144xf32> to vector<8x16xf32>
    %c0_230 = arith.constant 0 : index
    %c0_231 = arith.constant 0 : index
    %475 = vector.load %arg11[%c0_230, %c0_231] : memref<8x16xf32, #tpu.memory_space<vmem>>, vector<8x16xf32>
    %c0_232 = arith.constant 0 : index
    %c0_233 = arith.constant 0 : index
    %476 = vector.load %arg10[%c0_232, %c0_233] : memref<8x16xf32, #tpu.memory_space<vmem>>, vector<8x16xf32>
    %cst_234 = arith.constant 0.899999976 : f32
    %477 = vector.broadcast %cst_234 : f32 to vector<8x16xf32>
    %478 = arith.mulf %477, %475 : vector<8x16xf32>
    %479 = arith.addf %478, %474 : vector<8x16xf32>
    %cst_235 = arith.constant 1.000000e+00 : f32
    %480 = vector.broadcast %cst_235 : f32 to vector<8x16xf32>
    %481 = arith.mulf %476, %480 : vector<8x16xf32>
    %482 = arith.subf %479, %481 : vector<8x16xf32>
    %cst_236 = arith.constant 1.000000e+00 : f32
    %483 = vector.broadcast %cst_236 : f32 to vector<8x16xf32>
    %484 = arith.cmpf ogt, %482, %483 : vector<8x16xf32>
    %485 = arith.extui %484 : vector<8x16xi1> to vector<8x16xi32>
    %486 = arith.sitofp %485 : vector<8x16xi32> to vector<8x16xf32>
    %c5_i32_237 = arith.constant 5 : i32
    %487 = vector.broadcast %c5_i32_237 : i32 to vector<8x16xi32>
    %488 = arith.cmpi sge, %377, %487 : vector<8x16xi32>
    %489 = arith.select %488, %482, %475 : vector<8x16xi1>, vector<8x16xf32>
    %490 = arith.select %488, %486, %476 : vector<8x16xi1>, vector<8x16xf32>
    %c0_238 = arith.constant 0 : index
    %c0_239 = arith.constant 0 : index
    %491 = vector.load %arg11[%c0_238, %c0_239] : memref<8x16xf32, #tpu.memory_space<vmem>>, vector<8x16xf32>
    tpu.vector_store %arg11[%c0_238, %c0_239], %489 {strides = array<i32>} : memref<8x16xf32, #tpu.memory_space<vmem>>, vector<8x16xf32>,
    %c0_240 = arith.constant 0 : index
    %c0_241 = arith.constant 0 : index
    %492 = vector.load %arg10[%c0_240, %c0_241] : memref<8x16xf32, #tpu.memory_space<vmem>>, vector<8x16xf32>
    tpu.vector_store %arg10[%c0_240, %c0_241], %490 {strides = array<i32>} : memref<8x16xf32, #tpu.memory_space<vmem>>, vector<8x16xf32>,
    %c0_242 = arith.constant 0 : index
    %c48 = arith.constant 48 : index
    %493 = vector.load %arg6[%c0_242, %c48] : memref<8x128xf32, #tpu.memory_space<vmem>>, vector<8x16xf32>
    tpu.vector_store %arg6[%c0_242, %c48], %490 {strides = array<i32>} : memref<8x128xf32, #tpu.memory_space<vmem>>, vector<8x16xf32>,
    %c0_243 = arith.constant 0 : index
    %c48_244 = arith.constant 48 : index
    %494 = vector.load %arg7[%c0_243, %c48_244] : memref<8x128xf32, #tpu.memory_space<vmem>>, vector<8x16xf32>
    tpu.vector_store %arg7[%c0_243, %c48_244], %489 {strides = array<i32>} : memref<8x128xf32, #tpu.memory_space<vmem>>, vector<8x16xf32>,
    %c4_i32_245 = arith.constant 4 : i32
    %495 = arith.addi %14, %c4_i32_245 : i32
    %496 = vector.broadcast %495 : i32 to vector<8x32xi32>
    %497 = vector.broadcast %495 : i32 to vector<8x16xi32>
    %c0_246 = arith.constant 0 : index
    %c0_247 = arith.constant 0 : index
    %498 = vector.load %arg8[%c0_246, %c0_247] : memref<40x32xf32, #tpu.memory_space<vmem>>, vector<40x32xf32>
    %c0_248 = arith.constant 0 : index
    %c0_249 = arith.constant 0 : index
    %499 = vector.load %arg9[%c0_248, %c0_249] : memref<40x32xf32, #tpu.memory_space<vmem>>, vector<40x32xf32>
    %500 = arith.truncf %498 : vector<40x32xf32> to vector<40x32xbf16>
    %cst_250 = arith.constant dense<0.000000e+00> : vector<40x144xf32>
    %501 = tpu.matmul %500, %3, %cst_250 {dimension_numbers = #tpu.dot_dimension_numbers<[1], [0], [0], [1], [0, 0, 1, 1], [], []>} : vector<40x32xbf16>, vector<32x144xbf16>, vector<40x144xf32> -> vector<40x144xf32>
    %502 = arith.addf %501, %6 : vector<40x144xf32>
    %503 = vector.extract_strided_slice %499 {offsets = [0, 0], sizes = [8, 32], strides = [1, 1]} : vector<40x32xf32> to vector<8x32xf32>
    %504 = vector.extract_strided_slice %498 {offsets = [0, 0], sizes = [8, 32], strides = [1, 1]} : vector<40x32xf32> to vector<8x32xf32>
    %cst_251 = arith.constant 0.899999976 : f32
    %505 = vector.broadcast %cst_251 : f32 to vector<8x32xf32>
    %506 = arith.mulf %505, %503 : vector<8x32xf32>
    %507 = vector.extract_strided_slice %13 {offsets = [32, 0], sizes = [8, 32], strides = [1, 1]} : vector<64x32xf32> to vector<8x32xf32>
    %508 = arith.addf %506, %507 : vector<8x32xf32>
    %cst_252 = arith.constant 5.000000e-01 : f32
    %509 = vector.broadcast %cst_252 : f32 to vector<8x32xf32>
    %510 = arith.mulf %504, %509 : vector<8x32xf32>
    %511 = arith.subf %508, %510 : vector<8x32xf32>
    %cst_253 = arith.constant 5.000000e-01 : f32
    %512 = vector.broadcast %cst_253 : f32 to vector<8x32xf32>
    %513 = arith.cmpf ogt, %511, %512 : vector<8x32xf32>
    %514 = arith.extui %513 : vector<8x32xi1> to vector<8x32xi32>
    %515 = arith.sitofp %514 : vector<8x32xi32> to vector<8x32xf32>
    %c0_254 = arith.constant 0 : index
    %c0_255 = arith.constant 0 : index
    %516 = vector.load %arg9[%c0_254, %c0_255] : memref<40x32xf32, #tpu.memory_space<vmem>>, vector<8x32xf32>
    tpu.vector_store %arg9[%c0_254, %c0_255], %511 {strides = array<i32>} : memref<40x32xf32, #tpu.memory_space<vmem>>, vector<8x32xf32>,
    %c0_256 = arith.constant 0 : index
    %c0_257 = arith.constant 0 : index
    %517 = vector.load %arg8[%c0_256, %c0_257] : memref<40x32xf32, #tpu.memory_space<vmem>>, vector<8x32xf32>
    tpu.vector_store %arg8[%c0_256, %c0_257], %515 {strides = array<i32>} : memref<40x32xf32, #tpu.memory_space<vmem>>, vector<8x32xf32>,
    %518 = vector.extract_strided_slice %502 {offsets = [0, 0], sizes = [8, 32], strides = [1, 1]} : vector<40x144xf32> to vector<8x32xf32>
    %519 = vector.extract_strided_slice %499 {offsets = [8, 0], sizes = [8, 32], strides = [1, 1]} : vector<40x32xf32> to vector<8x32xf32>
    %520 = vector.extract_strided_slice %498 {offsets = [8, 0], sizes = [8, 32], strides = [1, 1]} : vector<40x32xf32> to vector<8x32xf32>
    %cst_258 = arith.constant 0.899999976 : f32
    %521 = vector.broadcast %cst_258 : f32 to vector<8x32xf32>
    %522 = arith.mulf %521, %519 : vector<8x32xf32>
    %523 = arith.addf %522, %518 : vector<8x32xf32>
    %cst_259 = arith.constant 1.000000e+00 : f32
    %524 = vector.broadcast %cst_259 : f32 to vector<8x32xf32>
    %525 = arith.mulf %520, %524 : vector<8x32xf32>
    %526 = arith.subf %523, %525 : vector<8x32xf32>
    %cst_260 = arith.constant 1.000000e+00 : f32
    %527 = vector.broadcast %cst_260 : f32 to vector<8x32xf32>
    %528 = arith.cmpf ogt, %526, %527 : vector<8x32xf32>
    %529 = arith.extui %528 : vector<8x32xi1> to vector<8x32xi32>
    %530 = arith.sitofp %529 : vector<8x32xi32> to vector<8x32xf32>
    %c1_i32_261 = arith.constant 1 : i32
    %531 = vector.broadcast %c1_i32_261 : i32 to vector<8x32xi32>
    %532 = arith.cmpi sge, %496, %531 : vector<8x32xi32>
    %533 = arith.select %532, %526, %519 : vector<8x32xi1>, vector<8x32xf32>
    %534 = arith.select %532, %530, %520 : vector<8x32xi1>, vector<8x32xf32>
    %c8_262 = arith.constant 8 : index
    %c0_263 = arith.constant 0 : index
    %535 = vector.load %arg9[%c8_262, %c0_263] : memref<40x32xf32, #tpu.memory_space<vmem>>, vector<8x32xf32>
    tpu.vector_store %arg9[%c8_262, %c0_263], %533 {strides = array<i32>} : memref<40x32xf32, #tpu.memory_space<vmem>>, vector<8x32xf32>,
    %c8_264 = arith.constant 8 : index
    %c0_265 = arith.constant 0 : index
    %536 = vector.load %arg8[%c8_264, %c0_265] : memref<40x32xf32, #tpu.memory_space<vmem>>, vector<8x32xf32>
    tpu.vector_store %arg8[%c8_264, %c0_265], %534 {strides = array<i32>} : memref<40x32xf32, #tpu.memory_space<vmem>>, vector<8x32xf32>,
    %537 = vector.extract_strided_slice %502 {offsets = [8, 32], sizes = [8, 32], strides = [1, 1]} : vector<40x144xf32> to vector<8x32xf32>
    %538 = vector.extract_strided_slice %499 {offsets = [16, 0], sizes = [8, 32], strides = [1, 1]} : vector<40x32xf32> to vector<8x32xf32>
    %539 = vector.extract_strided_slice %498 {offsets = [16, 0], sizes = [8, 32], strides = [1, 1]} : vector<40x32xf32> to vector<8x32xf32>
    %cst_266 = arith.constant 0.899999976 : f32
    %540 = vector.broadcast %cst_266 : f32 to vector<8x32xf32>
    %541 = arith.mulf %540, %538 : vector<8x32xf32>
    %542 = arith.addf %541, %537 : vector<8x32xf32>
    %cst_267 = arith.constant 1.000000e+00 : f32
    %543 = vector.broadcast %cst_267 : f32 to vector<8x32xf32>
    %544 = arith.mulf %539, %543 : vector<8x32xf32>
    %545 = arith.subf %542, %544 : vector<8x32xf32>
    %cst_268 = arith.constant 1.000000e+00 : f32
    %546 = vector.broadcast %cst_268 : f32 to vector<8x32xf32>
    %547 = arith.cmpf ogt, %545, %546 : vector<8x32xf32>
    %548 = arith.extui %547 : vector<8x32xi1> to vector<8x32xi32>
    %549 = arith.sitofp %548 : vector<8x32xi32> to vector<8x32xf32>
    %c2_i32_269 = arith.constant 2 : i32
    %550 = vector.broadcast %c2_i32_269 : i32 to vector<8x32xi32>
    %551 = arith.cmpi sge, %496, %550 : vector<8x32xi32>
    %552 = arith.select %551, %545, %538 : vector<8x32xi1>, vector<8x32xf32>
    %553 = arith.select %551, %549, %539 : vector<8x32xi1>, vector<8x32xf32>
    %c16_270 = arith.constant 16 : index
    %c0_271 = arith.constant 0 : index
    %554 = vector.load %arg9[%c16_270, %c0_271] : memref<40x32xf32, #tpu.memory_space<vmem>>, vector<8x32xf32>
    tpu.vector_store %arg9[%c16_270, %c0_271], %552 {strides = array<i32>} : memref<40x32xf32, #tpu.memory_space<vmem>>, vector<8x32xf32>,
    %c16_272 = arith.constant 16 : index
    %c0_273 = arith.constant 0 : index
    %555 = vector.load %arg8[%c16_272, %c0_273] : memref<40x32xf32, #tpu.memory_space<vmem>>, vector<8x32xf32>
    tpu.vector_store %arg8[%c16_272, %c0_273], %553 {strides = array<i32>} : memref<40x32xf32, #tpu.memory_space<vmem>>, vector<8x32xf32>,
    %556 = vector.extract_strided_slice %502 {offsets = [16, 64], sizes = [8, 32], strides = [1, 1]} : vector<40x144xf32> to vector<8x32xf32>
    %557 = vector.extract_strided_slice %499 {offsets = [24, 0], sizes = [8, 32], strides = [1, 1]} : vector<40x32xf32> to vector<8x32xf32>
    %558 = vector.extract_strided_slice %498 {offsets = [24, 0], sizes = [8, 32], strides = [1, 1]} : vector<40x32xf32> to vector<8x32xf32>
    %cst_274 = arith.constant 0.899999976 : f32
    %559 = vector.broadcast %cst_274 : f32 to vector<8x32xf32>
    %560 = arith.mulf %559, %557 : vector<8x32xf32>
    %561 = arith.addf %560, %556 : vector<8x32xf32>
    %cst_275 = arith.constant 1.000000e+00 : f32
    %562 = vector.broadcast %cst_275 : f32 to vector<8x32xf32>
    %563 = arith.mulf %558, %562 : vector<8x32xf32>
    %564 = arith.subf %561, %563 : vector<8x32xf32>
    %cst_276 = arith.constant 1.000000e+00 : f32
    %565 = vector.broadcast %cst_276 : f32 to vector<8x32xf32>
    %566 = arith.cmpf ogt, %564, %565 : vector<8x32xf32>
    %567 = arith.extui %566 : vector<8x32xi1> to vector<8x32xi32>
    %568 = arith.sitofp %567 : vector<8x32xi32> to vector<8x32xf32>
    %c3_i32_277 = arith.constant 3 : i32
    %569 = vector.broadcast %c3_i32_277 : i32 to vector<8x32xi32>
    %570 = arith.cmpi sge, %496, %569 : vector<8x32xi32>
    %571 = arith.select %570, %564, %557 : vector<8x32xi1>, vector<8x32xf32>
    %572 = arith.select %570, %568, %558 : vector<8x32xi1>, vector<8x32xf32>
    %c24_278 = arith.constant 24 : index
    %c0_279 = arith.constant 0 : index
    %573 = vector.load %arg9[%c24_278, %c0_279] : memref<40x32xf32, #tpu.memory_space<vmem>>, vector<8x32xf32>
    tpu.vector_store %arg9[%c24_278, %c0_279], %571 {strides = array<i32>} : memref<40x32xf32, #tpu.memory_space<vmem>>, vector<8x32xf32>,
    %c24_280 = arith.constant 24 : index
    %c0_281 = arith.constant 0 : index
    %574 = vector.load %arg8[%c24_280, %c0_281] : memref<40x32xf32, #tpu.memory_space<vmem>>, vector<8x32xf32>
    tpu.vector_store %arg8[%c24_280, %c0_281], %572 {strides = array<i32>} : memref<40x32xf32, #tpu.memory_space<vmem>>, vector<8x32xf32>,
    %575 = vector.extract_strided_slice %502 {offsets = [24, 96], sizes = [8, 32], strides = [1, 1]} : vector<40x144xf32> to vector<8x32xf32>
    %576 = vector.extract_strided_slice %499 {offsets = [32, 0], sizes = [8, 32], strides = [1, 1]} : vector<40x32xf32> to vector<8x32xf32>
    %577 = vector.extract_strided_slice %498 {offsets = [32, 0], sizes = [8, 32], strides = [1, 1]} : vector<40x32xf32> to vector<8x32xf32>
    %cst_282 = arith.constant 0.899999976 : f32
    %578 = vector.broadcast %cst_282 : f32 to vector<8x32xf32>
    %579 = arith.mulf %578, %576 : vector<8x32xf32>
    %580 = arith.addf %579, %575 : vector<8x32xf32>
    %cst_283 = arith.constant 1.000000e+00 : f32
    %581 = vector.broadcast %cst_283 : f32 to vector<8x32xf32>
    %582 = arith.mulf %577, %581 : vector<8x32xf32>
    %583 = arith.subf %580, %582 : vector<8x32xf32>
    %cst_284 = arith.constant 1.000000e+00 : f32
    %584 = vector.broadcast %cst_284 : f32 to vector<8x32xf32>
    %585 = arith.cmpf ogt, %583, %584 : vector<8x32xf32>
    %586 = arith.extui %585 : vector<8x32xi1> to vector<8x32xi32>
    %587 = arith.sitofp %586 : vector<8x32xi32> to vector<8x32xf32>
    %c4_i32_285 = arith.constant 4 : i32
    %588 = vector.broadcast %c4_i32_285 : i32 to vector<8x32xi32>
    %589 = arith.cmpi sge, %496, %588 : vector<8x32xi32>
    %590 = arith.select %589, %583, %576 : vector<8x32xi1>, vector<8x32xf32>
    %591 = arith.select %589, %587, %577 : vector<8x32xi1>, vector<8x32xf32>
    %c32_286 = arith.constant 32 : index
    %c0_287 = arith.constant 0 : index
    %592 = vector.load %arg9[%c32_286, %c0_287] : memref<40x32xf32, #tpu.memory_space<vmem>>, vector<8x32xf32>
    tpu.vector_store %arg9[%c32_286, %c0_287], %590 {strides = array<i32>} : memref<40x32xf32, #tpu.memory_space<vmem>>, vector<8x32xf32>,
    %c32_288 = arith.constant 32 : index
    %c0_289 = arith.constant 0 : index
    %593 = vector.load %arg8[%c32_288, %c0_289] : memref<40x32xf32, #tpu.memory_space<vmem>>, vector<8x32xf32>
    tpu.vector_store %arg8[%c32_288, %c0_289], %591 {strides = array<i32>} : memref<40x32xf32, #tpu.memory_space<vmem>>, vector<8x32xf32>,
    %594 = vector.extract_strided_slice %502 {offsets = [32, 128], sizes = [8, 16], strides = [1, 1]} : vector<40x144xf32> to vector<8x16xf32>
    %c0_290 = arith.constant 0 : index
    %c0_291 = arith.constant 0 : index
    %595 = vector.load %arg11[%c0_290, %c0_291] : memref<8x16xf32, #tpu.memory_space<vmem>>, vector<8x16xf32>
    %c0_292 = arith.constant 0 : index
    %c0_293 = arith.constant 0 : index
    %596 = vector.load %arg10[%c0_292, %c0_293] : memref<8x16xf32, #tpu.memory_space<vmem>>, vector<8x16xf32>
    %cst_294 = arith.constant 0.899999976 : f32
    %597 = vector.broadcast %cst_294 : f32 to vector<8x16xf32>
    %598 = arith.mulf %597, %595 : vector<8x16xf32>
    %599 = arith.addf %598, %594 : vector<8x16xf32>
    %cst_295 = arith.constant 1.000000e+00 : f32
    %600 = vector.broadcast %cst_295 : f32 to vector<8x16xf32>
    %601 = arith.mulf %596, %600 : vector<8x16xf32>
    %602 = arith.subf %599, %601 : vector<8x16xf32>
    %cst_296 = arith.constant 1.000000e+00 : f32
    %603 = vector.broadcast %cst_296 : f32 to vector<8x16xf32>
    %604 = arith.cmpf ogt, %602, %603 : vector<8x16xf32>
    %605 = arith.extui %604 : vector<8x16xi1> to vector<8x16xi32>
    %606 = arith.sitofp %605 : vector<8x16xi32> to vector<8x16xf32>
    %c5_i32_297 = arith.constant 5 : i32
    %607 = vector.broadcast %c5_i32_297 : i32 to vector<8x16xi32>
    %608 = arith.cmpi sge, %497, %607 : vector<8x16xi32>
    %609 = arith.select %608, %602, %595 : vector<8x16xi1>, vector<8x16xf32>
    %610 = arith.select %608, %606, %596 : vector<8x16xi1>, vector<8x16xf32>
    %c0_298 = arith.constant 0 : index
    %c0_299 = arith.constant 0 : index
    %611 = vector.load %arg11[%c0_298, %c0_299] : memref<8x16xf32, #tpu.memory_space<vmem>>, vector<8x16xf32>
    tpu.vector_store %arg11[%c0_298, %c0_299], %609 {strides = array<i32>} : memref<8x16xf32, #tpu.memory_space<vmem>>, vector<8x16xf32>,
    %c0_300 = arith.constant 0 : index
    %c0_301 = arith.constant 0 : index
    %612 = vector.load %arg10[%c0_300, %c0_301] : memref<8x16xf32, #tpu.memory_space<vmem>>, vector<8x16xf32>
    tpu.vector_store %arg10[%c0_300, %c0_301], %610 {strides = array<i32>} : memref<8x16xf32, #tpu.memory_space<vmem>>, vector<8x16xf32>,
    %c0_302 = arith.constant 0 : index
    %c64 = arith.constant 64 : index
    %613 = vector.load %arg6[%c0_302, %c64] : memref<8x128xf32, #tpu.memory_space<vmem>>, vector<8x16xf32>
    tpu.vector_store %arg6[%c0_302, %c64], %610 {strides = array<i32>} : memref<8x128xf32, #tpu.memory_space<vmem>>, vector<8x16xf32>,
    %c0_303 = arith.constant 0 : index
    %c64_304 = arith.constant 64 : index
    %614 = vector.load %arg7[%c0_303, %c64_304] : memref<8x128xf32, #tpu.memory_space<vmem>>, vector<8x16xf32>
    tpu.vector_store %arg7[%c0_303, %c64_304], %609 {strides = array<i32>} : memref<8x128xf32, #tpu.memory_space<vmem>>, vector<8x16xf32>,
    %c5_i32_305 = arith.constant 5 : i32
    %615 = arith.addi %14, %c5_i32_305 : i32
    %616 = vector.broadcast %615 : i32 to vector<8x32xi32>
    %617 = vector.broadcast %615 : i32 to vector<8x16xi32>
    %c0_306 = arith.constant 0 : index
    %c0_307 = arith.constant 0 : index
    %618 = vector.load %arg8[%c0_306, %c0_307] : memref<40x32xf32, #tpu.memory_space<vmem>>, vector<40x32xf32>
    %c0_308 = arith.constant 0 : index
    %c0_309 = arith.constant 0 : index
    %619 = vector.load %arg9[%c0_308, %c0_309] : memref<40x32xf32, #tpu.memory_space<vmem>>, vector<40x32xf32>
    %620 = arith.truncf %618 : vector<40x32xf32> to vector<40x32xbf16>
    %cst_310 = arith.constant dense<0.000000e+00> : vector<40x144xf32>
    %621 = tpu.matmul %620, %3, %cst_310 {dimension_numbers = #tpu.dot_dimension_numbers<[1], [0], [0], [1], [0, 0, 1, 1], [], []>} : vector<40x32xbf16>, vector<32x144xbf16>, vector<40x144xf32> -> vector<40x144xf32>
    %622 = arith.addf %621, %6 : vector<40x144xf32>
    %623 = vector.extract_strided_slice %619 {offsets = [0, 0], sizes = [8, 32], strides = [1, 1]} : vector<40x32xf32> to vector<8x32xf32>
    %624 = vector.extract_strided_slice %618 {offsets = [0, 0], sizes = [8, 32], strides = [1, 1]} : vector<40x32xf32> to vector<8x32xf32>
    %cst_311 = arith.constant 0.899999976 : f32
    %625 = vector.broadcast %cst_311 : f32 to vector<8x32xf32>
    %626 = arith.mulf %625, %623 : vector<8x32xf32>
    %627 = vector.extract_strided_slice %13 {offsets = [40, 0], sizes = [8, 32], strides = [1, 1]} : vector<64x32xf32> to vector<8x32xf32>
    %628 = arith.addf %626, %627 : vector<8x32xf32>
    %cst_312 = arith.constant 5.000000e-01 : f32
    %629 = vector.broadcast %cst_312 : f32 to vector<8x32xf32>
    %630 = arith.mulf %624, %629 : vector<8x32xf32>
    %631 = arith.subf %628, %630 : vector<8x32xf32>
    %cst_313 = arith.constant 5.000000e-01 : f32
    %632 = vector.broadcast %cst_313 : f32 to vector<8x32xf32>
    %633 = arith.cmpf ogt, %631, %632 : vector<8x32xf32>
    %634 = arith.extui %633 : vector<8x32xi1> to vector<8x32xi32>
    %635 = arith.sitofp %634 : vector<8x32xi32> to vector<8x32xf32>
    %c0_314 = arith.constant 0 : index
    %c0_315 = arith.constant 0 : index
    %636 = vector.load %arg9[%c0_314, %c0_315] : memref<40x32xf32, #tpu.memory_space<vmem>>, vector<8x32xf32>
    tpu.vector_store %arg9[%c0_314, %c0_315], %631 {strides = array<i32>} : memref<40x32xf32, #tpu.memory_space<vmem>>, vector<8x32xf32>,
    %c0_316 = arith.constant 0 : index
    %c0_317 = arith.constant 0 : index
    %637 = vector.load %arg8[%c0_316, %c0_317] : memref<40x32xf32, #tpu.memory_space<vmem>>, vector<8x32xf32>
    tpu.vector_store %arg8[%c0_316, %c0_317], %635 {strides = array<i32>} : memref<40x32xf32, #tpu.memory_space<vmem>>, vector<8x32xf32>,
    %638 = vector.extract_strided_slice %622 {offsets = [0, 0], sizes = [8, 32], strides = [1, 1]} : vector<40x144xf32> to vector<8x32xf32>
    %639 = vector.extract_strided_slice %619 {offsets = [8, 0], sizes = [8, 32], strides = [1, 1]} : vector<40x32xf32> to vector<8x32xf32>
    %640 = vector.extract_strided_slice %618 {offsets = [8, 0], sizes = [8, 32], strides = [1, 1]} : vector<40x32xf32> to vector<8x32xf32>
    %cst_318 = arith.constant 0.899999976 : f32
    %641 = vector.broadcast %cst_318 : f32 to vector<8x32xf32>
    %642 = arith.mulf %641, %639 : vector<8x32xf32>
    %643 = arith.addf %642, %638 : vector<8x32xf32>
    %cst_319 = arith.constant 1.000000e+00 : f32
    %644 = vector.broadcast %cst_319 : f32 to vector<8x32xf32>
    %645 = arith.mulf %640, %644 : vector<8x32xf32>
    %646 = arith.subf %643, %645 : vector<8x32xf32>
    %cst_320 = arith.constant 1.000000e+00 : f32
    %647 = vector.broadcast %cst_320 : f32 to vector<8x32xf32>
    %648 = arith.cmpf ogt, %646, %647 : vector<8x32xf32>
    %649 = arith.extui %648 : vector<8x32xi1> to vector<8x32xi32>
    %650 = arith.sitofp %649 : vector<8x32xi32> to vector<8x32xf32>
    %c1_i32_321 = arith.constant 1 : i32
    %651 = vector.broadcast %c1_i32_321 : i32 to vector<8x32xi32>
    %652 = arith.cmpi sge, %616, %651 : vector<8x32xi32>
    %653 = arith.select %652, %646, %639 : vector<8x32xi1>, vector<8x32xf32>
    %654 = arith.select %652, %650, %640 : vector<8x32xi1>, vector<8x32xf32>
    %c8_322 = arith.constant 8 : index
    %c0_323 = arith.constant 0 : index
    %655 = vector.load %arg9[%c8_322, %c0_323] : memref<40x32xf32, #tpu.memory_space<vmem>>, vector<8x32xf32>
    tpu.vector_store %arg9[%c8_322, %c0_323], %653 {strides = array<i32>} : memref<40x32xf32, #tpu.memory_space<vmem>>, vector<8x32xf32>,
    %c8_324 = arith.constant 8 : index
    %c0_325 = arith.constant 0 : index
    %656 = vector.load %arg8[%c8_324, %c0_325] : memref<40x32xf32, #tpu.memory_space<vmem>>, vector<8x32xf32>
    tpu.vector_store %arg8[%c8_324, %c0_325], %654 {strides = array<i32>} : memref<40x32xf32, #tpu.memory_space<vmem>>, vector<8x32xf32>,
    %657 = vector.extract_strided_slice %622 {offsets = [8, 32], sizes = [8, 32], strides = [1, 1]} : vector<40x144xf32> to vector<8x32xf32>
    %658 = vector.extract_strided_slice %619 {offsets = [16, 0], sizes = [8, 32], strides = [1, 1]} : vector<40x32xf32> to vector<8x32xf32>
    %659 = vector.extract_strided_slice %618 {offsets = [16, 0], sizes = [8, 32], strides = [1, 1]} : vector<40x32xf32> to vector<8x32xf32>
    %cst_326 = arith.constant 0.899999976 : f32
    %660 = vector.broadcast %cst_326 : f32 to vector<8x32xf32>
    %661 = arith.mulf %660, %658 : vector<8x32xf32>
    %662 = arith.addf %661, %657 : vector<8x32xf32>
    %cst_327 = arith.constant 1.000000e+00 : f32
    %663 = vector.broadcast %cst_327 : f32 to vector<8x32xf32>
    %664 = arith.mulf %659, %663 : vector<8x32xf32>
    %665 = arith.subf %662, %664 : vector<8x32xf32>
    %cst_328 = arith.constant 1.000000e+00 : f32
    %666 = vector.broadcast %cst_328 : f32 to vector<8x32xf32>
    %667 = arith.cmpf ogt, %665, %666 : vector<8x32xf32>
    %668 = arith.extui %667 : vector<8x32xi1> to vector<8x32xi32>
    %669 = arith.sitofp %668 : vector<8x32xi32> to vector<8x32xf32>
    %c2_i32_329 = arith.constant 2 : i32
    %670 = vector.broadcast %c2_i32_329 : i32 to vector<8x32xi32>
    %671 = arith.cmpi sge, %616, %670 : vector<8x32xi32>
    %672 = arith.select %671, %665, %658 : vector<8x32xi1>, vector<8x32xf32>
    %673 = arith.select %671, %669, %659 : vector<8x32xi1>, vector<8x32xf32>
    %c16_330 = arith.constant 16 : index
    %c0_331 = arith.constant 0 : index
    %674 = vector.load %arg9[%c16_330, %c0_331] : memref<40x32xf32, #tpu.memory_space<vmem>>, vector<8x32xf32>
    tpu.vector_store %arg9[%c16_330, %c0_331], %672 {strides = array<i32>} : memref<40x32xf32, #tpu.memory_space<vmem>>, vector<8x32xf32>,
    %c16_332 = arith.constant 16 : index
    %c0_333 = arith.constant 0 : index
    %675 = vector.load %arg8[%c16_332, %c0_333] : memref<40x32xf32, #tpu.memory_space<vmem>>, vector<8x32xf32>
    tpu.vector_store %arg8[%c16_332, %c0_333], %673 {strides = array<i32>} : memref<40x32xf32, #tpu.memory_space<vmem>>, vector<8x32xf32>,
    %676 = vector.extract_strided_slice %622 {offsets = [16, 64], sizes = [8, 32], strides = [1, 1]} : vector<40x144xf32> to vector<8x32xf32>
    %677 = vector.extract_strided_slice %619 {offsets = [24, 0], sizes = [8, 32], strides = [1, 1]} : vector<40x32xf32> to vector<8x32xf32>
    %678 = vector.extract_strided_slice %618 {offsets = [24, 0], sizes = [8, 32], strides = [1, 1]} : vector<40x32xf32> to vector<8x32xf32>
    %cst_334 = arith.constant 0.899999976 : f32
    %679 = vector.broadcast %cst_334 : f32 to vector<8x32xf32>
    %680 = arith.mulf %679, %677 : vector<8x32xf32>
    %681 = arith.addf %680, %676 : vector<8x32xf32>
    %cst_335 = arith.constant 1.000000e+00 : f32
    %682 = vector.broadcast %cst_335 : f32 to vector<8x32xf32>
    %683 = arith.mulf %678, %682 : vector<8x32xf32>
    %684 = arith.subf %681, %683 : vector<8x32xf32>
    %cst_336 = arith.constant 1.000000e+00 : f32
    %685 = vector.broadcast %cst_336 : f32 to vector<8x32xf32>
    %686 = arith.cmpf ogt, %684, %685 : vector<8x32xf32>
    %687 = arith.extui %686 : vector<8x32xi1> to vector<8x32xi32>
    %688 = arith.sitofp %687 : vector<8x32xi32> to vector<8x32xf32>
    %c3_i32_337 = arith.constant 3 : i32
    %689 = vector.broadcast %c3_i32_337 : i32 to vector<8x32xi32>
    %690 = arith.cmpi sge, %616, %689 : vector<8x32xi32>
    %691 = arith.select %690, %684, %677 : vector<8x32xi1>, vector<8x32xf32>
    %692 = arith.select %690, %688, %678 : vector<8x32xi1>, vector<8x32xf32>
    %c24_338 = arith.constant 24 : index
    %c0_339 = arith.constant 0 : index
    %693 = vector.load %arg9[%c24_338, %c0_339] : memref<40x32xf32, #tpu.memory_space<vmem>>, vector<8x32xf32>
    tpu.vector_store %arg9[%c24_338, %c0_339], %691 {strides = array<i32>} : memref<40x32xf32, #tpu.memory_space<vmem>>, vector<8x32xf32>,
    %c24_340 = arith.constant 24 : index
    %c0_341 = arith.constant 0 : index
    %694 = vector.load %arg8[%c24_340, %c0_341] : memref<40x32xf32, #tpu.memory_space<vmem>>, vector<8x32xf32>
    tpu.vector_store %arg8[%c24_340, %c0_341], %692 {strides = array<i32>} : memref<40x32xf32, #tpu.memory_space<vmem>>, vector<8x32xf32>,
    %695 = vector.extract_strided_slice %622 {offsets = [24, 96], sizes = [8, 32], strides = [1, 1]} : vector<40x144xf32> to vector<8x32xf32>
    %696 = vector.extract_strided_slice %619 {offsets = [32, 0], sizes = [8, 32], strides = [1, 1]} : vector<40x32xf32> to vector<8x32xf32>
    %697 = vector.extract_strided_slice %618 {offsets = [32, 0], sizes = [8, 32], strides = [1, 1]} : vector<40x32xf32> to vector<8x32xf32>
    %cst_342 = arith.constant 0.899999976 : f32
    %698 = vector.broadcast %cst_342 : f32 to vector<8x32xf32>
    %699 = arith.mulf %698, %696 : vector<8x32xf32>
    %700 = arith.addf %699, %695 : vector<8x32xf32>
    %cst_343 = arith.constant 1.000000e+00 : f32
    %701 = vector.broadcast %cst_343 : f32 to vector<8x32xf32>
    %702 = arith.mulf %697, %701 : vector<8x32xf32>
    %703 = arith.subf %700, %702 : vector<8x32xf32>
    %cst_344 = arith.constant 1.000000e+00 : f32
    %704 = vector.broadcast %cst_344 : f32 to vector<8x32xf32>
    %705 = arith.cmpf ogt, %703, %704 : vector<8x32xf32>
    %706 = arith.extui %705 : vector<8x32xi1> to vector<8x32xi32>
    %707 = arith.sitofp %706 : vector<8x32xi32> to vector<8x32xf32>
    %c4_i32_345 = arith.constant 4 : i32
    %708 = vector.broadcast %c4_i32_345 : i32 to vector<8x32xi32>
    %709 = arith.cmpi sge, %616, %708 : vector<8x32xi32>
    %710 = arith.select %709, %703, %696 : vector<8x32xi1>, vector<8x32xf32>
    %711 = arith.select %709, %707, %697 : vector<8x32xi1>, vector<8x32xf32>
    %c32_346 = arith.constant 32 : index
    %c0_347 = arith.constant 0 : index
    %712 = vector.load %arg9[%c32_346, %c0_347] : memref<40x32xf32, #tpu.memory_space<vmem>>, vector<8x32xf32>
    tpu.vector_store %arg9[%c32_346, %c0_347], %710 {strides = array<i32>} : memref<40x32xf32, #tpu.memory_space<vmem>>, vector<8x32xf32>,
    %c32_348 = arith.constant 32 : index
    %c0_349 = arith.constant 0 : index
    %713 = vector.load %arg8[%c32_348, %c0_349] : memref<40x32xf32, #tpu.memory_space<vmem>>, vector<8x32xf32>
    tpu.vector_store %arg8[%c32_348, %c0_349], %711 {strides = array<i32>} : memref<40x32xf32, #tpu.memory_space<vmem>>, vector<8x32xf32>,
    %714 = vector.extract_strided_slice %622 {offsets = [32, 128], sizes = [8, 16], strides = [1, 1]} : vector<40x144xf32> to vector<8x16xf32>
    %c0_350 = arith.constant 0 : index
    %c0_351 = arith.constant 0 : index
    %715 = vector.load %arg11[%c0_350, %c0_351] : memref<8x16xf32, #tpu.memory_space<vmem>>, vector<8x16xf32>
    %c0_352 = arith.constant 0 : index
    %c0_353 = arith.constant 0 : index
    %716 = vector.load %arg10[%c0_352, %c0_353] : memref<8x16xf32, #tpu.memory_space<vmem>>, vector<8x16xf32>
    %cst_354 = arith.constant 0.899999976 : f32
    %717 = vector.broadcast %cst_354 : f32 to vector<8x16xf32>
    %718 = arith.mulf %717, %715 : vector<8x16xf32>
    %719 = arith.addf %718, %714 : vector<8x16xf32>
    %cst_355 = arith.constant 1.000000e+00 : f32
    %720 = vector.broadcast %cst_355 : f32 to vector<8x16xf32>
    %721 = arith.mulf %716, %720 : vector<8x16xf32>
    %722 = arith.subf %719, %721 : vector<8x16xf32>
    %cst_356 = arith.constant 1.000000e+00 : f32
    %723 = vector.broadcast %cst_356 : f32 to vector<8x16xf32>
    %724 = arith.cmpf ogt, %722, %723 : vector<8x16xf32>
    %725 = arith.extui %724 : vector<8x16xi1> to vector<8x16xi32>
    %726 = arith.sitofp %725 : vector<8x16xi32> to vector<8x16xf32>
    %c5_i32_357 = arith.constant 5 : i32
    %727 = vector.broadcast %c5_i32_357 : i32 to vector<8x16xi32>
    %728 = arith.cmpi sge, %617, %727 : vector<8x16xi32>
    %729 = arith.select %728, %722, %715 : vector<8x16xi1>, vector<8x16xf32>
    %730 = arith.select %728, %726, %716 : vector<8x16xi1>, vector<8x16xf32>
    %c0_358 = arith.constant 0 : index
    %c0_359 = arith.constant 0 : index
    %731 = vector.load %arg11[%c0_358, %c0_359] : memref<8x16xf32, #tpu.memory_space<vmem>>, vector<8x16xf32>
    tpu.vector_store %arg11[%c0_358, %c0_359], %729 {strides = array<i32>} : memref<8x16xf32, #tpu.memory_space<vmem>>, vector<8x16xf32>,
    %c0_360 = arith.constant 0 : index
    %c0_361 = arith.constant 0 : index
    %732 = vector.load %arg10[%c0_360, %c0_361] : memref<8x16xf32, #tpu.memory_space<vmem>>, vector<8x16xf32>
    tpu.vector_store %arg10[%c0_360, %c0_361], %730 {strides = array<i32>} : memref<8x16xf32, #tpu.memory_space<vmem>>, vector<8x16xf32>,
    %c0_362 = arith.constant 0 : index
    %c80 = arith.constant 80 : index
    %733 = vector.load %arg6[%c0_362, %c80] : memref<8x128xf32, #tpu.memory_space<vmem>>, vector<8x16xf32>
    tpu.vector_store %arg6[%c0_362, %c80], %730 {strides = array<i32>} : memref<8x128xf32, #tpu.memory_space<vmem>>, vector<8x16xf32>,
    %c0_363 = arith.constant 0 : index
    %c80_364 = arith.constant 80 : index
    %734 = vector.load %arg7[%c0_363, %c80_364] : memref<8x128xf32, #tpu.memory_space<vmem>>, vector<8x16xf32>
    tpu.vector_store %arg7[%c0_363, %c80_364], %729 {strides = array<i32>} : memref<8x128xf32, #tpu.memory_space<vmem>>, vector<8x16xf32>,
    %c6_i32 = arith.constant 6 : i32
    %735 = arith.addi %14, %c6_i32 : i32
    %736 = vector.broadcast %735 : i32 to vector<8x32xi32>
    %737 = vector.broadcast %735 : i32 to vector<8x16xi32>
    %c0_365 = arith.constant 0 : index
    %c0_366 = arith.constant 0 : index
    %738 = vector.load %arg8[%c0_365, %c0_366] : memref<40x32xf32, #tpu.memory_space<vmem>>, vector<40x32xf32>
    %c0_367 = arith.constant 0 : index
    %c0_368 = arith.constant 0 : index
    %739 = vector.load %arg9[%c0_367, %c0_368] : memref<40x32xf32, #tpu.memory_space<vmem>>, vector<40x32xf32>
    %740 = arith.truncf %738 : vector<40x32xf32> to vector<40x32xbf16>
    %cst_369 = arith.constant dense<0.000000e+00> : vector<40x144xf32>
    %741 = tpu.matmul %740, %3, %cst_369 {dimension_numbers = #tpu.dot_dimension_numbers<[1], [0], [0], [1], [0, 0, 1, 1], [], []>} : vector<40x32xbf16>, vector<32x144xbf16>, vector<40x144xf32> -> vector<40x144xf32>
    %742 = arith.addf %741, %6 : vector<40x144xf32>
    %743 = vector.extract_strided_slice %739 {offsets = [0, 0], sizes = [8, 32], strides = [1, 1]} : vector<40x32xf32> to vector<8x32xf32>
    %744 = vector.extract_strided_slice %738 {offsets = [0, 0], sizes = [8, 32], strides = [1, 1]} : vector<40x32xf32> to vector<8x32xf32>
    %cst_370 = arith.constant 0.899999976 : f32
    %745 = vector.broadcast %cst_370 : f32 to vector<8x32xf32>
    %746 = arith.mulf %745, %743 : vector<8x32xf32>
    %747 = vector.extract_strided_slice %13 {offsets = [48, 0], sizes = [8, 32], strides = [1, 1]} : vector<64x32xf32> to vector<8x32xf32>
    %748 = arith.addf %746, %747 : vector<8x32xf32>
    %cst_371 = arith.constant 5.000000e-01 : f32
    %749 = vector.broadcast %cst_371 : f32 to vector<8x32xf32>
    %750 = arith.mulf %744, %749 : vector<8x32xf32>
    %751 = arith.subf %748, %750 : vector<8x32xf32>
    %cst_372 = arith.constant 5.000000e-01 : f32
    %752 = vector.broadcast %cst_372 : f32 to vector<8x32xf32>
    %753 = arith.cmpf ogt, %751, %752 : vector<8x32xf32>
    %754 = arith.extui %753 : vector<8x32xi1> to vector<8x32xi32>
    %755 = arith.sitofp %754 : vector<8x32xi32> to vector<8x32xf32>
    %c0_373 = arith.constant 0 : index
    %c0_374 = arith.constant 0 : index
    %756 = vector.load %arg9[%c0_373, %c0_374] : memref<40x32xf32, #tpu.memory_space<vmem>>, vector<8x32xf32>
    tpu.vector_store %arg9[%c0_373, %c0_374], %751 {strides = array<i32>} : memref<40x32xf32, #tpu.memory_space<vmem>>, vector<8x32xf32>,
    %c0_375 = arith.constant 0 : index
    %c0_376 = arith.constant 0 : index
    %757 = vector.load %arg8[%c0_375, %c0_376] : memref<40x32xf32, #tpu.memory_space<vmem>>, vector<8x32xf32>
    tpu.vector_store %arg8[%c0_375, %c0_376], %755 {strides = array<i32>} : memref<40x32xf32, #tpu.memory_space<vmem>>, vector<8x32xf32>,
    %758 = vector.extract_strided_slice %742 {offsets = [0, 0], sizes = [8, 32], strides = [1, 1]} : vector<40x144xf32> to vector<8x32xf32>
    %759 = vector.extract_strided_slice %739 {offsets = [8, 0], sizes = [8, 32], strides = [1, 1]} : vector<40x32xf32> to vector<8x32xf32>
    %760 = vector.extract_strided_slice %738 {offsets = [8, 0], sizes = [8, 32], strides = [1, 1]} : vector<40x32xf32> to vector<8x32xf32>
    %cst_377 = arith.constant 0.899999976 : f32
    %761 = vector.broadcast %cst_377 : f32 to vector<8x32xf32>
    %762 = arith.mulf %761, %759 : vector<8x32xf32>
    %763 = arith.addf %762, %758 : vector<8x32xf32>
    %cst_378 = arith.constant 1.000000e+00 : f32
    %764 = vector.broadcast %cst_378 : f32 to vector<8x32xf32>
    %765 = arith.mulf %760, %764 : vector<8x32xf32>
    %766 = arith.subf %763, %765 : vector<8x32xf32>
    %cst_379 = arith.constant 1.000000e+00 : f32
    %767 = vector.broadcast %cst_379 : f32 to vector<8x32xf32>
    %768 = arith.cmpf ogt, %766, %767 : vector<8x32xf32>
    %769 = arith.extui %768 : vector<8x32xi1> to vector<8x32xi32>
    %770 = arith.sitofp %769 : vector<8x32xi32> to vector<8x32xf32>
    %c1_i32_380 = arith.constant 1 : i32
    %771 = vector.broadcast %c1_i32_380 : i32 to vector<8x32xi32>
    %772 = arith.cmpi sge, %736, %771 : vector<8x32xi32>
    %773 = arith.select %772, %766, %759 : vector<8x32xi1>, vector<8x32xf32>
    %774 = arith.select %772, %770, %760 : vector<8x32xi1>, vector<8x32xf32>
    %c8_381 = arith.constant 8 : index
    %c0_382 = arith.constant 0 : index
    %775 = vector.load %arg9[%c8_381, %c0_382] : memref<40x32xf32, #tpu.memory_space<vmem>>, vector<8x32xf32>
    tpu.vector_store %arg9[%c8_381, %c0_382], %773 {strides = array<i32>} : memref<40x32xf32, #tpu.memory_space<vmem>>, vector<8x32xf32>,
    %c8_383 = arith.constant 8 : index
    %c0_384 = arith.constant 0 : index
    %776 = vector.load %arg8[%c8_383, %c0_384] : memref<40x32xf32, #tpu.memory_space<vmem>>, vector<8x32xf32>
    tpu.vector_store %arg8[%c8_383, %c0_384], %774 {strides = array<i32>} : memref<40x32xf32, #tpu.memory_space<vmem>>, vector<8x32xf32>,
    %777 = vector.extract_strided_slice %742 {offsets = [8, 32], sizes = [8, 32], strides = [1, 1]} : vector<40x144xf32> to vector<8x32xf32>
    %778 = vector.extract_strided_slice %739 {offsets = [16, 0], sizes = [8, 32], strides = [1, 1]} : vector<40x32xf32> to vector<8x32xf32>
    %779 = vector.extract_strided_slice %738 {offsets = [16, 0], sizes = [8, 32], strides = [1, 1]} : vector<40x32xf32> to vector<8x32xf32>
    %cst_385 = arith.constant 0.899999976 : f32
    %780 = vector.broadcast %cst_385 : f32 to vector<8x32xf32>
    %781 = arith.mulf %780, %778 : vector<8x32xf32>
    %782 = arith.addf %781, %777 : vector<8x32xf32>
    %cst_386 = arith.constant 1.000000e+00 : f32
    %783 = vector.broadcast %cst_386 : f32 to vector<8x32xf32>
    %784 = arith.mulf %779, %783 : vector<8x32xf32>
    %785 = arith.subf %782, %784 : vector<8x32xf32>
    %cst_387 = arith.constant 1.000000e+00 : f32
    %786 = vector.broadcast %cst_387 : f32 to vector<8x32xf32>
    %787 = arith.cmpf ogt, %785, %786 : vector<8x32xf32>
    %788 = arith.extui %787 : vector<8x32xi1> to vector<8x32xi32>
    %789 = arith.sitofp %788 : vector<8x32xi32> to vector<8x32xf32>
    %c2_i32_388 = arith.constant 2 : i32
    %790 = vector.broadcast %c2_i32_388 : i32 to vector<8x32xi32>
    %791 = arith.cmpi sge, %736, %790 : vector<8x32xi32>
    %792 = arith.select %791, %785, %778 : vector<8x32xi1>, vector<8x32xf32>
    %793 = arith.select %791, %789, %779 : vector<8x32xi1>, vector<8x32xf32>
    %c16_389 = arith.constant 16 : index
    %c0_390 = arith.constant 0 : index
    %794 = vector.load %arg9[%c16_389, %c0_390] : memref<40x32xf32, #tpu.memory_space<vmem>>, vector<8x32xf32>
    tpu.vector_store %arg9[%c16_389, %c0_390], %792 {strides = array<i32>} : memref<40x32xf32, #tpu.memory_space<vmem>>, vector<8x32xf32>,
    %c16_391 = arith.constant 16 : index
    %c0_392 = arith.constant 0 : index
    %795 = vector.load %arg8[%c16_391, %c0_392] : memref<40x32xf32, #tpu.memory_space<vmem>>, vector<8x32xf32>
    tpu.vector_store %arg8[%c16_391, %c0_392], %793 {strides = array<i32>} : memref<40x32xf32, #tpu.memory_space<vmem>>, vector<8x32xf32>,
    %796 = vector.extract_strided_slice %742 {offsets = [16, 64], sizes = [8, 32], strides = [1, 1]} : vector<40x144xf32> to vector<8x32xf32>
    %797 = vector.extract_strided_slice %739 {offsets = [24, 0], sizes = [8, 32], strides = [1, 1]} : vector<40x32xf32> to vector<8x32xf32>
    %798 = vector.extract_strided_slice %738 {offsets = [24, 0], sizes = [8, 32], strides = [1, 1]} : vector<40x32xf32> to vector<8x32xf32>
    %cst_393 = arith.constant 0.899999976 : f32
    %799 = vector.broadcast %cst_393 : f32 to vector<8x32xf32>
    %800 = arith.mulf %799, %797 : vector<8x32xf32>
    %801 = arith.addf %800, %796 : vector<8x32xf32>
    %cst_394 = arith.constant 1.000000e+00 : f32
    %802 = vector.broadcast %cst_394 : f32 to vector<8x32xf32>
    %803 = arith.mulf %798, %802 : vector<8x32xf32>
    %804 = arith.subf %801, %803 : vector<8x32xf32>
    %cst_395 = arith.constant 1.000000e+00 : f32
    %805 = vector.broadcast %cst_395 : f32 to vector<8x32xf32>
    %806 = arith.cmpf ogt, %804, %805 : vector<8x32xf32>
    %807 = arith.extui %806 : vector<8x32xi1> to vector<8x32xi32>
    %808 = arith.sitofp %807 : vector<8x32xi32> to vector<8x32xf32>
    %c3_i32_396 = arith.constant 3 : i32
    %809 = vector.broadcast %c3_i32_396 : i32 to vector<8x32xi32>
    %810 = arith.cmpi sge, %736, %809 : vector<8x32xi32>
    %811 = arith.select %810, %804, %797 : vector<8x32xi1>, vector<8x32xf32>
    %812 = arith.select %810, %808, %798 : vector<8x32xi1>, vector<8x32xf32>
    %c24_397 = arith.constant 24 : index
    %c0_398 = arith.constant 0 : index
    %813 = vector.load %arg9[%c24_397, %c0_398] : memref<40x32xf32, #tpu.memory_space<vmem>>, vector<8x32xf32>
    tpu.vector_store %arg9[%c24_397, %c0_398], %811 {strides = array<i32>} : memref<40x32xf32, #tpu.memory_space<vmem>>, vector<8x32xf32>,
    %c24_399 = arith.constant 24 : index
    %c0_400 = arith.constant 0 : index
    %814 = vector.load %arg8[%c24_399, %c0_400] : memref<40x32xf32, #tpu.memory_space<vmem>>, vector<8x32xf32>
    tpu.vector_store %arg8[%c24_399, %c0_400], %812 {strides = array<i32>} : memref<40x32xf32, #tpu.memory_space<vmem>>, vector<8x32xf32>,
    %815 = vector.extract_strided_slice %742 {offsets = [24, 96], sizes = [8, 32], strides = [1, 1]} : vector<40x144xf32> to vector<8x32xf32>
    %816 = vector.extract_strided_slice %739 {offsets = [32, 0], sizes = [8, 32], strides = [1, 1]} : vector<40x32xf32> to vector<8x32xf32>
    %817 = vector.extract_strided_slice %738 {offsets = [32, 0], sizes = [8, 32], strides = [1, 1]} : vector<40x32xf32> to vector<8x32xf32>
    %cst_401 = arith.constant 0.899999976 : f32
    %818 = vector.broadcast %cst_401 : f32 to vector<8x32xf32>
    %819 = arith.mulf %818, %816 : vector<8x32xf32>
    %820 = arith.addf %819, %815 : vector<8x32xf32>
    %cst_402 = arith.constant 1.000000e+00 : f32
    %821 = vector.broadcast %cst_402 : f32 to vector<8x32xf32>
    %822 = arith.mulf %817, %821 : vector<8x32xf32>
    %823 = arith.subf %820, %822 : vector<8x32xf32>
    %cst_403 = arith.constant 1.000000e+00 : f32
    %824 = vector.broadcast %cst_403 : f32 to vector<8x32xf32>
    %825 = arith.cmpf ogt, %823, %824 : vector<8x32xf32>
    %826 = arith.extui %825 : vector<8x32xi1> to vector<8x32xi32>
    %827 = arith.sitofp %826 : vector<8x32xi32> to vector<8x32xf32>
    %c4_i32_404 = arith.constant 4 : i32
    %828 = vector.broadcast %c4_i32_404 : i32 to vector<8x32xi32>
    %829 = arith.cmpi sge, %736, %828 : vector<8x32xi32>
    %830 = arith.select %829, %823, %816 : vector<8x32xi1>, vector<8x32xf32>
    %831 = arith.select %829, %827, %817 : vector<8x32xi1>, vector<8x32xf32>
    %c32_405 = arith.constant 32 : index
    %c0_406 = arith.constant 0 : index
    %832 = vector.load %arg9[%c32_405, %c0_406] : memref<40x32xf32, #tpu.memory_space<vmem>>, vector<8x32xf32>
    tpu.vector_store %arg9[%c32_405, %c0_406], %830 {strides = array<i32>} : memref<40x32xf32, #tpu.memory_space<vmem>>, vector<8x32xf32>,
    %c32_407 = arith.constant 32 : index
    %c0_408 = arith.constant 0 : index
    %833 = vector.load %arg8[%c32_407, %c0_408] : memref<40x32xf32, #tpu.memory_space<vmem>>, vector<8x32xf32>
    tpu.vector_store %arg8[%c32_407, %c0_408], %831 {strides = array<i32>} : memref<40x32xf32, #tpu.memory_space<vmem>>, vector<8x32xf32>,
    %834 = vector.extract_strided_slice %742 {offsets = [32, 128], sizes = [8, 16], strides = [1, 1]} : vector<40x144xf32> to vector<8x16xf32>
    %c0_409 = arith.constant 0 : index
    %c0_410 = arith.constant 0 : index
    %835 = vector.load %arg11[%c0_409, %c0_410] : memref<8x16xf32, #tpu.memory_space<vmem>>, vector<8x16xf32>
    %c0_411 = arith.constant 0 : index
    %c0_412 = arith.constant 0 : index
    %836 = vector.load %arg10[%c0_411, %c0_412] : memref<8x16xf32, #tpu.memory_space<vmem>>, vector<8x16xf32>
    %cst_413 = arith.constant 0.899999976 : f32
    %837 = vector.broadcast %cst_413 : f32 to vector<8x16xf32>
    %838 = arith.mulf %837, %835 : vector<8x16xf32>
    %839 = arith.addf %838, %834 : vector<8x16xf32>
    %cst_414 = arith.constant 1.000000e+00 : f32
    %840 = vector.broadcast %cst_414 : f32 to vector<8x16xf32>
    %841 = arith.mulf %836, %840 : vector<8x16xf32>
    %842 = arith.subf %839, %841 : vector<8x16xf32>
    %cst_415 = arith.constant 1.000000e+00 : f32
    %843 = vector.broadcast %cst_415 : f32 to vector<8x16xf32>
    %844 = arith.cmpf ogt, %842, %843 : vector<8x16xf32>
    %845 = arith.extui %844 : vector<8x16xi1> to vector<8x16xi32>
    %846 = arith.sitofp %845 : vector<8x16xi32> to vector<8x16xf32>
    %c5_i32_416 = arith.constant 5 : i32
    %847 = vector.broadcast %c5_i32_416 : i32 to vector<8x16xi32>
    %848 = arith.cmpi sge, %737, %847 : vector<8x16xi32>
    %849 = arith.select %848, %842, %835 : vector<8x16xi1>, vector<8x16xf32>
    %850 = arith.select %848, %846, %836 : vector<8x16xi1>, vector<8x16xf32>
    %c0_417 = arith.constant 0 : index
    %c0_418 = arith.constant 0 : index
    %851 = vector.load %arg11[%c0_417, %c0_418] : memref<8x16xf32, #tpu.memory_space<vmem>>, vector<8x16xf32>
    tpu.vector_store %arg11[%c0_417, %c0_418], %849 {strides = array<i32>} : memref<8x16xf32, #tpu.memory_space<vmem>>, vector<8x16xf32>,
    %c0_419 = arith.constant 0 : index
    %c0_420 = arith.constant 0 : index
    %852 = vector.load %arg10[%c0_419, %c0_420] : memref<8x16xf32, #tpu.memory_space<vmem>>, vector<8x16xf32>
    tpu.vector_store %arg10[%c0_419, %c0_420], %850 {strides = array<i32>} : memref<8x16xf32, #tpu.memory_space<vmem>>, vector<8x16xf32>,
    %c0_421 = arith.constant 0 : index
    %c96 = arith.constant 96 : index
    %853 = vector.load %arg6[%c0_421, %c96] : memref<8x128xf32, #tpu.memory_space<vmem>>, vector<8x16xf32>
    tpu.vector_store %arg6[%c0_421, %c96], %850 {strides = array<i32>} : memref<8x128xf32, #tpu.memory_space<vmem>>, vector<8x16xf32>,
    %c0_422 = arith.constant 0 : index
    %c96_423 = arith.constant 96 : index
    %854 = vector.load %arg7[%c0_422, %c96_423] : memref<8x128xf32, #tpu.memory_space<vmem>>, vector<8x16xf32>
    tpu.vector_store %arg7[%c0_422, %c96_423], %849 {strides = array<i32>} : memref<8x128xf32, #tpu.memory_space<vmem>>, vector<8x16xf32>,
    %c7_i32 = arith.constant 7 : i32
    %855 = arith.addi %14, %c7_i32 : i32
    %856 = vector.broadcast %855 : i32 to vector<8x32xi32>
    %857 = vector.broadcast %855 : i32 to vector<8x16xi32>
    %c0_424 = arith.constant 0 : index
    %c0_425 = arith.constant 0 : index
    %858 = vector.load %arg8[%c0_424, %c0_425] : memref<40x32xf32, #tpu.memory_space<vmem>>, vector<40x32xf32>
    %c0_426 = arith.constant 0 : index
    %c0_427 = arith.constant 0 : index
    %859 = vector.load %arg9[%c0_426, %c0_427] : memref<40x32xf32, #tpu.memory_space<vmem>>, vector<40x32xf32>
    %860 = arith.truncf %858 : vector<40x32xf32> to vector<40x32xbf16>
    %cst_428 = arith.constant dense<0.000000e+00> : vector<40x144xf32>
    %861 = tpu.matmul %860, %3, %cst_428 {dimension_numbers = #tpu.dot_dimension_numbers<[1], [0], [0], [1], [0, 0, 1, 1], [], []>} : vector<40x32xbf16>, vector<32x144xbf16>, vector<40x144xf32> -> vector<40x144xf32>
    %862 = arith.addf %861, %6 : vector<40x144xf32>
    %863 = vector.extract_strided_slice %859 {offsets = [0, 0], sizes = [8, 32], strides = [1, 1]} : vector<40x32xf32> to vector<8x32xf32>
    %864 = vector.extract_strided_slice %858 {offsets = [0, 0], sizes = [8, 32], strides = [1, 1]} : vector<40x32xf32> to vector<8x32xf32>
    %cst_429 = arith.constant 0.899999976 : f32
    %865 = vector.broadcast %cst_429 : f32 to vector<8x32xf32>
    %866 = arith.mulf %865, %863 : vector<8x32xf32>
    %867 = vector.extract_strided_slice %13 {offsets = [56, 0], sizes = [8, 32], strides = [1, 1]} : vector<64x32xf32> to vector<8x32xf32>
    %868 = arith.addf %866, %867 : vector<8x32xf32>
    %cst_430 = arith.constant 5.000000e-01 : f32
    %869 = vector.broadcast %cst_430 : f32 to vector<8x32xf32>
    %870 = arith.mulf %864, %869 : vector<8x32xf32>
    %871 = arith.subf %868, %870 : vector<8x32xf32>
    %cst_431 = arith.constant 5.000000e-01 : f32
    %872 = vector.broadcast %cst_431 : f32 to vector<8x32xf32>
    %873 = arith.cmpf ogt, %871, %872 : vector<8x32xf32>
    %874 = arith.extui %873 : vector<8x32xi1> to vector<8x32xi32>
    %875 = arith.sitofp %874 : vector<8x32xi32> to vector<8x32xf32>
    %c0_432 = arith.constant 0 : index
    %c0_433 = arith.constant 0 : index
    %876 = vector.load %arg9[%c0_432, %c0_433] : memref<40x32xf32, #tpu.memory_space<vmem>>, vector<8x32xf32>
    tpu.vector_store %arg9[%c0_432, %c0_433], %871 {strides = array<i32>} : memref<40x32xf32, #tpu.memory_space<vmem>>, vector<8x32xf32>,
    %c0_434 = arith.constant 0 : index
    %c0_435 = arith.constant 0 : index
    %877 = vector.load %arg8[%c0_434, %c0_435] : memref<40x32xf32, #tpu.memory_space<vmem>>, vector<8x32xf32>
    tpu.vector_store %arg8[%c0_434, %c0_435], %875 {strides = array<i32>} : memref<40x32xf32, #tpu.memory_space<vmem>>, vector<8x32xf32>,
    %878 = vector.extract_strided_slice %862 {offsets = [0, 0], sizes = [8, 32], strides = [1, 1]} : vector<40x144xf32> to vector<8x32xf32>
    %879 = vector.extract_strided_slice %859 {offsets = [8, 0], sizes = [8, 32], strides = [1, 1]} : vector<40x32xf32> to vector<8x32xf32>
    %880 = vector.extract_strided_slice %858 {offsets = [8, 0], sizes = [8, 32], strides = [1, 1]} : vector<40x32xf32> to vector<8x32xf32>
    %cst_436 = arith.constant 0.899999976 : f32
    %881 = vector.broadcast %cst_436 : f32 to vector<8x32xf32>
    %882 = arith.mulf %881, %879 : vector<8x32xf32>
    %883 = arith.addf %882, %878 : vector<8x32xf32>
    %cst_437 = arith.constant 1.000000e+00 : f32
    %884 = vector.broadcast %cst_437 : f32 to vector<8x32xf32>
    %885 = arith.mulf %880, %884 : vector<8x32xf32>
    %886 = arith.subf %883, %885 : vector<8x32xf32>
    %cst_438 = arith.constant 1.000000e+00 : f32
    %887 = vector.broadcast %cst_438 : f32 to vector<8x32xf32>
    %888 = arith.cmpf ogt, %886, %887 : vector<8x32xf32>
    %889 = arith.extui %888 : vector<8x32xi1> to vector<8x32xi32>
    %890 = arith.sitofp %889 : vector<8x32xi32> to vector<8x32xf32>
    %c1_i32_439 = arith.constant 1 : i32
    %891 = vector.broadcast %c1_i32_439 : i32 to vector<8x32xi32>
    %892 = arith.cmpi sge, %856, %891 : vector<8x32xi32>
    %893 = arith.select %892, %886, %879 : vector<8x32xi1>, vector<8x32xf32>
    %894 = arith.select %892, %890, %880 : vector<8x32xi1>, vector<8x32xf32>
    %c8_440 = arith.constant 8 : index
    %c0_441 = arith.constant 0 : index
    %895 = vector.load %arg9[%c8_440, %c0_441] : memref<40x32xf32, #tpu.memory_space<vmem>>, vector<8x32xf32>
    tpu.vector_store %arg9[%c8_440, %c0_441], %893 {strides = array<i32>} : memref<40x32xf32, #tpu.memory_space<vmem>>, vector<8x32xf32>,
    %c8_442 = arith.constant 8 : index
    %c0_443 = arith.constant 0 : index
    %896 = vector.load %arg8[%c8_442, %c0_443] : memref<40x32xf32, #tpu.memory_space<vmem>>, vector<8x32xf32>
    tpu.vector_store %arg8[%c8_442, %c0_443], %894 {strides = array<i32>} : memref<40x32xf32, #tpu.memory_space<vmem>>, vector<8x32xf32>,
    %897 = vector.extract_strided_slice %862 {offsets = [8, 32], sizes = [8, 32], strides = [1, 1]} : vector<40x144xf32> to vector<8x32xf32>
    %898 = vector.extract_strided_slice %859 {offsets = [16, 0], sizes = [8, 32], strides = [1, 1]} : vector<40x32xf32> to vector<8x32xf32>
    %899 = vector.extract_strided_slice %858 {offsets = [16, 0], sizes = [8, 32], strides = [1, 1]} : vector<40x32xf32> to vector<8x32xf32>
    %cst_444 = arith.constant 0.899999976 : f32
    %900 = vector.broadcast %cst_444 : f32 to vector<8x32xf32>
    %901 = arith.mulf %900, %898 : vector<8x32xf32>
    %902 = arith.addf %901, %897 : vector<8x32xf32>
    %cst_445 = arith.constant 1.000000e+00 : f32
    %903 = vector.broadcast %cst_445 : f32 to vector<8x32xf32>
    %904 = arith.mulf %899, %903 : vector<8x32xf32>
    %905 = arith.subf %902, %904 : vector<8x32xf32>
    %cst_446 = arith.constant 1.000000e+00 : f32
    %906 = vector.broadcast %cst_446 : f32 to vector<8x32xf32>
    %907 = arith.cmpf ogt, %905, %906 : vector<8x32xf32>
    %908 = arith.extui %907 : vector<8x32xi1> to vector<8x32xi32>
    %909 = arith.sitofp %908 : vector<8x32xi32> to vector<8x32xf32>
    %c2_i32_447 = arith.constant 2 : i32
    %910 = vector.broadcast %c2_i32_447 : i32 to vector<8x32xi32>
    %911 = arith.cmpi sge, %856, %910 : vector<8x32xi32>
    %912 = arith.select %911, %905, %898 : vector<8x32xi1>, vector<8x32xf32>
    %913 = arith.select %911, %909, %899 : vector<8x32xi1>, vector<8x32xf32>
    %c16_448 = arith.constant 16 : index
    %c0_449 = arith.constant 0 : index
    %914 = vector.load %arg9[%c16_448, %c0_449] : memref<40x32xf32, #tpu.memory_space<vmem>>, vector<8x32xf32>
    tpu.vector_store %arg9[%c16_448, %c0_449], %912 {strides = array<i32>} : memref<40x32xf32, #tpu.memory_space<vmem>>, vector<8x32xf32>,
    %c16_450 = arith.constant 16 : index
    %c0_451 = arith.constant 0 : index
    %915 = vector.load %arg8[%c16_450, %c0_451] : memref<40x32xf32, #tpu.memory_space<vmem>>, vector<8x32xf32>
    tpu.vector_store %arg8[%c16_450, %c0_451], %913 {strides = array<i32>} : memref<40x32xf32, #tpu.memory_space<vmem>>, vector<8x32xf32>,
    %916 = vector.extract_strided_slice %862 {offsets = [16, 64], sizes = [8, 32], strides = [1, 1]} : vector<40x144xf32> to vector<8x32xf32>
    %917 = vector.extract_strided_slice %859 {offsets = [24, 0], sizes = [8, 32], strides = [1, 1]} : vector<40x32xf32> to vector<8x32xf32>
    %918 = vector.extract_strided_slice %858 {offsets = [24, 0], sizes = [8, 32], strides = [1, 1]} : vector<40x32xf32> to vector<8x32xf32>
    %cst_452 = arith.constant 0.899999976 : f32
    %919 = vector.broadcast %cst_452 : f32 to vector<8x32xf32>
    %920 = arith.mulf %919, %917 : vector<8x32xf32>
    %921 = arith.addf %920, %916 : vector<8x32xf32>
    %cst_453 = arith.constant 1.000000e+00 : f32
    %922 = vector.broadcast %cst_453 : f32 to vector<8x32xf32>
    %923 = arith.mulf %918, %922 : vector<8x32xf32>
    %924 = arith.subf %921, %923 : vector<8x32xf32>
    %cst_454 = arith.constant 1.000000e+00 : f32
    %925 = vector.broadcast %cst_454 : f32 to vector<8x32xf32>
    %926 = arith.cmpf ogt, %924, %925 : vector<8x32xf32>
    %927 = arith.extui %926 : vector<8x32xi1> to vector<8x32xi32>
    %928 = arith.sitofp %927 : vector<8x32xi32> to vector<8x32xf32>
    %c3_i32_455 = arith.constant 3 : i32
    %929 = vector.broadcast %c3_i32_455 : i32 to vector<8x32xi32>
    %930 = arith.cmpi sge, %856, %929 : vector<8x32xi32>
    %931 = arith.select %930, %924, %917 : vector<8x32xi1>, vector<8x32xf32>
    %932 = arith.select %930, %928, %918 : vector<8x32xi1>, vector<8x32xf32>
    %c24_456 = arith.constant 24 : index
    %c0_457 = arith.constant 0 : index
    %933 = vector.load %arg9[%c24_456, %c0_457] : memref<40x32xf32, #tpu.memory_space<vmem>>, vector<8x32xf32>
    tpu.vector_store %arg9[%c24_456, %c0_457], %931 {strides = array<i32>} : memref<40x32xf32, #tpu.memory_space<vmem>>, vector<8x32xf32>,
    %c24_458 = arith.constant 24 : index
    %c0_459 = arith.constant 0 : index
    %934 = vector.load %arg8[%c24_458, %c0_459] : memref<40x32xf32, #tpu.memory_space<vmem>>, vector<8x32xf32>
    tpu.vector_store %arg8[%c24_458, %c0_459], %932 {strides = array<i32>} : memref<40x32xf32, #tpu.memory_space<vmem>>, vector<8x32xf32>,
    %935 = vector.extract_strided_slice %862 {offsets = [24, 96], sizes = [8, 32], strides = [1, 1]} : vector<40x144xf32> to vector<8x32xf32>
    %936 = vector.extract_strided_slice %859 {offsets = [32, 0], sizes = [8, 32], strides = [1, 1]} : vector<40x32xf32> to vector<8x32xf32>
    %937 = vector.extract_strided_slice %858 {offsets = [32, 0], sizes = [8, 32], strides = [1, 1]} : vector<40x32xf32> to vector<8x32xf32>
    %cst_460 = arith.constant 0.899999976 : f32
    %938 = vector.broadcast %cst_460 : f32 to vector<8x32xf32>
    %939 = arith.mulf %938, %936 : vector<8x32xf32>
    %940 = arith.addf %939, %935 : vector<8x32xf32>
    %cst_461 = arith.constant 1.000000e+00 : f32
    %941 = vector.broadcast %cst_461 : f32 to vector<8x32xf32>
    %942 = arith.mulf %937, %941 : vector<8x32xf32>
    %943 = arith.subf %940, %942 : vector<8x32xf32>
    %cst_462 = arith.constant 1.000000e+00 : f32
    %944 = vector.broadcast %cst_462 : f32 to vector<8x32xf32>
    %945 = arith.cmpf ogt, %943, %944 : vector<8x32xf32>
    %946 = arith.extui %945 : vector<8x32xi1> to vector<8x32xi32>
    %947 = arith.sitofp %946 : vector<8x32xi32> to vector<8x32xf32>
    %c4_i32_463 = arith.constant 4 : i32
    %948 = vector.broadcast %c4_i32_463 : i32 to vector<8x32xi32>
    %949 = arith.cmpi sge, %856, %948 : vector<8x32xi32>
    %950 = arith.select %949, %943, %936 : vector<8x32xi1>, vector<8x32xf32>
    %951 = arith.select %949, %947, %937 : vector<8x32xi1>, vector<8x32xf32>
    %c32_464 = arith.constant 32 : index
    %c0_465 = arith.constant 0 : index
    %952 = vector.load %arg9[%c32_464, %c0_465] : memref<40x32xf32, #tpu.memory_space<vmem>>, vector<8x32xf32>
    tpu.vector_store %arg9[%c32_464, %c0_465], %950 {strides = array<i32>} : memref<40x32xf32, #tpu.memory_space<vmem>>, vector<8x32xf32>,
    %c32_466 = arith.constant 32 : index
    %c0_467 = arith.constant 0 : index
    %953 = vector.load %arg8[%c32_466, %c0_467] : memref<40x32xf32, #tpu.memory_space<vmem>>, vector<8x32xf32>
    tpu.vector_store %arg8[%c32_466, %c0_467], %951 {strides = array<i32>} : memref<40x32xf32, #tpu.memory_space<vmem>>, vector<8x32xf32>,
    %954 = vector.extract_strided_slice %862 {offsets = [32, 128], sizes = [8, 16], strides = [1, 1]} : vector<40x144xf32> to vector<8x16xf32>
    %c0_468 = arith.constant 0 : index
    %c0_469 = arith.constant 0 : index
    %955 = vector.load %arg11[%c0_468, %c0_469] : memref<8x16xf32, #tpu.memory_space<vmem>>, vector<8x16xf32>
    %c0_470 = arith.constant 0 : index
    %c0_471 = arith.constant 0 : index
    %956 = vector.load %arg10[%c0_470, %c0_471] : memref<8x16xf32, #tpu.memory_space<vmem>>, vector<8x16xf32>
    %cst_472 = arith.constant 0.899999976 : f32
    %957 = vector.broadcast %cst_472 : f32 to vector<8x16xf32>
    %958 = arith.mulf %957, %955 : vector<8x16xf32>
    %959 = arith.addf %958, %954 : vector<8x16xf32>
    %cst_473 = arith.constant 1.000000e+00 : f32
    %960 = vector.broadcast %cst_473 : f32 to vector<8x16xf32>
    %961 = arith.mulf %956, %960 : vector<8x16xf32>
    %962 = arith.subf %959, %961 : vector<8x16xf32>
    %cst_474 = arith.constant 1.000000e+00 : f32
    %963 = vector.broadcast %cst_474 : f32 to vector<8x16xf32>
    %964 = arith.cmpf ogt, %962, %963 : vector<8x16xf32>
    %965 = arith.extui %964 : vector<8x16xi1> to vector<8x16xi32>
    %966 = arith.sitofp %965 : vector<8x16xi32> to vector<8x16xf32>
    %c5_i32_475 = arith.constant 5 : i32
    %967 = vector.broadcast %c5_i32_475 : i32 to vector<8x16xi32>
    %968 = arith.cmpi sge, %857, %967 : vector<8x16xi32>
    %969 = arith.select %968, %962, %955 : vector<8x16xi1>, vector<8x16xf32>
    %970 = arith.select %968, %966, %956 : vector<8x16xi1>, vector<8x16xf32>
    %c0_476 = arith.constant 0 : index
    %c0_477 = arith.constant 0 : index
    %971 = vector.load %arg11[%c0_476, %c0_477] : memref<8x16xf32, #tpu.memory_space<vmem>>, vector<8x16xf32>
    tpu.vector_store %arg11[%c0_476, %c0_477], %969 {strides = array<i32>} : memref<8x16xf32, #tpu.memory_space<vmem>>, vector<8x16xf32>,
    %c0_478 = arith.constant 0 : index
    %c0_479 = arith.constant 0 : index
    %972 = vector.load %arg10[%c0_478, %c0_479] : memref<8x16xf32, #tpu.memory_space<vmem>>, vector<8x16xf32>
    tpu.vector_store %arg10[%c0_478, %c0_479], %970 {strides = array<i32>} : memref<8x16xf32, #tpu.memory_space<vmem>>, vector<8x16xf32>,
    %c0_480 = arith.constant 0 : index
    %c112 = arith.constant 112 : index
    %973 = vector.load %arg6[%c0_480, %c112] : memref<8x128xf32, #tpu.memory_space<vmem>>, vector<8x16xf32>
    tpu.vector_store %arg6[%c0_480, %c112], %970 {strides = array<i32>} : memref<8x128xf32, #tpu.memory_space<vmem>>, vector<8x16xf32>,
    %c0_481 = arith.constant 0 : index
    %c112_482 = arith.constant 112 : index
    %974 = vector.load %arg7[%c0_481, %c112_482] : memref<8x128xf32, #tpu.memory_space<vmem>>, vector<8x16xf32>
    tpu.vector_store %arg7[%c0_481, %c112_482], %969 {strides = array<i32>} : memref<8x128xf32, #tpu.memory_space<vmem>>, vector<8x16xf32>,
    return
  }
  func.func @transform_0(%arg0: i32) -> (i32, i32, i32) {
    %c0_i32 = arith.constant 0 : i32
    %c0_i32_0 = arith.constant 0 : i32
    %c0_i32_1 = arith.constant 0 : i32
    return %arg0, %c0_i32, %c0_i32_0 : i32, i32, i32
  }
  func.func @transform_1(%arg0: i32) -> (i32, i32) {
    %c0_i32 = arith.constant 0 : i32
    %c0_i32_0 = arith.constant 0 : i32
    %c0_i32_1 = arith.constant 0 : i32
    return %c0_i32, %c0_i32_0 : i32, i32
  }
  func.func @transform_2(%arg0: i32) -> (i32, i32) {
    %c0_i32 = arith.constant 0 : i32
    %c0_i32_0 = arith.constant 0 : i32
    %c0_i32_1 = arith.constant 0 : i32
    return %c0_i32, %c0_i32_0 : i32, i32
  }
  func.func @transform_3(%arg0: i32) -> (i32, i32) {
    %c0_i32 = arith.constant 0 : i32
    %c0_i32_0 = arith.constant 0 : i32
    %c0_i32_1 = arith.constant 0 : i32
    return %c0_i32, %c0_i32_0 : i32, i32
  }
  func.func @transform_4(%arg0: i32) -> (i32, i32) {
    %c0_i32 = arith.constant 0 : i32
    %c0_i32_0 = arith.constant 0 : i32
    %c0_i32_1 = arith.constant 0 : i32
    return %c0_i32, %c0_i32_0 : i32, i32
  }
  func.func @transform_5(%arg0: i32) -> (i32, i32) {
    %c0_i32 = arith.constant 0 : i32
    %c0_i32_0 = arith.constant 0 : i32
    return %c0_i32, %arg0 : i32, i32
  }
  func.func @transform_6(%arg0: i32) -> (i32, i32) {
    %c0_i32 = arith.constant 0 : i32
    %c0_i32_0 = arith.constant 0 : i32
    return %c0_i32, %arg0 : i32, i32
  }
}

</mosaic_0001>

<bundles_post_ra>
// kernel: tpu_custom_call.1
= control target key start
LH: loop header
LB: loop body
LE: loop exit
PB: predicated region body
PF: predicated region fallthrough
CT: control target
= control target key end

     0   :  { %12 = vsyncpa [#allocation7], 0  ;;  %s2882_s0 = inlined_call_operand.vmem [shape: bf16[2,64,32], index: 0, kind: input, shape index: {}]   ;;  %s2883_s1 = inlined_call_operand.vmem [shape: bf16[32,32], index: 1, kind: input, shape index: {}]   ;;  %s2884_s2 = inlined_call_operand.vmem [shape: f32[1,32], index: 2, kind: input, shape index: {}]   ;;  %s2885_s3 = inlined_call_operand.vmem [shape: bf16[32,144], index: 3, kind: input, shape index: {}]   ;;  %s2886_s4 = inlined_call_operand.vmem [shape: f32[1,144], index: 4, kind: input, shape index: {}]   ;;  %s2887_s5 = inlined_call_operand.hbm [shape: f32[8,256], index: 5, kind: output, shape index: {0}]   ;;  %s2888_s6 = inlined_call_operand.hbm [shape: f32[8,256], index: 6, kind: output, shape index: {1}]  }
   0x1   :  { %14 = vsyncpa [#allocation7 + $0x1], 0 }
   0x2   :  { %15 = vsyncpa [#allocation9], 0 }
   0x3   :  { %17 = vsyncpa [#allocation9 + $0x1], 0  ;;  %s2116_s21 = smov 0   ;;  %s2118_s22 = smov 0  }
   0x4   :  { %s2120_s23 = smov 0   ;;  %s2122_s24 = smov 0  }
   0x5 LB: > { %s2137_s25 = sadd.s32 4294967295, %s2070_s24   ;;  %s1751_s26 = sadd.s32 4294967294, %s2070_s24   ;;  %s2070_s24 = sphi %s2122_s24, %s2894_s24   ;;  %s2066_s23 = sphi %s2120_s23, %s2893_s23   ;;  %s2062_s22 = sphi %s2118_s22, %s2892_s22   ;;  %s2058_s21 = sphi %s2116_s21, %s2891_s21  }
   0x6   : > { %s2141_s27 = sadd.s32 1, %s2070_s24   ;;  %s140_s28 = sadd.s32 1, %s2066_s23 }
   0x7   : > { %s137_s29 = ssub.s32 %s2070_s24, %s2141_s27  ;;  %p150_p0 = scmp.ne.s32.totalorder %s2066_s23, %s2062_s22 }
   0x8   : > { %p138_p1 = scmp.eq.s32.totalorder %s137_s29, 0  ;;  %p151_p2 = scmp.eq.s32.totalorder %s2137_s25, 1 }
   0x9   : > { %p156_p3 = scmp.ne.s32.totalorder %s2062_s22, %s2058_s21  ;;  %p157_p4 = scmp.eq.s32.totalorder %s1751_s26, 1 }
   0xa   : > { %s2152_s30 = scalar_select %p138_p1, %s2066_s23, %s140_s28  }
   0xb   : > { %p2154_p5 = por %p151_p2, %p150_p0  ;;  %p2158_p6 = por %p157_p4, %p156_p3 }
   0xc   : > { %p1754_p7 = scmp.ge.s32.totalorder %s2070_s24, 1  ;;  %p221_p8 = scmp.lt.s32.totalorder %s2070_s24, 3 }
   0xe   : > { %p222_p9 = pnand %p1754_p7, %p221_p8 }
   0xf   : > { %s2165_s9 = sand.u32 (!%p222_p9), 1, %s2062_s22   ;;  %p256_p10 = scmp.lt.s32.totalorder (!%p222_p9), %s2137_s25, 1 }
  0x10   : > { %225 = sbr.rel (%p222_p9) target bundleno = 2166 (0x876), region = 40  ;;  %s1755_s10 = sshll.u32 (!%p222_p9), %s2165_s9, 3 }
  0x11   : > { %s2175_s16 = scalar_lea.vmem (!%p222_p9), [#allocation6], %s1755_s10  ;;  %s2177_s17 = scalar_lea.vmem (!%p222_p9), [#allocation8], %s1755_s10 }
  0x12   : > { %p1759_p11 = scmp.ne.s32.totalorder (!%p222_p9), %s2137_s25, 0 }
  0x15   : > { %s257_s11 = scalar_select %p256_p10, %s2137_s25, 1 }
  0x16   : > { %265 = sbr.rel (%p1759_p11) target bundleno = 40 (0x28), region = 44 }
  0x17   : > { %s1907_s12 = sshll.u32 %s257_s11, 5 }
  0x18   : > { %s2173_s15 = scalar_lea.vmem %s2882_s0, %s1907_s12 }
  0x1b   : > { %vm266_vm0 = vcmask 261120   ;;  %v2072_v0 = vmov 0.0   ;;  %vm277_vm1 = vcmask 130048  }
  0x1c   : > { %267 = vst.msk [vmem:[#allocation2] sm:$0xff] %vm266_vm0, %v2072_v0 }
  0x1d   : > { %268 = vst.msk [vmem:[#allocation2 + $0x8] sm:$0xff] %vm266_vm0, %v2072_v0 }
  0x1e   : > { %269 = vst.msk [vmem:[#allocation2 + $0x10] sm:$0xff] %vm266_vm0, %v2072_v0 }
  0x1f   : > { %270 = vst.msk [vmem:[#allocation2 + $0x18] sm:$0xff] %vm266_vm0, %v2072_v0 }
  0x20   : > { %271 = vst.msk [vmem:[#allocation2 + $0x20] sm:$0xff] %vm266_vm0, %v2072_v0 }
  0x21   : > { %272 = vst.msk [vmem:[#allocation3] sm:$0xff] %vm266_vm0, %v2072_v0 }
  0x22   : > { %273 = vst.msk [vmem:[#allocation3 + $0x8] sm:$0xff] %vm266_vm0, %v2072_v0 }
  0x23   : > { %274 = vst.msk [vmem:[#allocation3 + $0x10] sm:$0xff] %vm266_vm0, %v2072_v0 }
  0x24   : > { %275 = vst.msk [vmem:[#allocation3 + $0x18] sm:$0xff] %vm266_vm0, %v2072_v0 }
  0x25   : > { %276 = vst.msk [vmem:[#allocation3 + $0x20] sm:$0xff] %vm266_vm0, %v2072_v0 }
  0x26   : > { %278 = vst.msk [vmem:[#allocation4] sm:$0xff] %vm277_vm1, %v2072_v0 }
  0x27   : > { %279 = vst.msk [vmem:[#allocation5] sm:$0xff] %vm277_vm1, %v2072_v0 }
  0x28 PF: > { %v1799_v1 = vld [vmem:[%s2885_s3 + $0x10] sm:$0xf]  ;;  %v1911_v2 = vld [vmem:[%s2885_s3 + $0x14] sm:$0xf0]  ;;  %v1917_v3 = vld [vmem:[%s2883_s1 + $0x8] sm:$0xff]  ;;  %vm338_vm2 = vcmask 261120  }
  0x29   : > { %v2189_v4 = vor.u32 %v1911_v2, %v1799_v1  ;;  %v1791_v5 = vld [vmem:[%s2885_s3] sm:$0xf]  ;;  %v1909_v6 = vld [vmem:[%s2885_s3 + $0x4] sm:$0xf0]  ;;  %357 = vmatpush.bf16.msra.mxu0 %v1917_v3  ;;  %v2206_v11 = vld [vmem:[#allocation2 + $0x10] sm:$0xff]  ;;  %s2282_s20 = sshll.u32 %s2137_s25, 3 }
  0x2a   : > { %v1916_v7 = vld [vmem:[%s2883_s1] sm:$0xff]  ;;  %v2202_v9 = vor.u32 %v1909_v6, %v1791_v5  ;;  %v2204_v10 = vld [vmem:[#allocation2 + $0x8] sm:$0xff]  ;;  %v2208_v12 = vld [vmem:[#allocation2 + $0x18] sm:$0xff]  ;;  %v2286_v37 = vstv %s2282_s20  ;;  %v2073_v44 = vmov 0.0   ;;  %s2074_s25 = smov 96   ;;  %s2076_s26 = smov 32  }
  0x2b   : > { %v382_v8 = vld [vmem:[#allocation2] sm:$0xff]  ;;  %430 = vmatpush.bf16.msra.mxu1 %v2189_v4  ;;  %1918 = vmatpush.bf16.msra.mxu2 %v2189_v4  ;;  %v393_v15 = vpack.c.bf16 %v2208_v12, %v2206_v11  ;;  %v1913_v18 = vld [vmem:[%s2173_s15 + $0x8] sm:$0xff]  ;;  %v1910_v19 = vld [vmem:[%s2885_s3 + $0x14] sm:$0xf]  ;;  %vm480_vm3 = vcmp.ge.s32.totalorder %v2286_v37, 1  ;;  %vm495_vm9 = vcmp.ge.s32.totalorder %v2286_v37, 2 }
  0x2c   : > { %1919 = vmatpush.bf16.msra.mxu3 %v2189_v4  ;;  %v1912_v13 = vld [vmem:[%s2173_s15] sm:$0xff]  ;;  %v392_v14 = vpack.c.bf16 %v2204_v10, %v382_v8  ;;  %v1801_v20 = vld [vmem:[%s2885_s3 + $0x18] sm:$0xf0]  ;;  %v1793_v23 = vld [vmem:[%s2885_s3 + $0x8] sm:$0xf0]  ;;  %v467_v36 = vmul.f32 0.5, %v382_v8 }
  0x2d   : > { %358 = vmatpush.bf16.msra.mxu0 %v1916_v7  ;;  %v2227_v16 = vld [vmem:[#allocation2 + $0x20] sm:$0xff]  ;;  %v2243_v21 = vor.u32 %v1910_v19, %v1801_v20  ;;  %v387_v26 = vld [vmem:[#allocation3] sm:$0xff]  ;;  %v1914_v27 = vld [vmem:[%s2173_s15 + $0x10] sm:$0xff]  ;;  %vm510_vm12 = vcmp.ge.s32.totalorder %v2286_v37, 3  ;;  %vm525_vm14 = vcmp.ge.s32.totalorder %v2286_v37, 4  ;;  %s546_s28 = sadd.s32 1, %s2282_s20 }
  0x2e   : > { %v2231_v17 = vpack.c.bf16 %v2227_v16, %v2227_v16  ;;  %v1908_v22 = vld [vmem:[%s2885_s3 + $0x4] sm:$0xf]  ;;  %v2268_v25 = vld [vmem:[%s2886_s4] sm:$0x3]  ;;  %v388_v28 = vld [vmem:[#allocation3 + $0x8] sm:$0xff]  ;;  %s700_s29 = sadd.s32 2, %s2282_s20 }
  0x2f   : > { %431 = vmatpush.bf16.msra.mxu1 %v2202_v9  ;;  %1920 = vmatpush.bf16.msra.mxu2 %v2202_v9  ;;  %v2254_v24 = vor.u32 %v1908_v22, %v1793_v23  ;;  %v2275_v29 = vld [vmem:[%s2884_s2] ss:$0 sm:$0xff]  ;;  %v2278_v30 = vperm.slane %v2268_v25, 0  ;;  %v465_v31 = vmul.f32 0.9, %v387_v26  ;;  %v1915_v50 = vld [vmem:[%s2173_s15 + $0x18] sm:$0xff] }
  0x30   : > { %1921 = vmatpush.bf16.msra.mxu3 %v2202_v9  ;;  %1784 = vmatmul.msk.bf16.vlgmr.msra.gmra.mxu0 %vm338_vm2, %v1912_v13  ;;  %v474_v32 = vmul.f32 0.9, %v388_v28  ;;  %s2075_s15 = smov 64   ;;  %s854_s10 = sadd.s32 3, %s2282_s20 }
  0x31   : > { %884 = vmatpush.bf16.msrb.mxu0 %v2189_v4  ;;  %s1008_s11 = sadd.s32 4, %s2282_s20  ;;  %s1162_s12 = sadd.s32 5, %s2282_s20 }
  0x32   : > { %1805 = vmatmul.msk.bf16.vlgmr.msra.gmra.mxu1 %vm338_vm2, %v392_v14  ;;  %1806 = vmatmul.msk.bf16.vlgmr.msra.gmra.mxu2 %vm338_vm2, %v393_v15  ;;  %s1316_s13 = sadd.s32 6, %s2282_s20  ;;  %s2077_s14 = smov 16  }
  0x33   : > { %1807 = vmatmul.msk.bf16.vlgmr.msra.gmra.mxu3 %vm338_vm2, %v2231_v17  ;;  %598 = vmatpush.bf16.msrb.mxu1 %v2243_v21  ;;  %s1470_s18 = sadd.s32 7, %s2282_s20  ;;  %s2078_s19 = smov 80  }
  0x34   : > { %576 = vmatpush.bf16.msrb.mxu3 %v2189_v4  ;;  %452 = vmatpush.bf16.msrb.mxu2 %v2243_v21 }
  0x35   : > { %885 = vmatpush.bf16.msrb.mxu0 %v2202_v9 }
  0x37   : > { %599 = vmatpush.bf16.msrb.mxu1 %v2254_v24 }
  0x38   : > { %577 = vmatpush.bf16.msrb.mxu3 %v2202_v9  ;;  %453 = vmatpush.bf16.msrb.mxu2 %v2254_v24 }
  0x39   : > { %1192 = vmatpush.bf16.msra.mxu0 %v2189_v4 }
  0x3b   : > { %906 = vmatpush.bf16.msra.mxu1 %v2243_v21 }
  0x3c   : > { %752 = vmatpush.bf16.msra.mxu3 %v2243_v21  ;;  %730 = vmatpush.bf16.msra.mxu2 %v2189_v4 }
  0x3d   : > { %1193 = vmatpush.bf16.msra.mxu0 %v2202_v9 }
  0x3f   : > { %907 = vmatpush.bf16.msra.mxu1 %v2254_v24 }
  0x40   : > { %1785 = vmatmul.msk.bf16.gmra.mxu0 %vm338_vm2, %v1913_v18  ;;  %753 = vmatpush.bf16.msra.mxu3 %v2254_v24 }
  0x41   : > { %731 = vmatpush.bf16.msra.mxu2 %v2202_v9 }
  0x42   : > { %1808 = vmatmul.msk.bf16.vlgmr.msrb.gmra.mxu2 %vm338_vm2, %v392_v14 }
  0x45   : > { %1038 = vmatpush.bf16.msrb.mxu2 %v2189_v4 }
  0x49   : > { %1039 = vmatpush.bf16.msrb.mxu2 %v2202_v9 }
  0x50   : > { %1786 = vmatmul.msk.bf16.gmra.mxu0 %vm338_vm2, %v1914_v27 }
  0x52   : > { %1809 = vmatmul.msk.bf16.gmra.mxu2 %vm338_vm2, %v393_v15 }
  0x60   : > { %1787 = vmatmul.msk.bf16.gmra.mxu0 %vm338_vm2, %v1915_v50 }
  0x62   : > { %1810 = vmatmul.msk.bf16.gmra.mxu2 %vm338_vm2, %v2231_v17 }
  0xad   : > { %v360_v33 = vpop.f32.mrf.mxu0 }
  0xae   : > { %v361_v35 = vadd.f32 %v2275_v29, %v360_v33 }
  0xaf   : > { %v433_v34 = vpop.f32.mrf.mxu1 }
  0xb0   : > { %v434_v38 = vadd.f32 %v433_v34, %v2278_v30  ;;  %v466_v39 = vadd.f32 %v465_v31, %v361_v35  ;;  %v389_v31 = vld [vmem:[#allocation3 + $0x10] sm:$0xff] }
  0xb1   : > { %v485_v34 = vmul.f32 0.9, %v389_v31 }
  0xb2   : > { %v475_v40 = vadd.f32 %v474_v32, %v434_v38  ;;  %v468_v41 = vsub.f32 %v466_v39, %v467_v36 }
  0xb4   : > { %v476_v42 = vsub.f32 %v475_v40, %v2204_v10  ;;  %vm469_vm4 = vcmp.gt.f32.partialorder %v468_v41, 0.5  ;;  %472 = vst.msk [vmem:[#allocation3] sm:$0xff] %vm338_vm2, %v468_v41  ;;  %v390_v40 = vld [vmem:[#allocation3 + $0x18] sm:$0xff] }
  0xb5   : > { %v1811_v45 = vsel %vm469_vm4, 1.0, %v2073_v44  ;;  %v362_v51 = vpop.f32.mrf.mxu0  ;;  %v438_v52 = vpop.f32.mrf.mxu2  ;;  %v500_v50 = vmul.f32 0.9, %v390_v40 }
  0xb6   : > { %vm477_vm5 = vcmp.gt.f32.partialorder %v476_v42, 1.0  ;;  %v481_v43 = vsel %vm480_vm3, %v476_v42, %v388_v28  ;;  %473 = vst.msk [vmem:[#allocation2] sm:$0xff] %vm338_vm2, %v1811_v45  ;;  %v363_v53 = vadd.f32 %v2275_v29, %v362_v51  ;;  %v439_v56 = vadd.f32 %v438_v52, %v2278_v30  ;;  %v443_v14 = vpop.f32.mrf.mxu3 }
  0xb7   : > { %v1812_v46 = vsel %vm477_vm5, 1.0, %v2073_v44  ;;  %483 = vst.msk [vmem:[#allocation3 + $0x8] sm:$0xff] %vm338_vm2, %v481_v43  ;;  %v435_v47 = vpop.f32.mrf.mxu1 }
  0xb8   : > { %v482_v48 = vsel %vm480_vm3, %v1812_v46, %v2204_v10  ;;  %v436_v49 = vadd.f32 %v435_v47, %v2278_v30 }
  0xb9   : > { %484 = vst.msk [vmem:[#allocation2 + $0x8] sm:$0xff] %vm338_vm2, %v482_v48 }
  0xba   : > { %487 = vrot.lane.b32.xlu0 %v436_v49, %s2074_s25 }
  0xbb   : > { %v553_v54 = vld [vmem:[#allocation3] sm:$0xff] }
  0xbc   : > { %v611_v55 = vmul.f32 0.9, %v553_v54 }
  0xbd   : > { %v548_v57 = vld [vmem:[#allocation2] sm:$0xff]  ;;  %v440_v63 = vpop.f32.mrf.mxu2  ;;  %v365_v2 = vpop.f32.mrf.mxu0 }
  0xbe   : > { %v612_v58 = vadd.f32 %v611_v55, %v363_v53  ;;  %v613_v60 = vmul.f32 0.5, %v548_v57  ;;  %v441_v1 = vadd.f32 %v440_v63, %v2278_v30  ;;  %v366_v5 = vadd.f32 %v2275_v29, %v365_v2  ;;  %v444_v17 = vpop.f32.mrf.mxu3 }
  0xc0   : > { %v2305_v59 = vld [vmem:[#allocation2 + $0x8] sm:$0xff]  ;;  %v614_v62 = vsub.f32 %v612_v58, %v613_v60 }
  0xc1   : > { %v558_v61 = vpack.c.bf16 %v2305_v59, %v548_v57  ;;  %v391_v57 = vld [vmem:[#allocation3 + $0x20] sm:$0xff] }
  0xc2   : > { %502 = vrot.lane.b32.xlu0 %v439_v56, %s2075_s15  ;;  %vm615_vm6 = vcmp.gt.f32.partialorder %v614_v62, 0.5  ;;  %618 = vst.msk [vmem:[#allocation3] sm:$0xff] %vm338_vm2, %v614_v62 }
  0xc3   : > { %1817 = vmatmul.msk.bf16.vlgmr.msrb.gmra.mxu3 %vm338_vm2, %v558_v61  ;;  %1820 = vmatmul.msk.bf16.vlgmr.msrb.gmra.mxu1 %vm338_vm2, %v558_v61  ;;  %v1823_v0 = vsel %vm615_vm6, 1.0, %v2073_v44  ;;  %vm538_vm6 = vcmp.ge.s32.totalorder %v2286_v37, 5 }
  0xc4   : > { %1060 = vmatpush.bf16.msrb.mxu3 %v2243_v21  ;;  %1214 = vmatpush.bf16.msrb.mxu1 %v2243_v21  ;;  %619 = vst.msk [vmem:[#allocation2] sm:$0xff] %vm338_vm2, %v1823_v0 }
  0xc5   : > { %v367_v18 = vpop.f32.mrf.mxu0  ;;  %v455_v32 = vpop.f32.mrf.mxu2 }
  0xc6   : > { %v368_v20 = vadd.f32 %v2275_v29, %v367_v18 }
  0xc8   : > { %1061 = vmatpush.bf16.msrb.mxu3 %v2254_v24  ;;  %1215 = vmatpush.bf16.msrb.mxu1 %v2254_v24 }
  0xc9   : > { %v707_v3 = vld [vmem:[#allocation3] sm:$0xff] }
  0xca   : > { %517 = vrot.lane.b32.xlu0 %v441_v1, %s2076_s26  ;;  %v765_v6 = vmul.f32 0.9, %v707_v3 }
  0xcb   : > { %v2323_v7 = vld [vmem:[#allocation2] sm:$0xff] }
  0xcc   : > { %v766_v8 = vadd.f32 %v765_v6, %v366_v5  ;;  %v767_v10 = vmul.f32 0.5, %v2323_v7 }
  0xcd   : > { %v370_v38 = vpop.f32.mrf.mxu0  ;;  %v456_v43 = vpop.f32.mrf.mxu2 }
  0xce   : > { %v768_v13 = vsub.f32 %v766_v8, %v767_v10  ;;  %v371_v41 = vadd.f32 %v2275_v29, %v370_v38 }
  0xd0   : > { %vm769_vm7 = vcmp.gt.f32.partialorder %v768_v13, 0.5  ;;  %772 = vst.msk [vmem:[#allocation3] sm:$0xff] %vm338_vm2, %v768_v13 }
  0xd1   : > { %v1835_v15 = vsel %vm769_vm7, 1.0, %v2073_v44 }
  0xd2   : > { %773 = vst.msk [vmem:[#allocation2] sm:$0xff] %vm338_vm2, %v1835_v15 }
  0xd5   : > { %v458_v58 = vpop.f32.mrf.mxu2  ;;  %v372_v63 = vpop.f32.mrf.mxu0 }
  0xd6   : > { %v373_v1 = vadd.f32 %v2275_v29, %v372_v63 }
  0xd7   : > { %v861_v19 = vld [vmem:[#allocation3] sm:$0xff] }
  0xd8   : > { %v919_v22 = vmul.f32 0.9, %v861_v19 }
  0xd9   : > { %v2330_v23 = vld [vmem:[#allocation2] sm:$0xff] }
  0xda   : > { %v920_v26 = vadd.f32 %v919_v22, %v368_v20  ;;  %v921_v27 = vmul.f32 0.5, %v2330_v23 }
  0xdc   : > { %v922_v28 = vsub.f32 %v920_v26, %v921_v27  ;;  %v554_v27 = vld [vmem:[#allocation3 + $0x8] sm:$0xff] }
  0xdd   : > { %v459_v13 = vpop.f32.mrf.mxu2 }
  0xde   : > { %vm923_vm8 = vcmp.gt.f32.partialorder %v922_v28, 0.5  ;;  %926 = vst.msk [vmem:[#allocation3] sm:$0xff] %vm338_vm2, %v922_v28  ;;  %v531_v13 = vld [vmem:[#allocation4] sm:$0xff] }
  0xdf   : > { %v1847_v33 = vsel %vm923_vm8, 1.0, %v2073_v44  ;;  %vm541_vm8 = vcmask 130048  }
  0xe0   : > { %927 = vst.msk [vmem:[#allocation2] sm:$0xff] %vm338_vm2, %v1847_v33  ;;  %v2377_v33 = vstv %s546_s28  ;;  %s2079_s28 = smov 48  }
  0xe1   : > { %vm626_vm1 = vcmp.ge.s32.totalorder %v2377_v33, 1 }
  0xe5   : > { %v1015_v39 = vld [vmem:[#allocation3] sm:$0xff] }
  0xe6   : > { %v1073_v42 = vmul.f32 0.9, %v1015_v39 }
  0xe7   : > { %v2339_v46 = vld [vmem:[#allocation2] sm:$0xff] }
  0xe8   : > { %v1074_v47 = vadd.f32 %v1073_v42, %v371_v41  ;;  %v1075_v48 = vmul.f32 0.5, %v2339_v46 }
  0xea   : > { %v1076_v52 = vsub.f32 %v1074_v47, %v1075_v48 }
  0xec   : > { %vm1077_vm11 = vcmp.gt.f32.partialorder %v1076_v52, 0.5  ;;  %1080 = vst.msk [vmem:[#allocation3] sm:$0xff] %vm338_vm2, %v1076_v52 }
  0xed   : > { %v1859_v56 = vsel %vm1077_vm11, 1.0, %v2073_v44  ;;  %vm684_vm11 = vcmp.ge.s32.totalorder %v2377_v33, 5 }
  0xee   : > { %1081 = vst.msk [vmem:[#allocation2] sm:$0xff] %vm338_vm2, %v1859_v56 }
  0xf3   : > { %v1169_v3 = vld [vmem:[#allocation3] sm:$0xff] }
  0xf4   : > { %v1227_v8 = vmul.f32 0.9, %v1169_v3  ;;  %v530_v3 = vld [vmem:[#allocation5] sm:$0xff] }
  0xf5   : > { %v2356_v6 = vld [vmem:[#allocation2] sm:$0xff] }
  0xf6   : > { %v1229_v10 = vmul.f32 0.5, %v2356_v6  ;;  %v1228_v15 = vadd.f32 %v1227_v8, %v373_v1  ;;  %v532_v8 = vmul.f32 0.9, %v530_v3 }
  0xf8   : > { %v1230_v18 = vsub.f32 %v1228_v15, %v1229_v10 }
  0xfa   : > { %vm1231_vm0 = vcmp.gt.f32.partialorder %v1230_v18, 0.5  ;;  %1234 = vst.msk [vmem:[#allocation3] sm:$0xff] %vm338_vm2, %v1230_v18 }
 0x12c   : > { %v488_v35 = vpop.permute.xlu0 %487 }
 0x12d   : > { %v490_v36 = vadd.f32 %v488_v35, %v485_v34  ;;  %v620_v35 = vmul.f32 0.9, %v554_v27 }
 0x12f   : > { %v491_v45 = vsub.f32 %v490_v36, %v2206_v11 }
 0x131   : > { %vm492_vm10 = vcmp.gt.f32.partialorder %v491_v45, 1.0  ;;  %v496_v49 = vsel %vm495_vm9, %v491_v45, %v389_v31  ;;  %v1871_v31 = vsel %vm1231_vm0, 1.0, %v2073_v44 }
 0x132   : > { %v1813_v51 = vsel %vm492_vm10, 1.0, %v2073_v44  ;;  %498 = vst.msk [vmem:[#allocation3 + $0x10] sm:$0xff] %vm338_vm2, %v496_v49 }
 0x133   : > { %v497_v53 = vsel %vm495_vm9, %v1813_v51, %v2206_v11  ;;  %v515_v11 = vmul.f32 0.9, %v391_v57  ;;  %1235 = vst.msk [vmem:[#allocation2] sm:$0xff] %vm338_vm2, %v1871_v31  ;;  %vm641_vm9 = vcmp.ge.s32.totalorder %v2377_v33, 2 }
 0x134   : > { %499 = vst.msk [vmem:[#allocation2 + $0x10] sm:$0xff] %vm338_vm2, %v497_v53  ;;  %v503_v54 = vpop.permute.xlu0 %502 }
 0x135   : > { %v505_v55 = vadd.f32 %v503_v54, %v500_v50 }
 0x137   : > { %v506_v60 = vsub.f32 %v505_v55, %v2208_v12 }
 0x139   : > { %vm507_vm13 = vcmp.gt.f32.partialorder %v506_v60, 1.0  ;;  %v511_v61 = vsel %vm510_vm12, %v506_v60, %v390_v40  ;;  %v1323_v40 = vld [vmem:[#allocation3] sm:$0xff]  ;;  %v555_v18 = vld [vmem:[#allocation3 + $0x10] sm:$0xff] }
 0x13a   : > { %v1814_v62 = vsel %vm507_vm13, 1.0, %v2073_v44  ;;  %513 = vst.msk [vmem:[#allocation3 + $0x18] sm:$0xff] %vm338_vm2, %v511_v61  ;;  %v1381_v42 = vmul.f32 0.9, %v1323_v40  ;;  %v2383_v43 = vld [vmem:[#allocation2] sm:$0xff] }
 0x13b   : > { %v512_v0 = vsel %vm510_vm12, %v1814_v62, %v2208_v12  ;;  %v2364_v22 = vld [vmem:[#allocation2 + $0x10] sm:$0xff]  ;;  %v1383_v48 = vmul.f32 0.5, %v2383_v43 }
 0x13c   : > { %514 = vst.msk [vmem:[#allocation2 + $0x18] sm:$0xff] %vm338_vm2, %v512_v0  ;;  %v518_v2 = vpop.permute.xlu0 %517 }
 0x13d   : > { %v520_v5 = vadd.f32 %v518_v2, %v515_v11  ;;  %v461_v2 = vpop.f32.mrf.mxu2 }
 0x13f   : > { %v521_v14 = vsub.f32 %v520_v5, %v2227_v16 }
 0x140   : > { %v601_v12 = vpop.f32.mrf.mxu1 }
 0x141   : > { %vm522_vm15 = vcmp.gt.f32.partialorder %v521_v14, 1.0  ;;  %v526_v17 = vsel %vm525_vm14, %v521_v14, %v391_v57 }
 0x142   : > { %v1815_v19 = vsel %vm522_vm15, 1.0, %v2073_v44  ;;  %528 = vst.msk [vmem:[#allocation3 + $0x20] sm:$0xff] %vm338_vm2, %v526_v17  ;;  %vm656_vm15 = vcmp.ge.s32.totalorder %v2377_v33, 3 }
 0x143   : > { %v527_v20 = vsel %vm525_vm14, %v1815_v19, %v2227_v16  ;;  %v2366_v26 = vld [vmem:[#allocation2 + $0x18] sm:$0xff]  ;;  %v375_v16 = vpop.f32.mrf.mxu0  ;;  %v631_v19 = vmul.f32 0.9, %v555_v18 }
 0x144   : > { %529 = vst.msk [vmem:[#allocation2 + $0x20] sm:$0xff] %vm338_vm2, %v527_v20  ;;  %v559_v28 = vpack.c.bf16 %v2366_v26, %v2364_v22  ;;  %v376_v39 = vadd.f32 %v2275_v29, %v375_v16 }
 0x146   : > { %v579_v32 = vpop.f32.mrf.mxu3  ;;  %1818 = vmatmul.msk.bf16.gmra.mxu3 %vm338_vm2, %v559_v28  ;;  %1821 = vmatmul.msk.bf16.gmra.mxu1 %vm338_vm2, %v559_v28  ;;  %v1382_v47 = vadd.f32 %v1381_v42, %v376_v39 }
 0x147   : > { %v580_v34 = vadd.f32 %v579_v32, %v2278_v30 }
 0x148   : > { %v602_v36 = vpop.f32.mrf.mxu1  ;;  %v1384_v53 = vsub.f32 %v1382_v47, %v1383_v48 }
 0x149   : > { %v621_v38 = vadd.f32 %v620_v35, %v580_v34 }
 0x14a   : > { %vm1385_vm4 = vcmp.gt.f32.partialorder %v1384_v53, 0.5  ;;  %1388 = vst.msk [vmem:[#allocation3] sm:$0xff] %vm338_vm2, %v1384_v53 }
 0x14b   : > { %v622_v41 = vsub.f32 %v621_v38, %v2305_v59  ;;  %v2392_v54 = vld [vmem:[#allocation2 + $0x20] sm:$0xff]  ;;  %v1883_v55 = vsel %vm1385_vm4, 1.0, %v2073_v44  ;;  %vm671_vm4 = vcmp.ge.s32.totalorder %v2377_v33, 4 }
 0x14c   : > { %1389 = vst.msk [vmem:[#allocation2] sm:$0xff] %vm338_vm2, %v1883_v55  ;;  %v560_v56 = vpack.c.bf16 %v2392_v54, %v2392_v54 }
 0x14d   : > { %vm623_vm3 = vcmp.gt.f32.partialorder %v622_v41, 1.0  ;;  %v627_v45 = vsel %vm626_vm1, %v622_v41, %v554_v27 }
 0x14e   : > { %v1824_v49 = vsel %vm623_vm3, 1.0, %v2073_v44  ;;  %629 = vst.msk [vmem:[#allocation3 + $0x8] sm:$0xff] %vm338_vm2, %v627_v45  ;;  %v581_v50 = vpop.f32.mrf.mxu3 }
 0x14f   : > { %v628_v51 = vsel %vm626_vm1, %v1824_v49, %v2305_v59  ;;  %v582_v52 = vadd.f32 %v581_v50, %v2278_v30  ;;  %v377_v59 = vpop.f32.mrf.mxu0 }
 0x150   : > { %630 = vst.msk [vmem:[#allocation2 + $0x8] sm:$0xff] %vm338_vm2, %v628_v51  ;;  %v378_v58 = vadd.f32 %v2275_v29, %v377_v59  ;;  %v2452_v59 = vstv %s700_s29  ;;  %s1654_s29 = scalar_lea.hbm %s2888_s6, %s2282_s20 }
 0x151   : > { %633 = vrot.lane.b32.xlu1 %v582_v52, %s2074_s25  ;;  %v1477_v61 = vld [vmem:[#allocation3] sm:$0xff]  ;;  %vm780_vm13 = vcmp.ge.s32.totalorder %v2452_v59, 1  ;;  %vm795_vm1 = vcmp.ge.s32.totalorder %v2452_v59, 2 }
 0x152   : > { %v1535_v11 = vmul.f32 0.9, %v1477_v61 }
 0x153   : > { %v2407_v62 = vld [vmem:[#allocation2] sm:$0xff] }
 0x154   : > { %v1536_v63 = vadd.f32 %v1535_v11, %v378_v58  ;;  %v1537_v0 = vmul.f32 0.5, %v2407_v62 }
 0x155   : > { %v708_v52 = vld [vmem:[#allocation3 + $0x8] sm:$0xff] }
 0x156   : > { %1819 = vmatmul.msk.bf16.gmra.mxu3 %vm338_vm2, %v560_v56  ;;  %1822 = vmatmul.msk.bf16.gmra.mxu1 %vm338_vm2, %v560_v56  ;;  %v1538_v1 = vsub.f32 %v1536_v63, %v1537_v0 }
 0x157   : > { %v2401_v57 = vld [vmem:[#allocation2 + $0x8] sm:$0xff] }
 0x158   : > { %v712_v60 = vpack.c.bf16 %v2401_v57, %v2323_v7  ;;  %vm1539_vm5 = vcmp.gt.f32.partialorder %v1538_v1, 0.5  ;;  %1542 = vst.msk [vmem:[#allocation3] sm:$0xff] %vm338_vm2, %v1538_v1  ;;  %v2419_v7 = vperm.slane %v2268_v25, 1  ;;  %v463_v25 = vpop.f32.mrf.mxu2 }
 0x159   : > { %v1895_v29 = vsel %vm1539_vm5, 1.0, %v2073_v44 }
 0x15a   : > { %1829 = vmatmul.msk.bf16.vlgmr.msra.gmra.mxu2 %vm338_vm2, %v712_v60  ;;  %1543 = vst.msk [vmem:[#allocation2] sm:$0xff] %vm338_vm2, %v1895_v29  ;;  %v462_v5 = vadd.f32 %v461_v2, %v2419_v7 }
 0x15b   : > { %1346 = vmatpush.bf16.msra.mxu2 %v2189_v4 }
 0x15c   : > { %v533_v10 = vadd.f32 %v532_v8, %v462_v5 }
 0x15e   : > { %v534_v14 = vsub.f32 %v533_v10, %v531_v13 }
 0x15f   : > { %1347 = vmatpush.bf16.msra.mxu2 %v2202_v9 }
 0x160   : > { %vm535_vm7 = vcmp.gt.f32.partialorder %v534_v14, 1.0  ;;  %v539_v15 = vsel %vm538_vm6, %v534_v14, %v530_v3 }
 0x161   : > { %v1816_v12 = vsel %vm535_vm7, 1.0, %v2073_v44  ;;  %542 = vst.msk [vmem:[#allocation5] sm:$0xff] %vm541_vm8, %v539_v15 }
 0x162   : > { %v540_v17 = vsel %vm538_vm6, %v1816_v12, %v531_v13  ;;  %545 = vst.msk [vmem:[%s2177_s17] sm:$0xff] %vm541_vm8, %v539_v15 }
 0x163   : > { %543 = vst.msk [vmem:[#allocation4] sm:$0xff] %vm541_vm8, %v540_v17 }
 0x164   : > { %544 = vst.msk [vmem:[%s2175_s16] sm:$0xff] %vm541_vm8, %v540_v17 }
 0x166   : > { %1832 = vmatmul.msk.bf16.vlgmr.msra.gmra.mxu3 %vm338_vm2, %v712_v60  ;;  %v774_v60 = vmul.f32 0.9, %v708_v52 }
 0x167   : > { %1368 = vmatpush.bf16.msra.mxu3 %v2243_v21 }
 0x168   : > { %v676_v38 = vld [vmem:[#allocation5] sm:$0xff] }
 0x169   : > { %v678_v41 = vmul.f32 0.9, %v676_v38 }
 0x16a   : > { %v677_v47 = vld [vmem:[#allocation4] sm:$0xff] }
 0x16b   : > { %1369 = vmatpush.bf16.msra.mxu3 %v2254_v24 }
 0x1c3   : > { %v634_v20 = vpop.permute.xlu1 %633  ;;  %v604_v27 = vpop.f32.mrf.mxu1 }
 0x1c4   : > { %v636_v37 = vadd.f32 %v634_v20, %v631_v19  ;;  %v557_v19 = vld [vmem:[#allocation3 + $0x20] sm:$0xff] }
 0x1c6   : > { %v637_v28 = vsub.f32 %v636_v37, %v2364_v22  ;;  %v661_v37 = vmul.f32 0.9, %v557_v19 }
 0x1c8   : > { %vm638_vm10 = vcmp.gt.f32.partialorder %v637_v28, 1.0  ;;  %v642_v31 = vsel %vm641_vm9, %v637_v28, %v555_v18 }
 0x1c9   : > { %v1825_v32 = vsel %vm638_vm10, 1.0, %v2073_v44  ;;  %644 = vst.msk [vmem:[#allocation3 + $0x10] sm:$0xff] %vm338_vm2, %v642_v31  ;;  %v584_v16 = vpop.f32.mrf.mxu3 }
 0x1ca   : > { %v643_v34 = vsel %vm641_vm9, %v1825_v32, %v2364_v22  ;;  %v585_v35 = vadd.f32 %v584_v16, %v2278_v30  ;;  %vm838_vm9 = vcmp.ge.s32.totalorder %v2452_v59, 5 }
 0x1cb   : > { %645 = vst.msk [vmem:[#allocation2 + $0x10] sm:$0xff] %vm338_vm2, %v643_v34  ;;  %v605_v36 = vpop.f32.mrf.mxu1 }
 0x1cc   : > { %648 = vrot.lane.b32.xlu1 %v585_v35, %s2075_s15 }
 0x1d0   : > { %v709_v12 = vld [vmem:[#allocation3 + $0x10] sm:$0xff] }
 0x1d1   : > { %v586_v39 = vpop.f32.mrf.mxu3  ;;  %v785_v17 = vmul.f32 0.9, %v709_v12 }
 0x1d2   : > { %v587_v40 = vadd.f32 %v586_v39, %v2278_v30 }
 0x1d3   : > { %v607_v42 = vpop.f32.mrf.mxu1 }
 0x1d4   : > { %v608_v45 = vadd.f32 %v607_v42, %v2419_v7  ;;  %663 = vrot.lane.b32.xlu1 %v587_v40, %s2076_s26 }
 0x1d6   : > { %v679_v22 = vadd.f32 %v678_v41, %v608_v45 }
 0x1d8   : > { %v680_v48 = vsub.f32 %v679_v22, %v677_v47 }
 0x1d9   : > { %v589_v49 = vpop.f32.mrf.mxu3 }
 0x1da   : > { %v2442_v50 = vsel %vm684_vm11, %v680_v48, %v676_v38  ;;  %vm681_vm12 = vcmp.gt.f32.partialorder %v680_v48, 1.0 }
 0x1db   : > { %v609_v51 = vpop.f32.mrf.mxu1  ;;  %687 = vst.msk [vmem:[#allocation5] sm:$0xff] %vm541_vm8, %v2442_v50  ;;  %v1828_v53 = vsel %vm681_vm12, 1.0, %v2073_v44 }
 0x1dc   : > { %v2448_v55 = vsel %vm684_vm11, %v1828_v53, %v677_v47  ;;  %v2501_v47 = vstv %s854_s10 }
 0x1dd   : > { %v733_v56 = vpop.f32.mrf.mxu2  ;;  %688 = vst.msk [vmem:[#allocation4] sm:$0xff] %vm541_vm8, %v2448_v55  ;;  %vm934_vm6 = vcmp.ge.s32.totalorder %v2501_v47, 1 }
 0x1de   : > { %v734_v58 = vadd.f32 %v733_v56, %v2278_v30 }
 0x1e0   : > { %v775_v61 = vadd.f32 %v774_v60, %v734_v58 }
 0x1e1   : > { %v590_v11 = vpop.f32.mrf.mxu3 }
 0x1e2   : > { %v776_v63 = vsub.f32 %v775_v61, %v2401_v57 }
 0x1e4   : > { %vm777_vm14 = vcmp.gt.f32.partialorder %v776_v63, 1.0  ;;  %v781_v0 = vsel %vm780_vm13, %v776_v63, %v708_v52 }
 0x1e5   : > { %v1836_v1 = vsel %vm777_vm14, 1.0, %v2073_v44  ;;  %783 = vst.msk [vmem:[#allocation3 + $0x8] sm:$0xff] %vm338_vm2, %v781_v0  ;;  %v735_v29 = vpop.f32.mrf.mxu2 }
 0x1e6   : > { %v782_v2 = vsel %vm780_vm13, %v1836_v1, %v2401_v57  ;;  %v736_v3 = vadd.f32 %v735_v29, %v2278_v30  ;;  %v556_v57 = vld [vmem:[#allocation3 + $0x18] sm:$0xff]  ;;  %vm810_vm13 = vcmp.ge.s32.totalorder %v2452_v59, 3 }
 0x1e7   : > { %784 = vst.msk [vmem:[#allocation2 + $0x8] sm:$0xff] %vm338_vm2, %v782_v2  ;;  %v646_v14 = vmul.f32 0.9, %v556_v57 }
 0x1e8   : > { %787 = vrot.lane.b32.xlu2 %v736_v3, %s2074_s25 }
 0x1e9   : > { %v755_v5 = vpop.f32.mrf.mxu3 }
 0x1ee   : > { %v2463_v8 = vld [vmem:[#allocation2 + $0x8] sm:$0xff] }
 0x1ef   : > { %v866_v10 = vpack.c.bf16 %v2463_v8, %v2330_v23 }
 0x1f1   : > { %v756_v13 = vpop.f32.mrf.mxu3  ;;  %1841 = vmatmul.msk.bf16.vlgmr.msrb.gmra.mxu0 %vm338_vm2, %v866_v10  ;;  %1844 = vmatmul.msk.bf16.vlgmr.msra.gmra.mxu1 %vm338_vm2, %v866_v10 }
 0x1f2   : > { %1500 = vmatpush.bf16.msrb.mxu0 %v2189_v4  ;;  %1522 = vmatpush.bf16.msra.mxu1 %v2243_v21 }
 0x1f6   : > { %1501 = vmatpush.bf16.msrb.mxu0 %v2202_v9  ;;  %1523 = vmatpush.bf16.msra.mxu1 %v2254_v24  ;;  %v704_v9 = vld [vmem:[#allocation2 + $0x10] sm:$0xff] }
 0x23e   : > { %v649_v15 = vpop.permute.xlu1 %648 }
 0x23f   : > { %v651_v25 = vadd.f32 %v649_v15, %v646_v14  ;;  %v831_v15 = vld [vmem:[#allocation4] sm:$0xff] }
 0x241   : > { %v652_v23 = vsub.f32 %v651_v25, %v2366_v26 }
 0x242   : > { %v788_v18 = vpop.permute.xlu2 %787 }
 0x243   : > { %vm653_vm0 = vcmp.gt.f32.partialorder %v652_v23, 1.0  ;;  %v657_v4 = vsel %vm656_vm15, %v652_v23, %v556_v57  ;;  %v790_v20 = vadd.f32 %v788_v18, %v785_v17 }
 0x244   : > { %v1826_v21 = vsel %vm653_vm0, 1.0, %v2073_v44  ;;  %659 = vst.msk [vmem:[#allocation3 + $0x18] sm:$0xff] %vm338_vm2, %v657_v4 }
 0x245   : > { %v658_v24 = vsel %vm656_vm15, %v1826_v21, %v2366_v26  ;;  %v791_v27 = vsub.f32 %v790_v20, %v704_v9  ;;  %vm949_vm15 = vcmp.ge.s32.totalorder %v2501_v47, 2 }
 0x246   : > { %660 = vst.msk [vmem:[#allocation2 + $0x18] sm:$0xff] %vm338_vm2, %v658_v24  ;;  %v664_v28 = vpop.permute.xlu1 %663 }
 0x247   : > { %vm792_vm3 = vcmp.gt.f32.partialorder %v791_v27, 1.0  ;;  %v796_v31 = vsel %vm795_vm1, %v791_v27, %v709_v12  ;;  %v666_v32 = vadd.f32 %v664_v28, %v661_v37 }
 0x248   : > { %v1837_v16 = vsel %vm792_vm3, 1.0, %v2073_v44  ;;  %798 = vst.msk [vmem:[#allocation3 + $0x10] sm:$0xff] %vm338_vm2, %v796_v31 }
 0x249   : > { %v797_v34 = vsel %vm795_vm1, %v1837_v16, %v704_v9  ;;  %v667_v35 = vsub.f32 %v666_v32, %v2392_v54  ;;  %vm825_vm1 = vcmp.ge.s32.totalorder %v2452_v59, 4 }
 0x24a   : > { %799 = vst.msk [vmem:[#allocation2 + $0x10] sm:$0xff] %vm338_vm2, %v797_v34 }
 0x24b   : > { %vm668_vm5 = vcmp.gt.f32.partialorder %v667_v35, 1.0  ;;  %v672_v26 = vsel %vm671_vm4, %v667_v35, %v557_v19 }
 0x24c   : > { %v1827_v36 = vsel %vm668_vm5, 1.0, %v2073_v44  ;;  %674 = vst.msk [vmem:[#allocation3 + $0x20] sm:$0xff] %vm338_vm2, %v672_v26 }
 0x24d   : > { %v673_v38 = vsel %vm671_vm4, %v1827_v36, %v2392_v54  ;;  %v2488_v39 = vld [vmem:[#allocation2 + $0x18] sm:$0xff]  ;;  %v862_v54 = vld [vmem:[#allocation3 + $0x8] sm:$0xff]  ;;  %v710_v36 = vld [vmem:[#allocation3 + $0x18] sm:$0xff] }
 0x24e   : > { %675 = vst.msk [vmem:[#allocation2 + $0x20] sm:$0xff] %vm338_vm2, %v673_v38  ;;  %v713_v33 = vpack.c.bf16 %v2488_v39, %v704_v9  ;;  %v928_v48 = vmul.f32 0.9, %v862_v54  ;;  %v2531_v9 = vstv %s1008_s11  ;;  %v800_v38 = vmul.f32 0.9, %v710_v36 }
 0x24f   : > { %vm1088_vm11 = vcmp.ge.s32.totalorder %v2531_v9, 1  ;;  %vm1103_vm4 = vcmp.ge.s32.totalorder %v2531_v9, 2 }
 0x250   : > { %1830 = vmatmul.msk.bf16.gmra.mxu2 %vm338_vm2, %v713_v33  ;;  %1833 = vmatmul.msk.bf16.gmra.mxu3 %vm338_vm2, %v713_v33 }
 0x255   : > { %v2494_v40 = vld [vmem:[#allocation2 + $0x20] sm:$0xff] }
 0x256   : > { %v714_v41 = vpack.c.bf16 %v2494_v40, %v2494_v40 }
 0x260   : > { %1831 = vmatmul.msk.bf16.gmra.mxu2 %vm338_vm2, %v714_v41  ;;  %1834 = vmatmul.msk.bf16.gmra.mxu3 %vm338_vm2, %v714_v41 }
 0x26e   : > { %v887_v42 = vpop.f32.mrf.mxu0  ;;  %v909_v45 = vpop.f32.mrf.mxu1 }
 0x26f   : > { %v888_v22 = vadd.f32 %v887_v42, %v2278_v30  ;;  %v863_v42 = vld [vmem:[#allocation3 + $0x10] sm:$0xff] }
 0x271   : > { %v929_v49 = vadd.f32 %v928_v48, %v888_v22 }
 0x273   : > { %v930_v51 = vsub.f32 %v929_v49, %v2463_v8  ;;  %v939_v49 = vmul.f32 0.9, %v863_v42 }
 0x275   : > { %vm931_vm7 = vcmp.gt.f32.partialorder %v930_v51, 1.0  ;;  %v935_v52 = vsel %vm934_vm6, %v930_v51, %v862_v54 }
 0x276   : > { %v1848_v53 = vsel %vm931_vm7, 1.0, %v2073_v44  ;;  %937 = vst.msk [vmem:[#allocation3 + $0x8] sm:$0xff] %vm338_vm2, %v935_v52  ;;  %v910_v56 = vpop.f32.mrf.mxu1  ;;  %v889_v1 = vpop.f32.mrf.mxu0 }
 0x277   : > { %v936_v58 = vsel %vm934_vm6, %v1848_v53, %v2463_v8  ;;  %v890_v3 = vadd.f32 %v889_v1, %v2278_v30  ;;  %v858_v53 = vld [vmem:[#allocation2 + $0x10] sm:$0xff]  ;;  %vm992_vm6 = vcmp.ge.s32.totalorder %v2501_v47, 5 }
 0x278   : > { %938 = vst.msk [vmem:[#allocation2 + $0x8] sm:$0xff] %vm338_vm2, %v936_v58 }
 0x27d   : > { %v1016_v4 = vld [vmem:[#allocation3 + $0x8] sm:$0xff] }
 0x27e   : > { %v1082_v27 = vmul.f32 0.9, %v1016_v4 }
 0x27f   : > { %v1011_v60 = vld [vmem:[#allocation2 + $0x8] sm:$0xff] }
 0x280   : > { %v1020_v61 = vpack.c.bf16 %v1011_v60, %v2339_v46  ;;  %v830_v46 = vld [vmem:[#allocation5] sm:$0xff] }
 0x281   : > { %v832_v57 = vmul.f32 0.9, %v830_v46 }
 0x282   : > { %1853 = vmatmul.msk.bf16.vlgmr.msrb.gmra.mxu2 %vm338_vm2, %v1020_v61  ;;  %1856 = vmatmul.msk.bf16.vlgmr.msrb.gmra.mxu3 %vm338_vm2, %v1020_v61 }
 0x2d3   : > { %v738_v11 = vpop.f32.mrf.mxu2  ;;  %v758_v63 = vpop.f32.mrf.mxu3 }
 0x2d4   : > { %v739_v0 = vadd.f32 %v738_v11, %v2278_v30  ;;  %v711_v63 = vld [vmem:[#allocation3 + $0x20] sm:$0xff] }
 0x2d6   : > { %802 = vrot.lane.b32.xlu2 %v739_v0, %s2075_s15  ;;  %v815_v0 = vmul.f32 0.9, %v711_v63 }
 0x2db   : > { %v740_v29 = vpop.f32.mrf.mxu2  ;;  %v759_v2 = vpop.f32.mrf.mxu3 }
 0x2dc   : > { %v741_v5 = vadd.f32 %v740_v29, %v2278_v30 }
 0x2de   : > { %817 = vrot.lane.b32.xlu1 %v741_v5, %s2076_s26  ;;  %941 = vrot.lane.b32.xlu2 %v890_v3, %s2074_s25 }
 0x2e3   : > { %v743_v8 = vpop.f32.mrf.mxu2  ;;  %v761_v10 = vpop.f32.mrf.mxu3 }
 0x2e4   : > { %v762_v13 = vadd.f32 %v761_v10, %v2419_v7 }
 0x2e6   : > { %v833_v14 = vadd.f32 %v832_v57, %v762_v13 }
 0x2e8   : > { %v834_v12 = vsub.f32 %v833_v14, %v831_v15 }
 0x2ea   : > { %v2521_v25 = vsel %vm838_vm9, %v834_v12, %v830_v46  ;;  %vm835_vm10 = vcmp.gt.f32.partialorder %v834_v12, 1.0 }
 0x2eb   : > { %v744_v23 = vpop.f32.mrf.mxu2  ;;  %v763_v17 = vpop.f32.mrf.mxu3  ;;  %v1840_v18 = vsel %vm835_vm10, 1.0, %v2073_v44  ;;  %841 = vst.msk [vmem:[#allocation5] sm:$0xff] %vm541_vm8, %v2521_v25 }
 0x2ec   : > { %v2526_v19 = vsel %vm838_vm9, %v1840_v18, %v831_v15 }
 0x2ed   : > { %842 = vst.msk [vmem:[#allocation4] sm:$0xff] %vm541_vm8, %v2526_v19 }
 0x305   : > { %v1041_v20 = vpop.f32.mrf.mxu2  ;;  %v1063_v21 = vpop.f32.mrf.mxu3 }
 0x306   : > { %v1042_v24 = vadd.f32 %v1041_v20, %v2278_v30 }
 0x308   : > { %v1083_v37 = vadd.f32 %v1082_v27, %v1042_v24 }
 0x30a   : > { %v1084_v28 = vsub.f32 %v1083_v37, %v1011_v60 }
 0x30c   : > { %vm1085_vm12 = vcmp.gt.f32.partialorder %v1084_v28, 1.0  ;;  %v1089_v31 = vsel %vm1088_vm11, %v1084_v28, %v1016_v4 }
 0x30d   : > { %v1860_v32 = vsel %vm1085_vm12, 1.0, %v2073_v44  ;;  %1091 = vst.msk [vmem:[#allocation3 + $0x8] sm:$0xff] %vm338_vm2, %v1089_v31  ;;  %v1043_v16 = vpop.f32.mrf.mxu2  ;;  %v1064_v34 = vpop.f32.mrf.mxu3 }
 0x30e   : > { %v1090_v35 = vsel %vm1088_vm11, %v1860_v32, %v1011_v60  ;;  %v1044_v26 = vadd.f32 %v1043_v16, %v2278_v30  ;;  %vm964_vm11 = vcmp.ge.s32.totalorder %v2501_v47, 3 }
 0x30f   : > { %1092 = vst.msk [vmem:[#allocation2 + $0x8] sm:$0xff] %vm338_vm2, %v1090_v35 }
 0x310   : > { %1095 = vrot.lane.b32.xlu2 %v1044_v26, %s2074_s25  ;;  %v985_v26 = vld [vmem:[#allocation4] sm:$0xff] }
 0x316   : > { %v1165_v12 = vld [vmem:[#allocation2 + $0x8] sm:$0xff] }
 0x317   : > { %v1174_v18 = vpack.c.bf16 %v1165_v12, %v2356_v6  ;;  %v984_v6 = vld [vmem:[#allocation5] sm:$0xff] }
 0x318   : > { %v986_v34 = vmul.f32 0.9, %v984_v6 }
 0x330   : > { %v803_v33 = vpop.permute.xlu2 %802 }
 0x331   : > { %v805_v41 = vadd.f32 %v803_v33, %v800_v38 }
 0x333   : > { %v806_v54 = vsub.f32 %v805_v41, %v2488_v39 }
 0x335   : > { %vm807_vm14 = vcmp.gt.f32.partialorder %v806_v54, 1.0  ;;  %v811_v45 = vsel %vm810_vm13, %v806_v54, %v710_v36 }
 0x336   : > { %v1838_v22 = vsel %vm807_vm14, 1.0, %v2073_v44  ;;  %813 = vst.msk [vmem:[#allocation3 + $0x18] sm:$0xff] %vm338_vm2, %v811_v45  ;;  %v1170_v45 = vld [vmem:[#allocation3 + $0x8] sm:$0xff] }
 0x337   : > { %v812_v48 = vsel %vm810_vm13, %v1838_v22, %v2488_v39  ;;  %vm979_vm13 = vcmp.ge.s32.totalorder %v2501_v47, 4 }
 0x338   : > { %814 = vst.msk [vmem:[#allocation2 + $0x18] sm:$0xff] %vm338_vm2, %v812_v48  ;;  %v942_v51 = vpop.permute.xlu2 %941 }
 0x339   : > { %v944_v52 = vadd.f32 %v942_v51, %v939_v49  ;;  %v2594_v49 = vstv %s1162_s12  ;;  %s1640_s12 = scalar_lea.hbm %s2887_s5, %s2282_s20 }
 0x33a   : > { %vm1242_vm9 = vcmp.ge.s32.totalorder %v2594_v49, 1 }
 0x33b   : > { %v945_v56 = vsub.f32 %v944_v52, %v858_v53  ;;  %v1236_v52 = vmul.f32 0.9, %v1170_v45 }
 0x33d   : > { %vm946_vm0 = vcmp.gt.f32.partialorder %v945_v56, 1.0  ;;  %v950_v58 = vsel %vm949_vm15, %v945_v56, %v863_v42 }
 0x33e   : > { %v1849_v60 = vsel %vm946_vm0, 1.0, %v2073_v44  ;;  %952 = vst.msk [vmem:[#allocation3 + $0x10] sm:$0xff] %vm338_vm2, %v950_v58 }
 0x33f   : > { %v951_v61 = vsel %vm949_vm15, %v1849_v60, %v858_v53  ;;  %v2549_v11 = vld [vmem:[#allocation2 + $0x18] sm:$0xff]  ;;  %vm1257_vm15 = vcmp.ge.s32.totalorder %v2594_v49, 2 }
 0x340   : > { %953 = vst.msk [vmem:[#allocation2 + $0x10] sm:$0xff] %vm338_vm2, %v951_v61  ;;  %v867_v39 = vpack.c.bf16 %v2549_v11, %v858_v53 }
 0x342   : > { %1842 = vmatmul.msk.bf16.gmra.mxu0 %vm338_vm2, %v867_v39  ;;  %1845 = vmatmul.msk.bf16.gmra.mxu1 %vm338_vm2, %v867_v39 }
 0x345   : > { %v1017_v59 = vld [vmem:[#allocation3 + $0x10] sm:$0xff] }
 0x346   : > { %v1093_v13 = vmul.f32 0.9, %v1017_v59 }
 0x347   : > { %v2567_v15 = vld [vmem:[#allocation2 + $0x10] sm:$0xff] }
 0x350   : > { %v818_v1 = vpop.permute.xlu1 %817 }
 0x351   : > { %v820_v29 = vadd.f32 %v818_v1, %v815_v0  ;;  %v864_v1 = vld [vmem:[#allocation3 + $0x18] sm:$0xff] }
 0x353   : > { %v821_v2 = vsub.f32 %v820_v29, %v2494_v40  ;;  %v954_v29 = vmul.f32 0.9, %v864_v1 }
 0x355   : > { %vm822_vm3 = vcmp.gt.f32.partialorder %v821_v2, 1.0  ;;  %v826_v3 = vsel %vm825_vm1, %v821_v2, %v711_v63 }
 0x356   : > { %v1839_v5 = vsel %vm822_vm3, 1.0, %v2073_v44  ;;  %828 = vst.msk [vmem:[#allocation3 + $0x20] sm:$0xff] %vm338_vm2, %v826_v3 }
 0x357   : > { %v827_v46 = vsel %vm825_vm1, %v1839_v5, %v2494_v40  ;;  %vm1146_vm1 = vcmp.ge.s32.totalorder %v2531_v9, 5 }
 0x358   : > { %829 = vst.msk [vmem:[#allocation2 + $0x20] sm:$0xff] %vm338_vm2, %v827_v46 }
 0x35d   : > { %v865_v46 = vld [vmem:[#allocation3 + $0x20] sm:$0xff] }
 0x35f   : > { %v2561_v8 = vld [vmem:[#allocation2 + $0x20] sm:$0xff] }
 0x360   : > { %v868_v10 = vpack.c.bf16 %v2561_v8, %v2561_v8 }
 0x362   : > { %1843 = vmatmul.msk.bf16.gmra.mxu0 %vm338_vm2, %v868_v10  ;;  %1846 = vmatmul.msk.bf16.gmra.mxu1 %vm338_vm2, %v868_v10 }
 0x36a   : > { %v1096_v57 = vpop.permute.xlu2 %1095 }
 0x36b   : > { %v1098_v14 = vadd.f32 %v1096_v57, %v1093_v13  ;;  %v969_v57 = vmul.f32 0.9, %v865_v46 }
 0x36d   : > { %v1099_v40 = vsub.f32 %v1098_v14, %v2567_v15 }
 0x36f   : > { %vm1100_vm5 = vcmp.gt.f32.partialorder %v1099_v40, 1.0  ;;  %v1104_v23 = vsel %vm1103_vm4, %v1099_v40, %v1017_v59 }
 0x370   : > { %v1861_v17 = vsel %vm1100_vm5, 1.0, %v2073_v44  ;;  %1106 = vst.msk [vmem:[#allocation3 + $0x10] sm:$0xff] %vm338_vm2, %v1104_v23 }
 0x371   : > { %v1105_v4 = vsel %vm1103_vm4, %v1861_v17, %v2567_v15 }
 0x372   : > { %1107 = vst.msk [vmem:[#allocation2 + $0x10] sm:$0xff] %vm338_vm2, %v1105_v4  ;;  %1865 = vmatmul.msk.bf16.vlgmr.msra.gmra.mxu0 %vm338_vm2, %v1174_v18  ;;  %1868 = vmatmul.msk.bf16.vlgmr.msrb.gmra.mxu1 %vm338_vm2, %v1174_v18 }
 0x377   : > { %v1171_v47 = vld [vmem:[#allocation3 + $0x10] sm:$0xff] }
 0x3bf   : > { %v892_v20 = vpop.f32.mrf.mxu0  ;;  %v912_v21 = vpop.f32.mrf.mxu1 }
 0x3c0   : > { %v893_v24 = vadd.f32 %v892_v20, %v2278_v30  ;;  %v1247_v21 = vmul.f32 0.9, %v1171_v47 }
 0x3c2   : > { %956 = vrot.lane.b32.xlu0 %v893_v24, %s2075_s15 }
 0x3c7   : > { %v894_v27 = vpop.f32.mrf.mxu0  ;;  %v913_v37 = vpop.f32.mrf.mxu1 }
 0x3c8   : > { %v895_v28 = vadd.f32 %v894_v27, %v2278_v30  ;;  %v2625_v37 = vld [vmem:[#allocation2 + $0x10] sm:$0xff] }
 0x3ca   : > { %971 = vrot.lane.b32.xlu1 %v895_v28, %s2076_s26 }
 0x3df   : > { %v897_v31 = vpop.f32.mrf.mxu0  ;;  %v915_v32 = vpop.f32.mrf.mxu1 }
 0x3e0   : > { %v916_v16 = vadd.f32 %v915_v32, %v2419_v7 }
 0x3e2   : > { %v987_v35 = vadd.f32 %v986_v34, %v916_v16 }
 0x3e4   : > { %v988_v36 = vsub.f32 %v987_v35, %v985_v26 }
 0x3e6   : > { %v2584_v38 = vsel %vm992_vm6, %v988_v36, %v984_v6  ;;  %vm989_vm7 = vcmp.gt.f32.partialorder %v988_v36, 1.0 }
 0x3e7   : > { %v898_v33 = vpop.f32.mrf.mxu0  ;;  %v917_v41 = vpop.f32.mrf.mxu1  ;;  %995 = vst.msk [vmem:[#allocation5] sm:$0xff] %vm541_vm8, %v2584_v38  ;;  %v1852_v54 = vsel %vm989_vm7, 1.0, %v2073_v44 }
 0x3e8   : > { %v2589_v42 = vsel %vm992_vm6, %v1852_v54, %v985_v26  ;;  %vm1118_vm6 = vcmp.ge.s32.totalorder %v2531_v9, 3 }
 0x3e9   : > { %996 = vst.msk [vmem:[#allocation4] sm:$0xff] %vm541_vm8, %v2589_v42 }
 0x3ee   : > { %v1138_v54 = vld [vmem:[#allocation5] sm:$0xff] }
 0x3ef   : > { %v1195_v22 = vpop.f32.mrf.mxu0  ;;  %v1217_v48 = vpop.f32.mrf.mxu1 }
 0x3f0   : > { %v1196_v51 = vadd.f32 %v1195_v22, %v2278_v30  ;;  %v1140_v48 = vmul.f32 0.9, %v1138_v54 }
 0x3f2   : > { %v1237_v53 = vadd.f32 %v1236_v52, %v1196_v51  ;;  %v1139_v52 = vld [vmem:[#allocation4] sm:$0xff] }
 0x3f4   : > { %v1238_v56 = vsub.f32 %v1237_v53, %v1165_v12 }
 0x3f6   : > { %vm1239_vm10 = vcmp.gt.f32.partialorder %v1238_v56, 1.0  ;;  %v1243_v58 = vsel %vm1242_vm9, %v1238_v56, %v1170_v45 }
 0x3f7   : > { %v1872_v60 = vsel %vm1239_vm10, 1.0, %v2073_v44  ;;  %1245 = vst.msk [vmem:[#allocation3 + $0x8] sm:$0xff] %vm338_vm2, %v1243_v58  ;;  %v1197_v61 = vpop.f32.mrf.mxu0  ;;  %v1218_v39 = vpop.f32.mrf.mxu1 }
 0x3f8   : > { %v1244_v63 = vsel %vm1242_vm9, %v1872_v60, %v1165_v12  ;;  %v1198_v0 = vadd.f32 %v1197_v61, %v2278_v30  ;;  %vm1133_vm9 = vcmp.ge.s32.totalorder %v2531_v9, 4 }
 0x3f9   : > { %1246 = vst.msk [vmem:[#allocation2 + $0x8] sm:$0xff] %vm338_vm2, %v1244_v63 }
 0x3fa   : > { %1249 = vrot.lane.b32.xlu2 %v1198_v0, %s2074_s25 }
 0x3fe   : > { %v1324_v63 = vld [vmem:[#allocation3 + $0x8] sm:$0xff] }
 0x400   : > { %v1319_v32 = vld [vmem:[#allocation2 + $0x8] sm:$0xff] }
 0x401   : > { %v1328_v16 = vpack.c.bf16 %v1319_v32, %v2383_v43 }
 0x434   : > { %v957_v2 = vpop.permute.xlu0 %956 }
 0x435   : > { %v959_v3 = vadd.f32 %v957_v2, %v954_v29  ;;  %v2654_v29 = vstv %s1316_s13  ;;  %s1656_s13 = sshll.u32 %s2177_s17, 4  ;;  %s1657_s13 = int_to_ptr.vmem [resolvable:$true] %s1656_s13 }
 0x436   : > { %vm1396_vm4 = vcmp.ge.s32.totalorder %v2654_v29, 1 }
 0x437   : > { %v960_v5 = vsub.f32 %v959_v3, %v2549_v11  ;;  %v1390_v3 = vmul.f32 0.9, %v1324_v63 }
 0x439   : > { %vm961_vm12 = vcmp.gt.f32.partialorder %v960_v5, 1.0  ;;  %v965_v10 = vsel %vm964_vm11, %v960_v5, %v864_v1 }
 0x43a   : > { %v1850_v59 = vsel %vm961_vm12, 1.0, %v2073_v44  ;;  %967 = vst.msk [vmem:[#allocation3 + $0x18] sm:$0xff] %vm338_vm2, %v965_v10 }
 0x43b   : > { %v966_v13 = vsel %vm964_vm11, %v1850_v59, %v2549_v11  ;;  %vm1300_vm11 = vcmp.ge.s32.totalorder %v2594_v49, 5 }
 0x43c   : > { %968 = vst.msk [vmem:[#allocation2 + $0x18] sm:$0xff] %vm338_vm2, %v966_v13  ;;  %v972_v14 = vpop.permute.xlu1 %971 }
 0x43d   : > { %v974_v40 = vadd.f32 %v972_v14, %v969_v57 }
 0x43f   : > { %v975_v12 = vsub.f32 %v974_v40, %v2561_v8 }
 0x441   : > { %vm976_vm14 = vcmp.gt.f32.partialorder %v975_v12, 1.0  ;;  %v980_v23 = vsel %vm979_vm13, %v975_v12, %v865_v46  ;;  %v1018_v14 = vld [vmem:[#allocation3 + $0x18] sm:$0xff] }
 0x442   : > { %v1851_v17 = vsel %vm976_vm14, 1.0, %v2073_v44  ;;  %982 = vst.msk [vmem:[#allocation3 + $0x20] sm:$0xff] %vm338_vm2, %v980_v23  ;;  %v1108_v40 = vmul.f32 0.9, %v1018_v14 }
 0x443   : > { %v981_v18 = vsel %vm979_vm13, %v1851_v17, %v2561_v8  ;;  %v2614_v4 = vld [vmem:[#allocation2 + $0x18] sm:$0xff] }
 0x444   : > { %983 = vst.msk [vmem:[#allocation2 + $0x20] sm:$0xff] %vm338_vm2, %v981_v18  ;;  %v1021_v11 = vpack.c.bf16 %v2614_v4, %v2567_v15 }
 0x446   : > { %1854 = vmatmul.msk.bf16.gmra.mxu2 %vm338_vm2, %v1021_v11  ;;  %1857 = vmatmul.msk.bf16.gmra.mxu3 %vm338_vm2, %v1021_v11 }
 0x449   : > { %v1019_v18 = vld [vmem:[#allocation3 + $0x20] sm:$0xff] }
 0x44b   : > { %v2621_v20 = vld [vmem:[#allocation2 + $0x20] sm:$0xff] }
 0x44c   : > { %v1022_v27 = vpack.c.bf16 %v2621_v20, %v2621_v20 }
 0x454   : > { %v1250_v24 = vpop.permute.xlu2 %1249 }
 0x455   : > { %v1252_v8 = vadd.f32 %v1250_v24, %v1247_v21  ;;  %v1123_v24 = vmul.f32 0.9, %v1019_v18 }
 0x456   : > { %1855 = vmatmul.msk.bf16.gmra.mxu2 %vm338_vm2, %v1022_v27  ;;  %1858 = vmatmul.msk.bf16.gmra.mxu3 %vm338_vm2, %v1022_v27 }
 0x457   : > { %v1253_v15 = vsub.f32 %v1252_v8, %v2625_v37 }
 0x459   : > { %vm1254_vm0 = vcmp.gt.f32.partialorder %v1253_v15, 1.0  ;;  %v1258_v28 = vsel %vm1257_vm15, %v1253_v15, %v1171_v47 }
 0x45a   : > { %v1873_v6 = vsel %vm1254_vm0, 1.0, %v2073_v44  ;;  %1260 = vst.msk [vmem:[#allocation3 + $0x10] sm:$0xff] %vm338_vm2, %v1258_v28 }
 0x45b   : > { %v1259_v31 = vsel %vm1257_vm15, %v1873_v6, %v2625_v37  ;;  %vm1287_vm15 = vcmp.ge.s32.totalorder %v2594_v49, 4 }
 0x45c   : > { %1261 = vst.msk [vmem:[#allocation2 + $0x10] sm:$0xff] %vm338_vm2, %v1259_v31 }
 0x466   : > { %1877 = vmatmul.msk.bf16.vlgmr.msra.gmra.mxu2 %vm338_vm2, %v1328_v16  ;;  %1880 = vmatmul.msk.bf16.vlgmr.msra.gmra.mxu3 %vm338_vm2, %v1328_v16 }
 0x4c9   : > { %v1046_v34 = vpop.f32.mrf.mxu2  ;;  %v1066_v35 = vpop.f32.mrf.mxu3 }
 0x4ca   : > { %v1047_v26 = vadd.f32 %v1046_v34, %v2278_v30 }
 0x4cc   : > { %1110 = vrot.lane.b32.xlu0 %v1047_v26, %s2075_s15 }
 0x4d1   : > { %v1048_v36 = vpop.f32.mrf.mxu2  ;;  %v1067_v33 = vpop.f32.mrf.mxu3 }
 0x4d2   : > { %v1049_v41 = vadd.f32 %v1048_v36, %v2278_v30 }
 0x4d4   : > { %1125 = vrot.lane.b32.xlu1 %v1049_v41, %s2076_s26 }
 0x4d9   : > { %v1051_v45 = vpop.f32.mrf.mxu2  ;;  %v1069_v43 = vpop.f32.mrf.mxu3 }
 0x4da   : > { %v1070_v22 = vadd.f32 %v1069_v43, %v2419_v7 }
 0x4dc   : > { %v1141_v51 = vadd.f32 %v1140_v48, %v1070_v22 }
 0x4de   : > { %v1142_v53 = vsub.f32 %v1141_v51, %v1139_v52 }
 0x4e0   : > { %vm1143_vm3 = vcmp.gt.f32.partialorder %v1142_v53, 1.0  ;;  %v2644_v56 = vsel %vm1146_vm1, %v1142_v53, %v1138_v54 }
 0x4e1   : > { %v1052_v58 = vpop.f32.mrf.mxu2  ;;  %v1071_v60 = vpop.f32.mrf.mxu3  ;;  %v1864_v61 = vsel %vm1143_vm3, 1.0, %v2073_v44  ;;  %1149 = vst.msk [vmem:[#allocation5] sm:$0xff] %vm541_vm8, %v2644_v56 }
 0x4e2   : > { %v2649_v39 = vsel %vm1146_vm1, %v1864_v61, %v1139_v52  ;;  %vm1272_vm1 = vcmp.ge.s32.totalorder %v2594_v49, 3 }
 0x4e3   : > { %1150 = vst.msk [vmem:[#allocation4] sm:$0xff] %vm541_vm8, %v2649_v39 }
 0x4e9   : > { %v1349_v0 = vpop.f32.mrf.mxu2  ;;  %v1371_v1 = vpop.f32.mrf.mxu3 }
 0x4ea   : > { %v1350_v2 = vadd.f32 %v1349_v0, %v2278_v30  ;;  %v1293_v53 = vld [vmem:[#allocation4] sm:$0xff] }
 0x4ec   : > { %v1391_v5 = vadd.f32 %v1390_v3, %v1350_v2 }
 0x4ee   : > { %v1392_v46 = vsub.f32 %v1391_v5, %v1319_v32  ;;  %v2707_v5 = vstv %s1470_s18  ;;  %s1642_s18 = sshll.u32 %s2175_s16, 4  ;;  %s2833_s18 = int_to_ptr.vmem [resolvable:$true] %s1642_s18 }
 0x4ef   : > { %vm1550_vm13 = vcmp.ge.s32.totalorder %v2707_v5, 1 }
 0x4f0   : > { %vm1393_vm5 = vcmp.gt.f32.partialorder %v1392_v46, 1.0  ;;  %v1397_v10 = vsel %vm1396_vm4, %v1392_v46, %v1324_v63 }
 0x4f1   : > { %v1884_v59 = vsel %vm1393_vm5, 1.0, %v2073_v44  ;;  %1399 = vst.msk [vmem:[#allocation3 + $0x8] sm:$0xff] %vm338_vm2, %v1397_v10  ;;  %v1372_v13 = vpop.f32.mrf.mxu3  ;;  %v1351_v36 = vpop.f32.mrf.mxu2 }
 0x4f2   : > { %v1398_v57 = vsel %vm1396_vm4, %v1884_v59, %v1319_v32  ;;  %v1352_v54 = vadd.f32 %v1351_v36, %v2278_v30  ;;  %vm1411_vm4 = vcmp.ge.s32.totalorder %v2654_v29, 2 }
 0x4f3   : > { %1400 = vst.msk [vmem:[#allocation2 + $0x8] sm:$0xff] %vm338_vm2, %v1398_v57 }
 0x53e   : > { %v1111_v12 = vpop.permute.xlu0 %1110 }
 0x53f   : > { %v1113_v23 = vadd.f32 %v1111_v12, %v1108_v40 }
 0x541   : > { %v1114_v17 = vsub.f32 %v1113_v23, %v2614_v4 }
 0x543   : > { %vm1115_vm7 = vcmp.gt.f32.partialorder %v1114_v17, 1.0  ;;  %v1119_v11 = vsel %vm1118_vm6, %v1114_v17, %v1018_v14 }
 0x544   : > { %v1862_v47 = vsel %vm1115_vm7, 1.0, %v2073_v44  ;;  %1121 = vst.msk [vmem:[#allocation3 + $0x18] sm:$0xff] %vm338_vm2, %v1119_v11  ;;  %vm1454_vm7 = vcmp.ge.s32.totalorder %v2654_v29, 5 }
 0x545   : > { %v1120_v21 = vsel %vm1118_vm6, %v1862_v47, %v2614_v4  ;;  %vm693_vm6 = vcmask 261248  }
 0x546   : > { %1122 = vst.msk [vmem:[#allocation2 + $0x18] sm:$0xff] %vm338_vm2, %v1120_v21  ;;  %v1126_v27 = vpop.permute.xlu1 %1125 }
 0x547   : > { %v1128_v8 = vadd.f32 %v1126_v27, %v1123_v24 }
 0x549   : > { %v1129_v15 = vsub.f32 %v1128_v8, %v2621_v20 }
 0x54b   : > { %vm1130_vm10 = vcmp.gt.f32.partialorder %v1129_v15, 1.0  ;;  %v1134_v28 = vsel %vm1133_vm9, %v1129_v15, %v1019_v18  ;;  %v1172_v24 = vld [vmem:[#allocation3 + $0x18] sm:$0xff] }
 0x54c   : > { %v1863_v6 = vsel %vm1130_vm10, 1.0, %v2073_v44  ;;  %1136 = vst.msk [vmem:[#allocation3 + $0x20] sm:$0xff] %vm338_vm2, %v1134_v28  ;;  %v1262_v27 = vmul.f32 0.9, %v1172_v24  ;;  %vm1441_vm10 = vcmp.ge.s32.totalorder %v2654_v29, 4 }
 0x54d   : > { %v1135_v31 = vsel %vm1133_vm9, %v1863_v6, %v2621_v20  ;;  %v2672_v32 = vld [vmem:[#allocation2 + $0x18] sm:$0xff]  ;;  %v1473_v20 = vld [vmem:[#allocation2 + $0x8] sm:$0xff] }
 0x54e   : > { %1137 = vst.msk [vmem:[#allocation2 + $0x20] sm:$0xff] %vm338_vm2, %v1135_v31  ;;  %v1175_v4 = vpack.c.bf16 %v2672_v32, %v2625_v37  ;;  %v1482_v34 = vpack.c.bf16 %v1473_v20, %v2407_v62  ;;  %v1292_v62 = vld [vmem:[#allocation5] sm:$0xff] }
 0x54f   : > { %v1294_v51 = vmul.f32 0.9, %v1292_v62  ;;  %v1325_v6 = vld [vmem:[#allocation3 + $0x10] sm:$0xff] }
 0x550   : > { %1866 = vmatmul.msk.bf16.gmra.mxu0 %vm338_vm2, %v1175_v4  ;;  %1869 = vmatmul.msk.bf16.gmra.mxu1 %vm338_vm2, %v1175_v4 }
 0x553   : > { %v1173_v12 = vld [vmem:[#allocation3 + $0x20] sm:$0xff] }
 0x554   : > { %v1277_v23 = vmul.f32 0.9, %v1173_v12 }
 0x555   : > { %v2679_v9 = vld [vmem:[#allocation2 + $0x20] sm:$0xff] }
 0x556   : > { %v1176_v16 = vpack.c.bf16 %v2679_v9, %v2679_v9 }
 0x560   : > { %1867 = vmatmul.msk.bf16.gmra.mxu0 %vm338_vm2, %v1176_v16  ;;  %1870 = vmatmul.msk.bf16.gmra.mxu1 %vm338_vm2, %v1176_v16 }
 0x570   : > { %1889 = vmatmul.msk.bf16.vlgmr.msrb.gmra.mxu0 %vm338_vm2, %v1482_v34  ;;  %1892 = vmatmul.msk.bf16.vlgmr.msra.gmra.mxu1 %vm338_vm2, %v1482_v34 }
 0x5cd   : > { %v1200_v37 = vpop.f32.mrf.mxu0  ;;  %v1220_v35 = vpop.f32.mrf.mxu1 }
 0x5ce   : > { %v1201_v26 = vadd.f32 %v1200_v37, %v2278_v30  ;;  %v1320_v37 = vld [vmem:[#allocation2 + $0x10] sm:$0xff] }
 0x5d0   : > { %1264 = vrot.lane.b32.xlu0 %v1201_v26, %s2075_s15 }
 0x5d5   : > { %v1202_v33 = vpop.f32.mrf.mxu0  ;;  %v1221_v41 = vpop.f32.mrf.mxu1 }
 0x5d6   : > { %v1203_v45 = vadd.f32 %v1202_v33, %v2278_v30 }
 0x5d8   : > { %1279 = vrot.lane.b32.xlu2 %v1203_v45, %s2076_s26  ;;  %1403 = vrot.lane.b32.xlu0 %v1352_v54, %s2074_s25 }
 0x5dd   : > { %v1205_v43 = vpop.f32.mrf.mxu0  ;;  %v1223_v22 = vpop.f32.mrf.mxu1 }
 0x5de   : > { %v1224_v48 = vadd.f32 %v1223_v22, %v2419_v7 }
 0x5e0   : > { %690 = vrot.lane.b32.xlu0 %v2448_v55, %s2077_s14  ;;  %v1295_v52 = vadd.f32 %v1294_v51, %v1224_v48  ;;  %v1478_v55 = vld [vmem:[#allocation3 + $0x8] sm:$0xff] }
 0x5e1   : > { %v1544_v10 = vmul.f32 0.9, %v1478_v55 }
 0x5e2   : > { %v1296_v58 = vsub.f32 %v1295_v52, %v1293_v53 }
 0x5e4   : > { %v1301_v60 = vsel %vm1300_vm11, %v1296_v58, %v1292_v62  ;;  %vm1297_vm12 = vcmp.gt.f32.partialorder %v1296_v58, 1.0 }
 0x5e5   : > { %v1206_v61 = vpop.f32.mrf.mxu0  ;;  %v1225_v63 = vpop.f32.mrf.mxu1  ;;  %v1876_v0 = vsel %vm1297_vm12, 1.0, %v2073_v44  ;;  %1303 = vst.msk [vmem:[#allocation5] sm:$0xff] %vm541_vm8, %v1301_v60  ;;  %vm1565_vm12 = vcmp.ge.s32.totalorder %v2707_v5, 2 }
 0x5e6   : > { %v2700_v1 = vsel %vm1300_vm11, %v1876_v0, %v1293_v53 }
 0x5e7   : > { %1304 = vst.msk [vmem:[#allocation4] sm:$0xff] %vm541_vm8, %v2700_v1 }
 0x5e8   : > { %850 = vrot.lane.b32.xlu0 %v2521_v25, %s2076_s26 }
 0x5ec   : > { %v1446_v58 = vld [vmem:[#allocation5] sm:$0xff] }
 0x5ed   : > { %v1503_v2 = vpop.f32.mrf.mxu0  ;;  %v1525_v3 = vpop.f32.mrf.mxu1 }
 0x5ee   : > { %v1504_v46 = vadd.f32 %v1503_v2, %v2278_v30  ;;  %v1447_v3 = vld [vmem:[#allocation4] sm:$0xff] }
 0x5f0   : > { %v1545_v59 = vadd.f32 %v1544_v10, %v1504_v46  ;;  %1152 = vrot.lane.b32.xlu0 %v2649_v39, %s2075_s15 }
 0x5f2   : > { %v1546_v13 = vsub.f32 %v1545_v59, %v1473_v20 }
 0x5f4   : > { %vm1547_vm14 = vcmp.gt.f32.partialorder %v1546_v13, 1.0  ;;  %v1551_v57 = vsel %vm1550_vm13, %v1546_v13, %v1478_v55  ;;  %v1448_v55 = vmul.f32 0.9, %v1446_v58 }
 0x5f5   : > { %v1896_v25 = vsel %vm1547_vm14, 1.0, %v2073_v44  ;;  %1553 = vst.msk [vmem:[#allocation3 + $0x8] sm:$0xff] %vm338_vm2, %v1551_v57  ;;  %v1526_v14 = vpop.f32.mrf.mxu1  ;;  %v1505_v53 = vpop.f32.mrf.mxu0  ;;  %vm847_vm14 = vcmask 392448  }
 0x5f6   : > { %v1552_v40 = vsel %vm1550_vm13, %v1896_v25, %v1473_v20  ;;  %v1506_v63 = vadd.f32 %v1505_v53, %v2278_v30 }
 0x5f7   : > { %1554 = vst.msk [vmem:[#allocation2 + $0x8] sm:$0xff] %vm338_vm2, %v1552_v40 }
 0x5f8   : > { %1312 = vrot.lane.b32.xlu0 %v1301_v60, %s2078_s19 }
 0x632   : > { %v1280_v17 = vpop.permute.xlu2 %1279 }
 0x633   : > { %v1282_v39 = vadd.f32 %v1280_v17, %v1277_v23 }
 0x635   : > { %v1283_v18 = vsub.f32 %v1282_v39, %v2679_v9 }
 0x637   : > { %vm1284_vm0 = vcmp.gt.f32.partialorder %v1283_v18, 1.0  ;;  %v1288_v11 = vsel %vm1287_vm15, %v1283_v18, %v1173_v12 }
 0x638   : > { %v1875_v47 = vsel %vm1284_vm0, 1.0, %v2073_v44  ;;  %1290 = vst.msk [vmem:[#allocation3 + $0x20] sm:$0xff] %vm338_vm2, %v1288_v11 }
 0x639   : > { %v1289_v21 = vsel %vm1287_vm15, %v1875_v47, %v2679_v9  ;;  %v1401_v9 = vmul.f32 0.9, %v1325_v6  ;;  %vm1426_vm15 = vcmp.ge.s32.totalorder %v2654_v29, 3 }
 0x63a   : > { %1291 = vst.msk [vmem:[#allocation2 + $0x20] sm:$0xff] %vm338_vm2, %v1289_v21 }
 0x641   : > { %v1322_v54 = vld [vmem:[#allocation2 + $0x20] sm:$0xff] }
 0x642   : > { %v1265_v8 = vpop.permute.xlu0 %1264  ;;  %v1330_v45 = vpack.c.bf16 %v1322_v54, %v1322_v54 }
 0x643   : > { %v1267_v15 = vadd.f32 %v1265_v8, %v1262_v27 }
 0x645   : > { %v1268_v28 = vsub.f32 %v1267_v15, %v2672_v32 }
 0x647   : > { %vm1269_vm3 = vcmp.gt.f32.partialorder %v1268_v28, 1.0  ;;  %v1273_v31 = vsel %vm1272_vm1, %v1268_v28, %v1172_v24 }
 0x648   : > { %v1874_v4 = vsel %vm1269_vm3, 1.0, %v2073_v44  ;;  %1275 = vst.msk [vmem:[#allocation3 + $0x18] sm:$0xff] %vm338_vm2, %v1273_v31  ;;  %vm1155_vm3 = vcmask 654848  }
 0x649   : > { %v1274_v16 = vsel %vm1272_vm1, %v1874_v4, %v2672_v32  ;;  %vm1001_vm1 = vcmask 523648  }
 0x64a   : > { %1276 = vst.msk [vmem:[#allocation2 + $0x18] sm:$0xff] %vm338_vm2, %v1274_v16  ;;  %v1404_v20 = vpop.permute.xlu0 %1403 }
 0x64b   : > { %v1406_v34 = vadd.f32 %v1404_v20, %v1401_v9 }
 0x64d   : > { %v1407_v49 = vsub.f32 %v1406_v34, %v1320_v37 }
 0x64f   : > { %vm1408_vm5 = vcmp.gt.f32.partialorder %v1407_v49, 1.0  ;;  %v1412_v35 = vsel %vm1411_vm4, %v1407_v49, %v1325_v6  ;;  %v1326_v47 = vld [vmem:[#allocation3 + $0x18] sm:$0xff] }
 0x650   : > { %v1885_v26 = vsel %vm1408_vm5, 1.0, %v2073_v44  ;;  %1414 = vst.msk [vmem:[#allocation3 + $0x10] sm:$0xff] %vm338_vm2, %v1412_v35  ;;  %v1416_v8 = vmul.f32 0.9, %v1326_v47  ;;  %vm1463_vm5 = vcmask 917248  }
 0x651   : > { %v1413_v36 = vsel %vm1411_vm4, %v1885_v26, %v1320_v37  ;;  %v2732_v33 = vld [vmem:[#allocation2 + $0x18] sm:$0xff]  ;;  %vm1309_vm4 = vcmask 786048  }
 0x652   : > { %1415 = vst.msk [vmem:[#allocation2 + $0x10] sm:$0xff] %vm338_vm2, %v1413_v36  ;;  %v691_v32 = vpop.permute.xlu0 %690  ;;  %v1329_v41 = vpack.c.bf16 %v2732_v33, %v1320_v37 }
 0x653   : > { %694 = vst.msk [vmem:[%s2175_s16] sm:$0xff] %vm693_vm6, %v691_v32 }
 0x654   : > { %1878 = vmatmul.msk.bf16.gmra.mxu2 %vm338_vm2, %v1329_v41  ;;  %1881 = vmatmul.msk.bf16.gmra.mxu3 %vm338_vm2, %v1329_v41 }
 0x659   : > { %v1474_v18 = vld [vmem:[#allocation2 + $0x10] sm:$0xff] }
 0x65a   : > { %v851_v4 = vpop.permute.xlu0 %850 }
 0x662   : > { %v1153_v29 = vpop.permute.xlu0 %1152 }
 0x664   : > { %1879 = vmatmul.msk.bf16.gmra.mxu2 %vm338_vm2, %v1330_v45  ;;  %1882 = vmatmul.msk.bf16.gmra.mxu3 %vm338_vm2, %v1330_v45 }
 0x66a   : > { %v1313_v32 = vpop.permute.xlu0 %1312 }
 0x6d7   : > { %v1354_v62 = vpop.f32.mrf.mxu2  ;;  %v1374_v43 = vpop.f32.mrf.mxu3 }
 0x6d8   : > { %v1355_v22 = vadd.f32 %v1354_v62, %v2278_v30 }
 0x6da   : > { %1418 = vrot.lane.b32.xlu1 %v1355_v22, %s2075_s15 }
 0x6df   : > { %v1356_v48 = vpop.f32.mrf.mxu2  ;;  %v1375_v51 = vpop.f32.mrf.mxu3 }
 0x6e0   : > { %v1357_v52 = vadd.f32 %v1356_v48, %v2278_v30 }
 0x6e2   : > { %1433 = vrot.lane.b32.xlu2 %v1357_v52, %s2076_s26  ;;  %696 = vrot.lane.b32.xlu1 %v2442_v50, %s2077_s14  ;;  %s1658_s14 = sshll.u32 %s1654_s29, 4  ;;  %s1996_s29 = scalar_lea.hbm %s2888_s6, 16  ;;  %s1659_s14 = int_to_ptr.hbm [resolvable:$true] %s1658_s14 }
 0x6e7   : > { %v1359_v60 = vpop.f32.mrf.mxu2  ;;  %v1377_v61 = vpop.f32.mrf.mxu3 }
 0x6e8   : > { %v1378_v0 = vadd.f32 %v1377_v61, %v2419_v7 }
 0x6ea   : > { %v1449_v2 = vadd.f32 %v1448_v55, %v1378_v0  ;;  %1557 = vrot.lane.b32.xlu2 %v1506_v63, %s2074_s25  ;;  %998 = vrot.lane.b32.xlu1 %v2589_v42, %s2079_s28  ;;  %v1327_v42 = vld [vmem:[#allocation3 + $0x20] sm:$0xff] }
 0x6eb   : > { %v1431_v25 = vmul.f32 0.9, %v1327_v42 }
 0x6ec   : > { %v1450_v46 = vsub.f32 %v1449_v2, %v1447_v3 }
 0x6ee   : > { %vm1451_vm9 = vcmp.gt.f32.partialorder %v1450_v46, 1.0  ;;  %v1455_v50 = vsel %vm1454_vm7, %v1450_v46, %v1446_v58 }
 0x6ef   : > { %v1360_v10 = vpop.f32.mrf.mxu2  ;;  %v1379_v59 = vpop.f32.mrf.mxu3  ;;  %v1888_v13 = vsel %vm1451_vm9, 1.0, %v2073_v44  ;;  %1457 = vst.msk [vmem:[#allocation5] sm:$0xff] %vm541_vm8, %v1455_v50  ;;  %vm1580_vm9 = vcmp.ge.s32.totalorder %v2707_v5, 3 }
 0x6f0   : > { %v1456_v57 = vsel %vm1454_vm7, %v1888_v13, %v1447_v3 }
 0x6f1   : > { %1458 = vst.msk [vmem:[#allocation4] sm:$0xff] %vm541_vm8, %v1456_v57 }
 0x6f2   : > { %844 = vrot.lane.b32.xlu2 %v2526_v19, %s2076_s26  ;;  %1158 = vrot.lane.b32.xlu1 %v2644_v56, %s2075_s15  ;;  %v1479_v19 = vld [vmem:[#allocation3 + $0x10] sm:$0xff] }
 0x6f3   : > { %v1555_v17 = vmul.f32 0.9, %v1479_v19 }
 0x6f6   : > { %v1600_v58 = vld [vmem:[#allocation5] sm:$0xff] }
 0x6f7   : > { %v1602_v0 = vmul.f32 0.9, %v1600_v58 }
 0x6f8   : > { %v1601_v2 = vld [vmem:[#allocation4] sm:$0xff] }
 0x6fa   : > { %1004 = vrot.lane.b32.xlu2 %v2584_v38, %s2079_s28  ;;  %1460 = vrot.lane.b32.xlu1 %v1456_v57, %s2074_s25  ;;  %s1630_s28 = scalar_lea.sflag [#allocation9], %s2165_s9 }
 0x702   : > { %1306 = vrot.lane.b32.xlu2 %v2700_v1, %s2078_s19  ;;  %s2829_s19 = sshll.u32 %s1640_s12, 4  ;;  %s1645_s19 = int_to_ptr.hbm [resolvable:$true] %s2829_s19 }
 0x70a   : > { %1466 = vrot.lane.b32.xlu2 %v1455_v50, %s2074_s25  ;;  %s2080_s25 = smov 112  }
 0x73c   : > { %v1434_v14 = vpop.permute.xlu2 %1433 }
 0x73d   : > { %v1436_v40 = vadd.f32 %v1434_v14, %v1431_v25 }
 0x73f   : > { %v1437_v12 = vsub.f32 %v1436_v40, %v1322_v54 }
 0x741   : > { %vm1438_vm11 = vcmp.gt.f32.partialorder %v1437_v12, 1.0  ;;  %v1442_v23 = vsel %vm1441_vm10, %v1437_v12, %v1327_v42 }
 0x742   : > { %v1887_v56 = vsel %vm1438_vm11, 1.0, %v2073_v44  ;;  %1444 = vst.msk [vmem:[#allocation3 + $0x20] sm:$0xff] %vm338_vm2, %v1442_v23 }
 0x743   : > { %v1443_v38 = vsel %vm1441_vm10, %v1887_v56, %v1322_v54 }
 0x744   : > { %1445 = vst.msk [vmem:[#allocation2 + $0x20] sm:$0xff] %vm338_vm2, %v1443_v38  ;;  %v1558_v1 = vpop.permute.xlu2 %1557 }
 0x745   : > { %v1560_v39 = vadd.f32 %v1558_v1, %v1555_v17 }
 0x747   : > { %v1561_v11 = vsub.f32 %v1560_v39, %v1474_v18 }
 0x749   : > { %vm1562_vm13 = vcmp.gt.f32.partialorder %v1561_v11, 1.0  ;;  %v1566_v21 = vsel %vm1565_vm12, %v1561_v11, %v1479_v19  ;;  %v1481_v14 = vld [vmem:[#allocation3 + $0x20] sm:$0xff] }
 0x74a   : > { %v1897_v24 = vsel %vm1562_vm13, 1.0, %v2073_v44  ;;  %1568 = vst.msk [vmem:[#allocation3 + $0x10] sm:$0xff] %vm338_vm2, %v1566_v21  ;;  %v1585_v23 = vmul.f32 0.9, %v1481_v14 }
 0x74b   : > { %v1567_v27 = vsel %vm1565_vm12, %v1897_v24, %v1474_v18  ;;  %v1476_v54 = vld [vmem:[#allocation2 + $0x20] sm:$0xff]  ;;  %vm1617_vm12 = vcmask 1048448  }
 0x74c   : > { %1569 = vst.msk [vmem:[#allocation2 + $0x10] sm:$0xff] %vm338_vm2, %v1567_v27  ;;  %v1419_v15 = vpop.permute.xlu1 %1418  ;;  %v845_v28 = vpop.permute.xlu2 %844  ;;  %v1484_v62 = vpack.c.bf16 %v1476_v54, %v1476_v54 }
 0x74d   : > { %v1421_v6 = vadd.f32 %v1419_v15, %v1416_v8  ;;  %848 = vst.msk [vmem:[%s2175_s16] sm:$0xff] %vm847_vm14, %v845_v28 }
 0x74f   : > { %v1422_v31 = vsub.f32 %v1421_v6, %v2732_v33 }
 0x751   : > { %vm1423_vm0 = vcmp.gt.f32.partialorder %v1422_v31, 1.0  ;;  %v1427_v16 = vsel %vm1426_vm15, %v1422_v31, %v1326_v47 }
 0x752   : > { %v1886_v9 = vsel %vm1423_vm0, 1.0, %v2073_v44  ;;  %1429 = vst.msk [vmem:[#allocation3 + $0x18] sm:$0xff] %vm338_vm2, %v1427_v16 }
 0x753   : > { %v1428_v20 = vsel %vm1426_vm15, %v1886_v9, %v2732_v33 }
 0x754   : > { %1430 = vst.msk [vmem:[#allocation2 + $0x18] sm:$0xff] %vm338_vm2, %v1428_v20  ;;  %v697_v34 = vpop.permute.xlu1 %696  ;;  %v1005_v37 = vpop.permute.xlu2 %1004 }
 0x755   : > { %699 = vst.msk [vmem:[%s2177_s17] sm:$0xff] %vm693_vm6, %v697_v34  ;;  %vm1608_vm6 = vcmp.ge.s32.totalorder %v2707_v5, 5 }
 0x756   : > { %853 = vst.msk [vmem:[%s2177_s17] sm:$0xff] %vm847_vm14, %v851_v4 }
 0x757   : > { %1007 = vst.msk [vmem:[%s2177_s17] sm:$0xff] %vm1001_vm1, %v1005_v37 }
 0x75b   : > { %v2786_v49 = vld [vmem:[#allocation2 + $0x18] sm:$0xff] }
 0x75c   : > { %v999_v35 = vpop.permute.xlu1 %998  ;;  %v1307_v26 = vpop.permute.xlu2 %1306  ;;  %v1483_v36 = vpack.c.bf16 %v2786_v49, %v1474_v18 }
 0x75d   : > { %1002 = vst.msk [vmem:[%s2175_s16] sm:$0xff] %vm1001_vm1, %v999_v35 }
 0x75e   : > { %1156 = vst.msk [vmem:[%s2175_s16] sm:$0xff] %vm1155_vm3, %v1153_v29  ;;  %1890 = vmatmul.msk.bf16.gmra.mxu0 %vm338_vm2, %v1483_v36  ;;  %1893 = vmatmul.msk.bf16.gmra.mxu1 %vm338_vm2, %v1483_v36 }
 0x75f   : > { %1310 = vst.msk [vmem:[%s2175_s16] sm:$0xff] %vm1309_vm4, %v1307_v26 }
 0x764   : > { %v1159_v33 = vpop.permute.xlu1 %1158  ;;  %v1467_v41 = vpop.permute.xlu2 %1466 }
 0x765   : > { %1161 = vst.msk [vmem:[%s2177_s17] sm:$0xff] %vm1155_vm3, %v1159_v33 }
 0x766   : > { %1315 = vst.msk [vmem:[%s2177_s17] sm:$0xff] %vm1309_vm4, %v1313_v32 }
 0x767   : > { %1469 = vst.msk [vmem:[%s2177_s17] sm:$0xff] %vm1463_vm5, %v1467_v41 }
 0x76c   : > { %v1461_v45 = vpop.permute.xlu1 %1460 }
 0x76d   : > { %1464 = vst.msk [vmem:[%s2175_s16] sm:$0xff] %vm1463_vm5, %v1461_v45 }
 0x76e   : > { %1891 = vmatmul.msk.bf16.gmra.mxu0 %vm338_vm2, %v1484_v62  ;;  %1894 = vmatmul.msk.bf16.gmra.mxu1 %vm338_vm2, %v1484_v62 }
 0x7db   : > { %v1508_v43 = vpop.f32.mrf.mxu0  ;;  %v1528_v22 = vpop.f32.mrf.mxu1 }
 0x7dc   : > { %v1509_v48 = vadd.f32 %v1508_v43, %v2278_v30 }
 0x7de   : > { %1572 = vrot.lane.b32.xlu0 %v1509_v48, %s2075_s15 }
 0x7e3   : > { %v1510_v51 = vpop.f32.mrf.mxu0  ;;  %v1529_v52 = vpop.f32.mrf.mxu1 }
 0x7e4   : > { %v1511_v53 = vadd.f32 %v1510_v51, %v2278_v30 }
 0x7e6   : > { %1587 = vrot.lane.b32.xlu1 %v1511_v53, %s2076_s26 }
 0x7eb   : > { %v1513_v60 = vpop.f32.mrf.mxu0  ;;  %v1531_v61 = vpop.f32.mrf.mxu1 }
 0x7ec   : > { %v1532_v63 = vadd.f32 %v1531_v61, %v2419_v7  ;;  %v1480_v7 = vld [vmem:[#allocation3 + $0x18] sm:$0xff] }
 0x7ed   : > { %v1570_v13 = vmul.f32 0.9, %v1480_v7 }
 0x7ee   : > { %v1603_v55 = vadd.f32 %v1602_v0, %v1532_v63 }
 0x7f0   : > { %v1604_v3 = vsub.f32 %v1603_v55, %v1601_v2 }
 0x7f2   : > { %v1609_v46 = vsel %vm1608_vm6, %v1604_v3, %v1600_v58  ;;  %vm1605_vm7 = vcmp.gt.f32.partialorder %v1604_v3, 1.0 }
 0x7f3   : > { %v1514_v50 = vpop.f32.mrf.mxu0  ;;  %v1533_v10 = vpop.f32.mrf.mxu1  ;;  %1620 = vrot.lane.b32.xlu1 %v1609_v46, %s2080_s25  ;;  %1611 = vst.msk [vmem:[#allocation5] sm:$0xff] %vm541_vm8, %v1609_v46  ;;  %v1900_v30 = vsel %vm1605_vm7, 1.0, %v2073_v44 }
 0x7f4   : > { %v1610_v59 = vsel %vm1608_vm6, %v1900_v30, %v1601_v2 }
 0x7f5   : > { %1614 = vrot.lane.b32.xlu0 %v1610_v59, %s2080_s25  ;;  %1612 = vst.msk [vmem:[#allocation4] sm:$0xff] %vm541_vm8, %v1610_v59  ;;  %vm1595_vm8 = vcmp.ge.s32.totalorder %v2707_v5, 4  ;;  %s1990_s25 = sshra.s32 %s1659_s14, 4  ;;  %s1991_s25 = int_to_ptr.hbm [resolvable:$true] %s1990_s25 }
 0x7f6   : > { %s1992_s20 = scalar_lea.hbm %s1991_s25, 8  ;;  %p1997_p1 = scmp.lt.s32.totalorder %s1991_s25, %s2888_s6 }
 0x7f7   : > { %p1993_p12 = scmp.ne.s32.totalorder %s1991_s25, %s1992_s20  ;;  %p1998_p2 = scmp.lt.s32.totalorder %s1996_s29, %s1992_s20 }
 0x7f9   : > { %p1994_p13 = pnand %p1993_p12, %p2154_p5  ;;  %p1999_p3 = por %p1998_p2, %p1997_p1 }
 0x7fb   : > { %p1995_p0 = pneg %p1994_p13 }
 0x7fd   : > { %p2000_p4 = pnand %p1999_p3, %p1995_p0 }
 0x850   : > { %v1573_v57 = vpop.permute.xlu0 %1572 }
 0x851   : > { %v1575_v42 = vadd.f32 %v1573_v57, %v1570_v13 }
 0x853   : > { %v1576_v25 = vsub.f32 %v1575_v42, %v2786_v49 }
 0x855   : > { %vm1577_vm10 = vcmp.gt.f32.partialorder %v1576_v25, 1.0  ;;  %v1581_v40 = vsel %vm1580_vm9, %v1576_v25, %v1480_v7 }
 0x856   : > { %v1898_v12 = vsel %vm1577_vm10, 1.0, %v2073_v44  ;;  %1583 = vst.msk [vmem:[#allocation3 + $0x18] sm:$0xff] %vm338_vm2, %v1581_v40 }
 0x857   : > { %v1582_v19 = vsel %vm1580_vm9, %v1898_v12, %v2786_v49 }
 0x858   : > { %1584 = vst.msk [vmem:[#allocation2 + $0x18] sm:$0xff] %vm338_vm2, %v1582_v19  ;;  %v1588_v56 = vpop.permute.xlu1 %1587 }
 0x859   : > { %v1590_v38 = vadd.f32 %v1588_v56, %v1585_v23 }
 0x85b   : > { %v1591_v17 = vsub.f32 %v1590_v38, %v1476_v54 }
 0x85d   : > { %vm1592_vm11 = vcmp.gt.f32.partialorder %v1591_v17, 1.0  ;;  %v1596_v1 = vsel %vm1595_vm8, %v1591_v17, %v1481_v14 }
 0x85e   : > { %v1899_v39 = vsel %vm1592_vm11, 1.0, %v2073_v44  ;;  %1598 = vst.msk [vmem:[#allocation3 + $0x20] sm:$0xff] %vm338_vm2, %v1596_v1 }
 0x85f   : > { %v1597_v18 = vsel %vm1595_vm8, %v1899_v39, %v1476_v54 }
 0x860   : > { %1599 = vst.msk [vmem:[#allocation2 + $0x20] sm:$0xff] %vm338_vm2, %v1597_v18 }
 0x865   : > { %v1621_v44 = vpop.permute.xlu1 %1620 }
 0x866   : > { %1623 = vst.msk [vmem:[%s2177_s17] sm:$0xff] %vm1617_vm12, %v1621_v44 }
 0x867   : > { %v1615_v5 = vpop.permute.xlu0 %1614 }
 0x868   : > { %2003 = shalt.err (!%p2000_p4)
}
 0x869   : > { %1923 = dma.vmem_to_hbm [thread:$0]  (%p2154_p5), %s1657_s13, 128, %s1659_s14, %s1630_s28   ;;  %1618 = vst.msk [vmem:[%s2175_s16] sm:$0xff] %vm1617_vm12, %v1615_v5 }
 0x86a   : > { %s1625_s17 = scalar_lea.sflag [#allocation7], %s2165_s9  ;;  %s2018_s12 = sshra.s32 %s1645_s19, 4  ;;  %s2019_s12 = int_to_ptr.hbm [resolvable:$true] %s2018_s12 }
 0x86b   : > { %s2020_s15 = scalar_lea.hbm %s2019_s12, 8  ;;  %s2024_s26 = scalar_lea.hbm %s2887_s5, 16 }
 0x86c   : > { %p2021_p7 = scmp.ne.s32.totalorder %s2019_s12, %s2020_s15  ;;  %p2025_p10 = scmp.lt.s32.totalorder %s2019_s12, %s2887_s5 }
 0x86d   : > { %p2026_p11 = scmp.lt.s32.totalorder %s2024_s26, %s2020_s15 }
 0x86e   : > { %p2022_p8 = pnand %p2021_p7, %p2154_p5 }
 0x86f   : > { %p2027_p12 = por %p2026_p11, %p2025_p10 }
 0x870   : > { %p2023_p9 = pneg %p2022_p8 }
 0x872   : > { %p2028_p13 = pnand %p2027_p12, %p2023_p9 }
 0x874   : > { %2031 = shalt.err (!%p2028_p13)
}
 0x875   : > { %1922 = dma.vmem_to_hbm [thread:$0]  (%p2154_p5), %s2833_s18, 128, %s1645_s19, %s1625_s17  }
 0x876 PF: > { %p1933_p0 = scmp.ge.s32.totalorder %s2070_s24, 2  ;;  %s1670_s9 = sand.u32 1, %s2058_s21  }
 0x877   : > { %s1671_s16 = scalar_lea.sflag [#allocation7], %s1670_s9 }
 0x878   : > { %p1927_p1 = pnand %p1933_p0, %p2158_p6 }
 0x87a   : > { %p1928_p2 = pneg %p1927_p1 }
 0x87c   : > { %2049 = dma.done.wait (%p1928_p2), %s1671_s16, 128  }
 0x87d   : > { %2051 = vsyncadd (%p1928_p2), %s1671_s16, 4294967168  ;;  %s1681_s13 = scalar_lea.sflag [#allocation9], %s1670_s9 }
 0x87e   : > { %2053 = dma.done.wait (%p1928_p2), %s1681_s13, 128  }
 0x87f   : > { %2055 = vsyncadd (%p1928_p2), %s1681_s13, 4294967168  ;;  %p20_p5 = scmp.ge.s32.totalorder %s2141_s27, 4   ;;  %s2891_s21 = smov %s2062_s22 }
 0x880   : > { %s2892_s22 = smov %s2066_s23  ;;  %s2893_s23 = smov %s2152_s30 }
 0x881   : > { %s2894_s24 = smov %s2141_s27  ;;  %22 = sbr.rel (!%p20_p5) target bundleno = 5 (0x5), region = 96 }
 0x886   :  { %1687 = vsyncpa [#allocation7], 1 }
 0x887   :  { %1689 = vsyncpa [#allocation7 + $0x1], 1 }
 0x888   :  { %1690 = vsyncpa [#allocation9], 1 }
 0x889   :  { %1692 = vsyncpa [#allocation9 + $0x1], 1 }

</bundles_post_ra>
